<compile_context>
chip_gen: v7x
topology: tpu7x:2x2x1
jax: 0.10.0
libtpu: 0.0.40
codegen_flags: <defaults>
</compile_context>

<pallas_src>
import functools

import jax
import jax.numpy as jnp
from jax import lax
from jax.experimental import pallas as pl
from jax.experimental.pallas import tpu as pltpu


# ----------------------------- Pallas kernels ------------------------------


def _conv_bias_act_kernel(w_ref, p_ref, b_ref, o_ref, *, relu):
    """(Cout, K)bf16 @ (K, bm)bf16 -> f32, + bias (Cout, 1), optional ReLU."""
    y = jnp.dot(w_ref[...], p_ref[...], preferred_element_type=jnp.float32)
    y = y + b_ref[...]
    if relu:
        y = jnp.maximum(y, 0.0)
    o_ref[...] = y


def _block_tail_kernel(p2_ref, w2_ref, b2_ref, idn_ref, pool_ref, y_ref, pk_ref):
    """conv2 GEMM + bias + residual add + ReLU + prompt avg-pool (as matmul)."""
    y = jnp.dot(w2_ref[...], p2_ref[...], preferred_element_type=jnp.float32)
    y = jnp.maximum(y + b2_ref[...] + idn_ref[...], 0.0)
    y_ref[...] = y
    pk_ref[...] = jnp.dot(y, pool_ref[...], preferred_element_type=jnp.float32)


def _block_tail_ds_kernel(p2_ref, w2_ref, b2_ref, xd_ref, wd_ref, bd_ref,
                          pool_ref, y_ref, pk_ref):
    """Same as _block_tail_kernel, residual path = fused 1x1 downsample conv+BN."""
    idn = jnp.dot(wd_ref[...], xd_ref[...], preferred_element_type=jnp.float32)
    idn = idn + bd_ref[...]
    y = jnp.dot(w2_ref[...], p2_ref[...], preferred_element_type=jnp.float32)
    y = jnp.maximum(y + b2_ref[...] + idn, 0.0)
    y_ref[...] = y
    pk_ref[...] = jnp.dot(y, pool_ref[...], preferred_element_type=jnp.float32)


def _max9_kernel(x_ref, o_ref):
    """Elementwise max over 9 stacked lane-dense slabs (pure VPU)."""
    m = x_ref[0]
    for t in range(1, 9):
        m = jnp.maximum(m, x_ref[t])
    o_ref[...] = m


def _full_spec(shape):
    # whole-array block (used only for small operands that easily fit VMEM)
    return pl.BlockSpec(shape, lambda i: (0,) * len(shape))


# ------------------------------ Pallas wrappers ------------------------------


def pallas_conv_bias_act(w, p, b, *, relu=True, block_m=512):
    """Fused conv(as GEMM)+bias(+ReLU); tiled over the spatial axis when large."""
    cout, k = w.shape
    _, m = p.shape
    bm = block_m if m % block_m == 0 else m
    return pl.pallas_call(
        functools.partial(_conv_bias_act_kernel, relu=relu),
        grid=(m // bm,),
        in_specs=[
            pl.BlockSpec((cout, k), lambda i: (0, 0)),
            pl.BlockSpec((k, bm), lambda i: (0, i)),
            pl.BlockSpec((cout, 1), lambda i: (0, 0)),
        ],
        out_specs=pl.BlockSpec((cout, bm), lambda i: (0, i)),
        out_shape=jax.ShapeDtypeStruct((cout, m), jnp.float32),
        compiler_params=pltpu.CompilerParams(dimension_semantics=("parallel",)),
    )(w, p, b)


def pallas_block_tail(p2, w2, b2, idn, pool):
    _, m = p2.shape
    cout = w2.shape[0]
    b4 = pool.shape[1]
    return pl.pallas_call(
        _block_tail_kernel,
        grid=(1,),
        in_specs=[_full_spec(p2.shape), _full_spec(w2.shape), _full_spec(b2.shape),
                  _full_spec(idn.shape), _full_spec(pool.shape)],
        out_specs=(_full_spec((cout, m)), _full_spec((cout, b4))),
        out_shape=(jax.ShapeDtypeStruct((cout, m), jnp.float32),
                   jax.ShapeDtypeStruct((cout, b4), jnp.float32)),
    )(p2, w2, b2, idn, pool)


def pallas_block_tail_ds(p2, w2, b2, xd, wd, bd, pool):
    _, m = p2.shape
    cout = w2.shape[0]
    b4 = pool.shape[1]
    return pl.pallas_call(
        _block_tail_ds_kernel,
        grid=(1,),
        in_specs=[_full_spec(p2.shape), _full_spec(w2.shape), _full_spec(b2.shape),
                  _full_spec(xd.shape), _full_spec(wd.shape), _full_spec(bd.shape),
                  _full_spec(pool.shape)],
        out_specs=(_full_spec((cout, m)), _full_spec((cout, b4))),
        out_shape=(jax.ShapeDtypeStruct((cout, m), jnp.float32),
                   jax.ShapeDtypeStruct((cout, b4), jnp.float32)),
    )(p2, w2, b2, xd, wd, bd, pool)


def pallas_max9(stacked):
    _, r, c = stacked.shape
    return pl.pallas_call(
        _max9_kernel,
        grid=(1,),
        in_specs=[_full_spec(stacked.shape)],
        out_specs=_full_spec((r, c)),
        out_shape=jax.ShapeDtypeStruct((r, c), jnp.float32),
    )(stacked)


# ------------------------------ JAX glue ops --------------------------------


def patches_cm(x, k, stride, padding):
    """x: (C, B, H, W) -> patch matrix (C*k*k, B*Ho*Wo); feature order (C, kh, kw)."""
    c, b, h, w = x.shape
    ho = (h + 2 * padding - k) // stride + 1
    wo = (w + 2 * padding - k) // stride + 1
    p = lax.conv_general_dilated_patches(
        x, (k, k), (stride, stride),
        [(padding, padding), (padding, padding)],
        dimension_numbers=("CNHW", "OIHW", "CNHW"))
    return p.reshape(c * k * k, b * ho * wo), ho, wo


def max_pool_3x3_s2_p1(x):
    """x: (C, B, H, W) -> (C, B, Ho, Wo) via elementwise max of 9 shifted slabs."""
    c, b, h, w = x.shape
    ho = (h - 1) // 2 + 1
    wo = (w - 1) // 2 + 1
    xp = jnp.pad(x, ((0, 0), (0, 0), (1, 1), (1, 1)), constant_values=-jnp.inf)
    slabs = [xp[:, :, i:i + 2 * ho:2, j:j + 2 * wo:2].reshape(c * b, ho * wo)
             for i in range(3) for j in range(3)]
    out = pallas_max9(jnp.stack(slabs, axis=0))
    return out.reshape(c, b, ho, wo)


def pool_matrix(bsz, ft):
    """Constant (B*ft*ft, B*4) matrix = AvgPool2d(kernel=ft//2, stride=ft//2) -> 2x2.

    Built from static shapes only, so it is constant-folded by XLA under jit.
    """
    k = ft // 2
    m = jnp.arange(bsz * ft * ft)
    b = m // (ft * ft)
    rem = m % (ft * ft)
    qi = (rem // ft) // k
    qj = (rem % ft) // k
    col = b * 4 + qi * 2 + qj
    onehot = (col[:, None] == jnp.arange(bsz * 4)[None, :]).astype(jnp.float32)
    return onehot / float(k * k)


def basic_block(x, p, stride, cout):
    """x: (Cin, B, H, W) -> (y: (Cout, B, Ho, Wo), pooled prompt_kv: (Cout, B*4))."""
    cin, bsz, h, w = x.shape
    # conv1(3x3, stride) + BN(folded) + ReLU
    p1, ho, wo = patches_cm(x.astype(jnp.bfloat16), 3, stride, 1)
    hidden = pallas_conv_bias_act(p["c1_w"], p1, p["c1_b"], relu=True)
    hidden = hidden.reshape(cout, bsz, ho, wo)
    # fused tail: conv2 + BN + (optional 1x1 downsample) + residual + ReLU + AvgPool
    p2, _, _ = patches_cm(hidden.astype(jnp.bfloat16), 3, 1, 1)
    pool = pool_matrix(bsz, ho)
    if "dw" in p:
        xd = x[:, :, ::stride, ::stride].reshape(cin, bsz * ho * wo)
        y, pk = pallas_block_tail_ds(p2, p["c2_w"], p["c2_b"],
                                     xd.astype(jnp.bfloat16), p["dw"], p["db"], pool)
    else:
        y, pk = pallas_block_tail(p2, p["c2_w"], p["c2_b"],
                                  x.reshape(cin, bsz * h * w), pool)
    return y.reshape(cout, bsz, ho, wo), pk


# static architecture config (NOT part of the jitted params pytree)
ARCH = (
    ("layer1", 8, 8, 1),
    ("layer2", 8, 16, 2),
    ("layer3", 16, 32, 2),
    ("layer4", 32, 64, 2),
)


def my_resnet_forward(params, x):
    """x: (B, 3, H, W) NCHW -> prompt guids (B, 4, sum(stage channels))."""
    bsz = x.shape[0]
    x = jnp.transpose(x, (1, 0, 2, 3))  # channel-major (C, B, H, W), once
    # conv1(7x7,s2,p3)+bn+relu, then maxpool(3x3,s2,p1)
    p0, ho, wo = patches_cm(x.astype(jnp.bfloat16), 7, 2, 3)
    x = pallas_conv_bias_act(params["conv1_w"], p0, params["conv1_b"], relu=True)
    x = x.reshape(-1, bsz, ho, wo)
    x = max_pool_3x3_s2_p1(x)
    # layer1..layer4, collecting prompt_kv (AvgPool to 2x2) per stage
    pooled = []
    for name, _cin, cout, stride in ARCH:
        x, pk = basic_block(x, params[name], stride, cout)
        pooled.append(pk.reshape(cout, bsz, 4).transpose(1, 0, 2))  # (B, Cout, 4)
    # torch: cat(dim=1) over (B, C, 2, 2) then .view(B, 4, -1)
    return jnp.concatenate(pooled, axis=1).reshape(bsz, 4, -1)


# --------------------------- deterministic params ---------------------------


def _he(key, shape):
    fan_in = shape[1] * shape[2] * shape[3]
    return jax.random.normal(key, shape, jnp.float32) * jnp.sqrt(2.0 / fan_in)


def _bn(key, c, eps=1e-5):
    k1, k2, k3, k4 = jax.random.split(key, 4)
    gamma = 1.0 + 0.1 * jax.random.normal(k1, (c,), jnp.float32)
    beta = 0.1 * jax.random.normal(k2, (c,), jnp.float32)
    mean = 0.1 * jax.random.normal(k3, (c,), jnp.float32)
    var = 1.0 + 0.1 * jax.random.uniform(k4, (c,), jnp.float32)
    scale = gamma / jnp.sqrt(var + eps)
    bias = beta - mean * scale
    return scale, bias


def _fold(w, scale, bias):
    """One-time fold of BN(inference) scale into the conv weight; bf16 GEMM weight."""
    cout = w.shape[0]
    wf = (w * scale[:, None, None, None]).reshape(cout, -1)
    return wf.astype(jnp.bfloat16), bias.reshape(cout, 1).astype(jnp.float32)


def _block_params(key, cin, cout, stride):
    ks = jax.random.split(key, 6)
    s1, b1 = _bn(ks[2], cout)
    s2, b2 = _bn(ks[3], cout)
    p = {}
    p["c1_w"], p["c1_b"] = _fold(_he(ks[0], (cout, cin, 3, 3)), s1, b1)
    p["c2_w"], p["c2_b"] = _fold(_he(ks[1], (cout, cout, 3, 3)), s2, b2)
    if stride != 1 or cin != cout:
        sd, bd = _bn(ks[5], cout)
        p["dw"], p["db"] = _fold(_he(ks[4], (cout, cin, 1, 1)), sd, bd)
    return p


def init_params(key):
    ks = jax.random.split(key, 6)
    s0, b0 = _bn(ks[1], 8)
    params = {}
    params["conv1_w"], params["conv1_b"] = _fold(_he(ks[0], (8, 3, 7, 7)), s0, b0)
    for i, (name, cin, cout, stride) in enumerate(ARCH):
        params[name] = _block_params(ks[2 + i], cin, cout, stride)
    return params


# --------------------------------- main --------------------------------------

if __name__ == "__main__":
    key = jax.random.PRNGKey(0)
    pkey, xkey = jax.random.split(key)
    params = init_params(pkey)
    # small synthetic image batch: (B=2, C=3, H=64, W=64), NCHW like the PyTorch module
    x = jax.random.normal(xkey, (2, 3, 64, 64), jnp.float32)

    out = jax.jit(my_resnet_forward)(params, x)
    out = jax.block_until_ready(out)

    # channels after layers 1..4: 8+16+32+64 = 120, each pooled to 2x2 -> (B, 4, 120)
    assert out.shape == (2, 4, 120), out.shape
    assert out.dtype == jnp.float32
    assert bool(jnp.all(jnp.isfinite(out)))
    print("KERNEL_OK")
</pallas_src>

<mosaic_0001>
module attributes {stable_mosaic.version = 11 : i64} {
  func.func @_conv_bias_act_kernel(%arg0: i32, %arg1: memref<8x147xbf16, #tpu.memory_space<vmem>>, %arg2: memref<147x512xbf16, #tpu.memory_space<vmem>>, %arg3: memref<8x1xf32, #tpu.memory_space<vmem>>, %arg4: memref<8x512xf32, #tpu.memory_space<vmem>>) attributes {dimension_semantics = [#tpu.dimension_semantics<parallel>], iteration_bounds = array<i64: 4>, scalar_prefetch = 0 : i64, scratch_operands = 0 : i64, tpu.core_type = #tpu.core_type<tc>, window_params = [{pipeline_mode = #tpu.pipeline_mode<synchronous>, transform_indices = @transform_0, window_bounds = array<i64: 8, 147>}, {transform_indices = @transform_1, window_bounds = array<i64: 147, 512>}, {pipeline_mode = #tpu.pipeline_mode<synchronous>, transform_indices = @transform_2, window_bounds = array<i64: 8, 1>}, {transform_indices = @transform_3, window_bounds = array<i64: 8, 512>}]} {
    %c0 = arith.constant 0 : index
    %c0_0 = arith.constant 0 : index
    %0 = vector.load %arg1[%c0, %c0_0] : memref<8x147xbf16, #tpu.memory_space<vmem>>, vector<8x147xbf16>
    %c0_1 = arith.constant 0 : index
    %c0_2 = arith.constant 0 : index
    %1 = vector.load %arg2[%c0_1, %c0_2] : memref<147x512xbf16, #tpu.memory_space<vmem>>, vector<147x512xbf16>
    %cst = arith.constant dense<0.000000e+00> : vector<8x512xf32>
    %2 = tpu.matmul %0, %1, %cst {dimension_numbers = #tpu.dot_dimension_numbers<[1], [0], [0], [1], [0, 0, 1, 1], [], []>} : vector<8x147xbf16>, vector<147x512xbf16>, vector<8x512xf32> -> vector<8x512xf32>
    %c0_3 = arith.constant 0 : index
    %c0_4 = arith.constant 0 : index
    %3 = vector.load %arg3[%c0_3, %c0_4] : memref<8x1xf32, #tpu.memory_space<vmem>>, vector<8x1xf32>
    %4 = vector.broadcast %3 : vector<8x1xf32> to vector<8x512xf32>
    %5 = arith.addf %2, %4 : vector<8x512xf32>
    %cst_5 = arith.constant 0.000000e+00 : f32
    %6 = vector.broadcast %cst_5 : f32 to vector<8x512xf32>
    %7 = arith.maximumf %5, %6 : vector<8x512xf32>
    %c0_6 = arith.constant 0 : index
    %c0_7 = arith.constant 0 : index
    %8 = vector.load %arg4[%c0_6, %c0_7] : memref<8x512xf32, #tpu.memory_space<vmem>>, vector<8x512xf32>
    tpu.vector_store %arg4[%c0_6, %c0_7], %7 {strides = array<i32>} : memref<8x512xf32, #tpu.memory_space<vmem>>, vector<8x512xf32>,
    return
  }
  func.func @transform_0(%arg0: i32) -> (i32, i32) {
    %c0_i32 = arith.constant 0 : i32
    %c0_i32_0 = arith.constant 0 : i32
    %c0_i32_1 = arith.constant 0 : i32
    return %c0_i32, %c0_i32_0 : i32, i32
  }
  func.func @transform_1(%arg0: i32) -> (i32, i32) {
    %c0_i32 = arith.constant 0 : i32
    %c0_i32_0 = arith.constant 0 : i32
    return %c0_i32, %arg0 : i32, i32
  }
  func.func @transform_2(%arg0: i32) -> (i32, i32) {
    %c0_i32 = arith.constant 0 : i32
    %c0_i32_0 = arith.constant 0 : i32
    %c0_i32_1 = arith.constant 0 : i32
    return %c0_i32, %c0_i32_0 : i32, i32
  }
  func.func @transform_3(%arg0: i32) -> (i32, i32) {
    %c0_i32 = arith.constant 0 : i32
    %c0_i32_0 = arith.constant 0 : i32
    return %c0_i32, %arg0 : i32, i32
  }
}

module attributes {stable_mosaic.version = 11 : i64} {
  func.func @_max9_kernel(%arg0: i32, %arg1: memref<9x16x256xf32, #tpu.memory_space<vmem>>, %arg2: memref<16x256xf32, #tpu.memory_space<vmem>>) attributes {dimension_semantics = [#tpu.dimension_semantics<arbitrary>], iteration_bounds = array<i64: 1>, scalar_prefetch = 0 : i64, scratch_operands = 0 : i64, tpu.core_type = #tpu.core_type<tc>, window_params = [{pipeline_mode = #tpu.pipeline_mode<synchronous>, transform_indices = @transform_0, window_bounds = array<i64: 9, 16, 256>}, {pipeline_mode = #tpu.pipeline_mode<synchronous>, transform_indices = @transform_1, window_bounds = array<i64: 16, 256>}]} {
    %c0 = arith.constant 0 : index
    %c0_0 = arith.constant 0 : index
    %c0_1 = arith.constant 0 : index
    %0 = vector.load %arg1[%c0, %c0_0, %c0_1] : memref<9x16x256xf32, #tpu.memory_space<vmem>>, vector<1x16x256xf32>
    %1 = vector.shape_cast %0 : vector<1x16x256xf32> to vector<16x256xf32>
    %c1 = arith.constant 1 : index
    %c0_2 = arith.constant 0 : index
    %c0_3 = arith.constant 0 : index
    %2 = vector.load %arg1[%c1, %c0_2, %c0_3] : memref<9x16x256xf32, #tpu.memory_space<vmem>>, vector<1x16x256xf32>
    %3 = vector.shape_cast %2 : vector<1x16x256xf32> to vector<16x256xf32>
    %4 = arith.maximumf %1, %3 : vector<16x256xf32>
    %c2 = arith.constant 2 : index
    %c0_4 = arith.constant 0 : index
    %c0_5 = arith.constant 0 : index
    %5 = vector.load %arg1[%c2, %c0_4, %c0_5] : memref<9x16x256xf32, #tpu.memory_space<vmem>>, vector<1x16x256xf32>
    %6 = vector.shape_cast %5 : vector<1x16x256xf32> to vector<16x256xf32>
    %7 = arith.maximumf %4, %6 : vector<16x256xf32>
    %c3 = arith.constant 3 : index
    %c0_6 = arith.constant 0 : index
    %c0_7 = arith.constant 0 : index
    %8 = vector.load %arg1[%c3, %c0_6, %c0_7] : memref<9x16x256xf32, #tpu.memory_space<vmem>>, vector<1x16x256xf32>
    %9 = vector.shape_cast %8 : vector<1x16x256xf32> to vector<16x256xf32>
    %10 = arith.maximumf %7, %9 : vector<16x256xf32>
    %c4 = arith.constant 4 : index
    %c0_8 = arith.constant 0 : index
    %c0_9 = arith.constant 0 : index
    %11 = vector.load %arg1[%c4, %c0_8, %c0_9] : memref<9x16x256xf32, #tpu.memory_space<vmem>>, vector<1x16x256xf32>
    %12 = vector.shape_cast %11 : vector<1x16x256xf32> to vector<16x256xf32>
    %13 = arith.maximumf %10, %12 : vector<16x256xf32>
    %c5 = arith.constant 5 : index
    %c0_10 = arith.constant 0 : index
    %c0_11 = arith.constant 0 : index
    %14 = vector.load %arg1[%c5, %c0_10, %c0_11] : memref<9x16x256xf32, #tpu.memory_space<vmem>>, vector<1x16x256xf32>
    %15 = vector.shape_cast %14 : vector<1x16x256xf32> to vector<16x256xf32>
    %16 = arith.maximumf %13, %15 : vector<16x256xf32>
    %c6 = arith.constant 6 : index
    %c0_12 = arith.constant 0 : index
    %c0_13 = arith.constant 0 : index
    %17 = vector.load %arg1[%c6, %c0_12, %c0_13] : memref<9x16x256xf32, #tpu.memory_space<vmem>>, vector<1x16x256xf32>
    %18 = vector.shape_cast %17 : vector<1x16x256xf32> to vector<16x256xf32>
    %19 = arith.maximumf %16, %18 : vector<16x256xf32>
    %c7 = arith.constant 7 : index
    %c0_14 = arith.constant 0 : index
    %c0_15 = arith.constant 0 : index
    %20 = vector.load %arg1[%c7, %c0_14, %c0_15] : memref<9x16x256xf32, #tpu.memory_space<vmem>>, vector<1x16x256xf32>
    %21 = vector.shape_cast %20 : vector<1x16x256xf32> to vector<16x256xf32>
    %22 = arith.maximumf %19, %21 : vector<16x256xf32>
    %c8 = arith.constant 8 : index
    %c0_16 = arith.constant 0 : index
    %c0_17 = arith.constant 0 : index
    %23 = vector.load %arg1[%c8, %c0_16, %c0_17] : memref<9x16x256xf32, #tpu.memory_space<vmem>>, vector<1x16x256xf32>
    %24 = vector.shape_cast %23 : vector<1x16x256xf32> to vector<16x256xf32>
    %25 = arith.maximumf %22, %24 : vector<16x256xf32>
    %c0_18 = arith.constant 0 : index
    %c0_19 = arith.constant 0 : index
    %26 = vector.load %arg2[%c0_18, %c0_19] : memref<16x256xf32, #tpu.memory_space<vmem>>, vector<16x256xf32>
    tpu.vector_store %arg2[%c0_18, %c0_19], %25 {strides = array<i32>} : memref<16x256xf32, #tpu.memory_space<vmem>>, vector<16x256xf32>,
    return
  }
  func.func @transform_0(%arg0: i32) -> (i32, i32, i32) {
    %c0_i32 = arith.constant 0 : i32
    %c0_i32_0 = arith.constant 0 : i32
    %c0_i32_1 = arith.constant 0 : i32
    %c0_i32_2 = arith.constant 0 : i32
    return %c0_i32, %c0_i32_0, %c0_i32_1 : i32, i32, i32
  }
  func.func @transform_1(%arg0: i32) -> (i32, i32) {
    %c0_i32 = arith.constant 0 : i32
    %c0_i32_0 = arith.constant 0 : i32
    %c0_i32_1 = arith.constant 0 : i32
    return %c0_i32, %c0_i32_0 : i32, i32
  }
}

module attributes {stable_mosaic.version = 11 : i64} {
  func.func @_conv_bias_act_kernel(%arg0: i32, %arg1: memref<8x72xbf16, #tpu.memory_space<vmem>>, %arg2: memref<72x512xbf16, #tpu.memory_space<vmem>>, %arg3: memref<8x1xf32, #tpu.memory_space<vmem>>, %arg4: memref<8x512xf32, #tpu.memory_space<vmem>>) attributes {dimension_semantics = [#tpu.dimension_semantics<parallel>], iteration_bounds = array<i64: 1>, scalar_prefetch = 0 : i64, scratch_operands = 0 : i64, tpu.core_type = #tpu.core_type<tc>, window_params = [{pipeline_mode = #tpu.pipeline_mode<synchronous>, transform_indices = @transform_0, window_bounds = array<i64: 8, 72>}, {transform_indices = @transform_1, window_bounds = array<i64: 72, 512>}, {pipeline_mode = #tpu.pipeline_mode<synchronous>, transform_indices = @transform_2, window_bounds = array<i64: 8, 1>}, {transform_indices = @transform_3, window_bounds = array<i64: 8, 512>}]} {
    %c0 = arith.constant 0 : index
    %c0_0 = arith.constant 0 : index
    %0 = vector.load %arg1[%c0, %c0_0] : memref<8x72xbf16, #tpu.memory_space<vmem>>, vector<8x72xbf16>
    %c0_1 = arith.constant 0 : index
    %c0_2 = arith.constant 0 : index
    %1 = vector.load %arg2[%c0_1, %c0_2] : memref<72x512xbf16, #tpu.memory_space<vmem>>, vector<72x512xbf16>
    %cst = arith.constant dense<0.000000e+00> : vector<8x512xf32>
    %2 = tpu.matmul %0, %1, %cst {dimension_numbers = #tpu.dot_dimension_numbers<[1], [0], [0], [1], [0, 0, 1, 1], [], []>} : vector<8x72xbf16>, vector<72x512xbf16>, vector<8x512xf32> -> vector<8x512xf32>
    %c0_3 = arith.constant 0 : index
    %c0_4 = arith.constant 0 : index
    %3 = vector.load %arg3[%c0_3, %c0_4] : memref<8x1xf32, #tpu.memory_space<vmem>>, vector<8x1xf32>
    %4 = vector.broadcast %3 : vector<8x1xf32> to vector<8x512xf32>
    %5 = arith.addf %2, %4 : vector<8x512xf32>
    %cst_5 = arith.constant 0.000000e+00 : f32
    %6 = vector.broadcast %cst_5 : f32 to vector<8x512xf32>
    %7 = arith.maximumf %5, %6 : vector<8x512xf32>
    %c0_6 = arith.constant 0 : index
    %c0_7 = arith.constant 0 : index
    %8 = vector.load %arg4[%c0_6, %c0_7] : memref<8x512xf32, #tpu.memory_space<vmem>>, vector<8x512xf32>
    tpu.vector_store %arg4[%c0_6, %c0_7], %7 {strides = array<i32>} : memref<8x512xf32, #tpu.memory_space<vmem>>, vector<8x512xf32>,
    return
  }
  func.func @transform_0(%arg0: i32) -> (i32, i32) {
    %c0_i32 = arith.constant 0 : i32
    %c0_i32_0 = arith.constant 0 : i32
    %c0_i32_1 = arith.constant 0 : i32
    return %c0_i32, %c0_i32_0 : i32, i32
  }
  func.func @transform_1(%arg0: i32) -> (i32, i32) {
    %c0_i32 = arith.constant 0 : i32
    %c0_i32_0 = arith.constant 0 : i32
    return %c0_i32, %arg0 : i32, i32
  }
  func.func @transform_2(%arg0: i32) -> (i32, i32) {
    %c0_i32 = arith.constant 0 : i32
    %c0_i32_0 = arith.constant 0 : i32
    %c0_i32_1 = arith.constant 0 : i32
    return %c0_i32, %c0_i32_0 : i32, i32
  }
  func.func @transform_3(%arg0: i32) -> (i32, i32) {
    %c0_i32 = arith.constant 0 : i32
    %c0_i32_0 = arith.constant 0 : i32
    return %c0_i32, %arg0 : i32, i32
  }
}

module attributes {stable_mosaic.version = 11 : i64} {
  func.func @_block_tail_kernel(%arg0: i32, %arg1: memref<72x512xbf16, #tpu.memory_space<vmem>>, %arg2: memref<8x72xbf16, #tpu.memory_space<vmem>>, %arg3: memref<8x1xf32, #tpu.memory_space<vmem>>, %arg4: memref<8x512xf32, #tpu.memory_space<vmem>>, %arg5: memref<512x8xf32, #tpu.memory_space<vmem>>, %arg6: memref<8x512xf32, #tpu.memory_space<vmem>>, %arg7: memref<8x8xf32, #tpu.memory_space<vmem>>) attributes {dimension_semantics = [#tpu.dimension_semantics<arbitrary>], iteration_bounds = array<i64: 1>, scalar_prefetch = 0 : i64, scratch_operands = 0 : i64, tpu.core_type = #tpu.core_type<tc>, window_params = [{pipeline_mode = #tpu.pipeline_mode<synchronous>, transform_indices = @transform_0, window_bounds = array<i64: 72, 512>}, {pipeline_mode = #tpu.pipeline_mode<synchronous>, transform_indices = @transform_1, window_bounds = array<i64: 8, 72>}, {pipeline_mode = #tpu.pipeline_mode<synchronous>, transform_indices = @transform_2, window_bounds = array<i64: 8, 1>}, {pipeline_mode = #tpu.pipeline_mode<synchronous>, transform_indices = @transform_3, window_bounds = array<i64: 8, 512>}, {pipeline_mode = #tpu.pipeline_mode<synchronous>, transform_indices = @transform_4, window_bounds = array<i64: 512, 8>}, {pipeline_mode = #tpu.pipeline_mode<synchronous>, transform_indices = @transform_5, window_bounds = array<i64: 8, 512>}, {pipeline_mode = #tpu.pipeline_mode<synchronous>, transform_indices = @transform_6, window_bounds = array<i64: 8, 8>}]} {
    %c0 = arith.constant 0 : index
    %c0_0 = arith.constant 0 : index
    %0 = vector.load %arg2[%c0, %c0_0] : memref<8x72xbf16, #tpu.memory_space<vmem>>, vector<8x72xbf16>
    %c0_1 = arith.constant 0 : index
    %c0_2 = arith.constant 0 : index
    %1 = vector.load %arg1[%c0_1, %c0_2] : memref<72x512xbf16, #tpu.memory_space<vmem>>, vector<72x512xbf16>
    %cst = arith.constant dense<0.000000e+00> : vector<8x512xf32>
    %2 = tpu.matmul %0, %1, %cst {dimension_numbers = #tpu.dot_dimension_numbers<[1], [0], [0], [1], [0, 0, 1, 1], [], []>} : vector<8x72xbf16>, vector<72x512xbf16>, vector<8x512xf32> -> vector<8x512xf32>
    %c0_3 = arith.constant 0 : index
    %c0_4 = arith.constant 0 : index
    %3 = vector.load %arg3[%c0_3, %c0_4] : memref<8x1xf32, #tpu.memory_space<vmem>>, vector<8x1xf32>
    %4 = vector.broadcast %3 : vector<8x1xf32> to vector<8x512xf32>
    %5 = arith.addf %2, %4 : vector<8x512xf32>
    %c0_5 = arith.constant 0 : index
    %c0_6 = arith.constant 0 : index
    %6 = vector.load %arg4[%c0_5, %c0_6] : memref<8x512xf32, #tpu.memory_space<vmem>>, vector<8x512xf32>
    %7 = arith.addf %5, %6 : vector<8x512xf32>
    %cst_7 = arith.constant 0.000000e+00 : f32
    %8 = vector.broadcast %cst_7 : f32 to vector<8x512xf32>
    %9 = arith.maximumf %7, %8 : vector<8x512xf32>
    %c0_8 = arith.constant 0 : index
    %c0_9 = arith.constant 0 : index
    %10 = vector.load %arg6[%c0_8, %c0_9] : memref<8x512xf32, #tpu.memory_space<vmem>>, vector<8x512xf32>
    tpu.vector_store %arg6[%c0_8, %c0_9], %9 {strides = array<i32>} : memref<8x512xf32, #tpu.memory_space<vmem>>, vector<8x512xf32>,
    %c0_10 = arith.constant 0 : index
    %c0_11 = arith.constant 0 : index
    %11 = vector.load %arg5[%c0_10, %c0_11] : memref<512x8xf32, #tpu.memory_space<vmem>>, vector<512x8xf32>
    %cst_12 = arith.constant dense<0.000000e+00> : vector<8x8xf32>
    %12 = tpu.matmul %9, %11, %cst_12 {dimension_numbers = #tpu.dot_dimension_numbers<[1], [0], [0], [1], [0, 0, 1, 1], [], []>} : vector<8x512xf32>, vector<512x8xf32>, vector<8x8xf32> -> vector<8x8xf32>
    %c0_13 = arith.constant 0 : index
    %c0_14 = arith.constant 0 : index
    %13 = vector.load %arg7[%c0_13, %c0_14] : memref<8x8xf32, #tpu.memory_space<vmem>>, vector<8x8xf32>
    tpu.vector_store %arg7[%c0_13, %c0_14], %12 {strides = array<i32>} : memref<8x8xf32, #tpu.memory_space<vmem>>, vector<8x8xf32>,
    return
  }
  func.func @transform_0(%arg0: i32) -> (i32, i32) {
    %c0_i32 = arith.constant 0 : i32
    %c0_i32_0 = arith.constant 0 : i32
    %c0_i32_1 = arith.constant 0 : i32
    return %c0_i32, %c0_i32_0 : i32, i32
  }
  func.func @transform_1(%arg0: i32) -> (i32, i32) {
    %c0_i32 = arith.constant 0 : i32
    %c0_i32_0 = arith.constant 0 : i32
    %c0_i32_1 = arith.constant 0 : i32
    return %c0_i32, %c0_i32_0 : i32, i32
  }
  func.func @transform_2(%arg0: i32) -> (i32, i32) {
    %c0_i32 = arith.constant 0 : i32
    %c0_i32_0 = arith.constant 0 : i32
    %c0_i32_1 = arith.constant 0 : i32
    return %c0_i32, %c0_i32_0 : i32, i32
  }
  func.func @transform_3(%arg0: i32) -> (i32, i32) {
    %c0_i32 = arith.constant 0 : i32
    %c0_i32_0 = arith.constant 0 : i32
    %c0_i32_1 = arith.constant 0 : i32
    return %c0_i32, %c0_i32_0 : i32, i32
  }
  func.func @transform_4(%arg0: i32) -> (i32, i32) {
    %c0_i32 = arith.constant 0 : i32
    %c0_i32_0 = arith.constant 0 : i32
    %c0_i32_1 = arith.constant 0 : i32
    return %c0_i32, %c0_i32_0 : i32, i32
  }
  func.func @transform_5(%arg0: i32) -> (i32, i32) {
    %c0_i32 = arith.constant 0 : i32
    %c0_i32_0 = arith.constant 0 : i32
    %c0_i32_1 = arith.constant 0 : i32
    return %c0_i32, %c0_i32_0 : i32, i32
  }
  func.func @transform_6(%arg0: i32) -> (i32, i32) {
    %c0_i32 = arith.constant 0 : i32
    %c0_i32_0 = arith.constant 0 : i32
    %c0_i32_1 = arith.constant 0 : i32
    return %c0_i32, %c0_i32_0 : i32, i32
  }
}

module attributes {stable_mosaic.version = 11 : i64} {
  func.func @_conv_bias_act_kernel(%arg0: i32, %arg1: memref<16x72xbf16, #tpu.memory_space<vmem>>, %arg2: memref<72x128xbf16, #tpu.memory_space<vmem>>, %arg3: memref<16x1xf32, #tpu.memory_space<vmem>>, %arg4: memref<16x128xf32, #tpu.memory_space<vmem>>) attributes {dimension_semantics = [#tpu.dimension_semantics<parallel>], iteration_bounds = array<i64: 1>, scalar_prefetch = 0 : i64, scratch_operands = 0 : i64, tpu.core_type = #tpu.core_type<tc>, window_params = [{pipeline_mode = #tpu.pipeline_mode<synchronous>, transform_indices = @transform_0, window_bounds = array<i64: 16, 72>}, {transform_indices = @transform_1, window_bounds = array<i64: 72, 128>}, {pipeline_mode = #tpu.pipeline_mode<synchronous>, transform_indices = @transform_2, window_bounds = array<i64: 16, 1>}, {transform_indices = @transform_3, window_bounds = array<i64: 16, 128>}]} {
    %c0 = arith.constant 0 : index
    %c0_0 = arith.constant 0 : index
    %0 = vector.load %arg1[%c0, %c0_0] : memref<16x72xbf16, #tpu.memory_space<vmem>>, vector<16x72xbf16>
    %c0_1 = arith.constant 0 : index
    %c0_2 = arith.constant 0 : index
    %1 = vector.load %arg2[%c0_1, %c0_2] : memref<72x128xbf16, #tpu.memory_space<vmem>>, vector<72x128xbf16>
    %cst = arith.constant dense<0.000000e+00> : vector<16x128xf32>
    %2 = tpu.matmul %0, %1, %cst {dimension_numbers = #tpu.dot_dimension_numbers<[1], [0], [0], [1], [0, 0, 1, 1], [], []>} : vector<16x72xbf16>, vector<72x128xbf16>, vector<16x128xf32> -> vector<16x128xf32>
    %c0_3 = arith.constant 0 : index
    %c0_4 = arith.constant 0 : index
    %3 = vector.load %arg3[%c0_3, %c0_4] : memref<16x1xf32, #tpu.memory_space<vmem>>, vector<16x1xf32>
    %4 = vector.broadcast %3 : vector<16x1xf32> to vector<16x128xf32>
    %5 = arith.addf %2, %4 : vector<16x128xf32>
    %cst_5 = arith.constant 0.000000e+00 : f32
    %6 = vector.broadcast %cst_5 : f32 to vector<16x128xf32>
    %7 = arith.maximumf %5, %6 : vector<16x128xf32>
    %c0_6 = arith.constant 0 : index
    %c0_7 = arith.constant 0 : index
    %8 = vector.load %arg4[%c0_6, %c0_7] : memref<16x128xf32, #tpu.memory_space<vmem>>, vector<16x128xf32>
    tpu.vector_store %arg4[%c0_6, %c0_7], %7 {strides = array<i32>} : memref<16x128xf32, #tpu.memory_space<vmem>>, vector<16x128xf32>,
    return
  }
  func.func @transform_0(%arg0: i32) -> (i32, i32) {
    %c0_i32 = arith.constant 0 : i32
    %c0_i32_0 = arith.constant 0 : i32
    %c0_i32_1 = arith.constant 0 : i32
    return %c0_i32, %c0_i32_0 : i32, i32
  }
  func.func @transform_1(%arg0: i32) -> (i32, i32) {
    %c0_i32 = arith.constant 0 : i32
    %c0_i32_0 = arith.constant 0 : i32
    return %c0_i32, %arg0 : i32, i32
  }
  func.func @transform_2(%arg0: i32) -> (i32, i32) {
    %c0_i32 = arith.constant 0 : i32
    %c0_i32_0 = arith.constant 0 : i32
    %c0_i32_1 = arith.constant 0 : i32
    return %c0_i32, %c0_i32_0 : i32, i32
  }
  func.func @transform_3(%arg0: i32) -> (i32, i32) {
    %c0_i32 = arith.constant 0 : i32
    %c0_i32_0 = arith.constant 0 : i32
    return %c0_i32, %arg0 : i32, i32
  }
}

module attributes {stable_mosaic.version = 11 : i64} {
  func.func @_block_tail_ds_kernel(%arg0: i32, %arg1: memref<144x128xbf16, #tpu.memory_space<vmem>>, %arg2: memref<16x144xbf16, #tpu.memory_space<vmem>>, %arg3: memref<16x1xf32, #tpu.memory_space<vmem>>, %arg4: memref<8x128xbf16, #tpu.memory_space<vmem>>, %arg5: memref<16x8xbf16, #tpu.memory_space<vmem>>, %arg6: memref<16x1xf32, #tpu.memory_space<vmem>>, %arg7: memref<128x8xf32, #tpu.memory_space<vmem>>, %arg8: memref<16x128xf32, #tpu.memory_space<vmem>>, %arg9: memref<16x8xf32, #tpu.memory_space<vmem>>) attributes {dimension_semantics = [#tpu.dimension_semantics<arbitrary>], iteration_bounds = array<i64: 1>, scalar_prefetch = 0 : i64, scratch_operands = 0 : i64, tpu.core_type = #tpu.core_type<tc>, window_params = [{pipeline_mode = #tpu.pipeline_mode<synchronous>, transform_indices = @transform_0, window_bounds = array<i64: 144, 128>}, {pipeline_mode = #tpu.pipeline_mode<synchronous>, transform_indices = @transform_1, window_bounds = array<i64: 16, 144>}, {pipeline_mode = #tpu.pipeline_mode<synchronous>, transform_indices = @transform_2, window_bounds = array<i64: 16, 1>}, {pipeline_mode = #tpu.pipeline_mode<synchronous>, transform_indices = @transform_3, window_bounds = array<i64: 8, 128>}, {pipeline_mode = #tpu.pipeline_mode<synchronous>, transform_indices = @transform_4, window_bounds = array<i64: 16, 8>}, {pipeline_mode = #tpu.pipeline_mode<synchronous>, transform_indices = @transform_5, window_bounds = array<i64: 16, 1>}, {pipeline_mode = #tpu.pipeline_mode<synchronous>, transform_indices = @transform_6, window_bounds = array<i64: 128, 8>}, {pipeline_mode = #tpu.pipeline_mode<synchronous>, transform_indices = @transform_7, window_bounds = array<i64: 16, 128>}, {pipeline_mode = #tpu.pipeline_mode<synchronous>, transform_indices = @transform_8, window_bounds = array<i64: 16, 8>}]} {
    %c0 = arith.constant 0 : index
    %c0_0 = arith.constant 0 : index
    %0 = vector.load %arg5[%c0, %c0_0] : memref<16x8xbf16, #tpu.memory_space<vmem>>, vector<16x8xbf16>
    %c0_1 = arith.constant 0 : index
    %c0_2 = arith.constant 0 : index
    %1 = vector.load %arg4[%c0_1, %c0_2] : memref<8x128xbf16, #tpu.memory_space<vmem>>, vector<8x128xbf16>
    %cst = arith.constant dense<0.000000e+00> : vector<16x128xf32>
    %2 = tpu.matmul %0, %1, %cst {dimension_numbers = #tpu.dot_dimension_numbers<[1], [0], [0], [1], [0, 0, 1, 1], [], []>} : vector<16x8xbf16>, vector<8x128xbf16>, vector<16x128xf32> -> vector<16x128xf32>
    %c0_3 = arith.constant 0 : index
    %c0_4 = arith.constant 0 : index
    %3 = vector.load %arg6[%c0_3, %c0_4] : memref<16x1xf32, #tpu.memory_space<vmem>>, vector<16x1xf32>
    %4 = vector.broadcast %3 : vector<16x1xf32> to vector<16x128xf32>
    %5 = arith.addf %2, %4 : vector<16x128xf32>
    %c0_5 = arith.constant 0 : index
    %c0_6 = arith.constant 0 : index
    %6 = vector.load %arg2[%c0_5, %c0_6] : memref<16x144xbf16, #tpu.memory_space<vmem>>, vector<16x144xbf16>
    %c0_7 = arith.constant 0 : index
    %c0_8 = arith.constant 0 : index
    %7 = vector.load %arg1[%c0_7, %c0_8] : memref<144x128xbf16, #tpu.memory_space<vmem>>, vector<144x128xbf16>
    %cst_9 = arith.constant dense<0.000000e+00> : vector<16x128xf32>
    %8 = tpu.matmul %6, %7, %cst_9 {dimension_numbers = #tpu.dot_dimension_numbers<[1], [0], [0], [1], [0, 0, 1, 1], [], []>} : vector<16x144xbf16>, vector<144x128xbf16>, vector<16x128xf32> -> vector<16x128xf32>
    %c0_10 = arith.constant 0 : index
    %c0_11 = arith.constant 0 : index
    %9 = vector.load %arg3[%c0_10, %c0_11] : memref<16x1xf32, #tpu.memory_space<vmem>>, vector<16x1xf32>
    %10 = vector.broadcast %9 : vector<16x1xf32> to vector<16x128xf32>
    %11 = arith.addf %8, %10 : vector<16x128xf32>
    %12 = arith.addf %11, %5 : vector<16x128xf32>
    %cst_12 = arith.constant 0.000000e+00 : f32
    %13 = vector.broadcast %cst_12 : f32 to vector<16x128xf32>
    %14 = arith.maximumf %12, %13 : vector<16x128xf32>
    %c0_13 = arith.constant 0 : index
    %c0_14 = arith.constant 0 : index
    %15 = vector.load %arg8[%c0_13, %c0_14] : memref<16x128xf32, #tpu.memory_space<vmem>>, vector<16x128xf32>
    tpu.vector_store %arg8[%c0_13, %c0_14], %14 {strides = array<i32>} : memref<16x128xf32, #tpu.memory_space<vmem>>, vector<16x128xf32>,
    %c0_15 = arith.constant 0 : index
    %c0_16 = arith.constant 0 : index
    %16 = vector.load %arg7[%c0_15, %c0_16] : memref<128x8xf32, #tpu.memory_space<vmem>>, vector<128x8xf32>
    %cst_17 = arith.constant dense<0.000000e+00> : vector<16x8xf32>
    %17 = tpu.matmul %14, %16, %cst_17 {dimension_numbers = #tpu.dot_dimension_numbers<[1], [0], [0], [1], [0, 0, 1, 1], [], []>} : vector<16x128xf32>, vector<128x8xf32>, vector<16x8xf32> -> vector<16x8xf32>
    %c0_18 = arith.constant 0 : index
    %c0_19 = arith.constant 0 : index
    %18 = vector.load %arg9[%c0_18, %c0_19] : memref<16x8xf32, #tpu.memory_space<vmem>>, vector<16x8xf32>
    tpu.vector_store %arg9[%c0_18, %c0_19], %17 {strides = array<i32>} : memref<16x8xf32, #tpu.memory_space<vmem>>, vector<16x8xf32>,
    return
  }
  func.func @transform_0(%arg0: i32) -> (i32, i32) {
    %c0_i32 = arith.constant 0 : i32
    %c0_i32_0 = arith.constant 0 : i32
    %c0_i32_1 = arith.constant 0 : i32
    return %c0_i32, %c0_i32_0 : i32, i32
  }
  func.func @transform_1(%arg0: i32) -> (i32, i32) {
    %c0_i32 = arith.constant 0 : i32
    %c0_i32_0 = arith.constant 0 : i32
    %c0_i32_1 = arith.constant 0 : i32
    return %c0_i32, %c0_i32_0 : i32, i32
  }
  func.func @transform_2(%arg0: i32) -> (i32, i32) {
    %c0_i32 = arith.constant 0 : i32
    %c0_i32_0 = arith.constant 0 : i32
    %c0_i32_1 = arith.constant 0 : i32
    return %c0_i32, %c0_i32_0 : i32, i32
  }
  func.func @transform_3(%arg0: i32) -> (i32, i32) {
    %c0_i32 = arith.constant 0 : i32
    %c0_i32_0 = arith.constant 0 : i32
    %c0_i32_1 = arith.constant 0 : i32
    return %c0_i32, %c0_i32_0 : i32, i32
  }
  func.func @transform_4(%arg0: i32) -> (i32, i32) {
    %c0_i32 = arith.constant 0 : i32
    %c0_i32_0 = arith.constant 0 : i32
    %c0_i32_1 = arith.constant 0 : i32
    return %c0_i32, %c0_i32_0 : i32, i32
  }
  func.func @transform_5(%arg0: i32) -> (i32, i32) {
    %c0_i32 = arith.constant 0 : i32
    %c0_i32_0 = arith.constant 0 : i32
    %c0_i32_1 = arith.constant 0 : i32
    return %c0_i32, %c0_i32_0 : i32, i32
  }
  func.func @transform_6(%arg0: i32) -> (i32, i32) {
    %c0_i32 = arith.constant 0 : i32
    %c0_i32_0 = arith.constant 0 : i32
    %c0_i32_1 = arith.constant 0 : i32
    return %c0_i32, %c0_i32_0 : i32, i32
  }
  func.func @transform_7(%arg0: i32) -> (i32, i32) {
    %c0_i32 = arith.constant 0 : i32
    %c0_i32_0 = arith.constant 0 : i32
    %c0_i32_1 = arith.constant 0 : i32
    return %c0_i32, %c0_i32_0 : i32, i32
  }
  func.func @transform_8(%arg0: i32) -> (i32, i32) {
    %c0_i32 = arith.constant 0 : i32
    %c0_i32_0 = arith.constant 0 : i32
    %c0_i32_1 = arith.constant 0 : i32
    return %c0_i32, %c0_i32_0 : i32, i32
  }
}

module attributes {stable_mosaic.version = 11 : i64} {
  func.func @_conv_bias_act_kernel(%arg0: i32, %arg1: memref<32x144xbf16, #tpu.memory_space<vmem>>, %arg2: memref<144x32xbf16, #tpu.memory_space<vmem>>, %arg3: memref<32x1xf32, #tpu.memory_space<vmem>>, %arg4: memref<32x32xf32, #tpu.memory_space<vmem>>) attributes {dimension_semantics = [#tpu.dimension_semantics<parallel>], iteration_bounds = array<i64: 1>, scalar_prefetch = 0 : i64, scratch_operands = 0 : i64, tpu.core_type = #tpu.core_type<tc>, window_params = [{pipeline_mode = #tpu.pipeline_mode<synchronous>, transform_indices = @transform_0, window_bounds = array<i64: 32, 144>}, {transform_indices = @transform_1, window_bounds = array<i64: 144, 32>}, {pipeline_mode = #tpu.pipeline_mode<synchronous>, transform_indices = @transform_2, window_bounds = array<i64: 32, 1>}, {transform_indices = @transform_3, window_bounds = array<i64: 32, 32>}]} {
    %c0 = arith.constant 0 : index
    %c0_0 = arith.constant 0 : index
    %0 = vector.load %arg1[%c0, %c0_0] : memref<32x144xbf16, #tpu.memory_space<vmem>>, vector<32x144xbf16>
    %c0_1 = arith.constant 0 : index
    %c0_2 = arith.constant 0 : index
    %1 = vector.load %arg2[%c0_1, %c0_2] : memref<144x32xbf16, #tpu.memory_space<vmem>>, vector<144x32xbf16>
    %cst = arith.constant dense<0.000000e+00> : vector<32x32xf32>
    %2 = tpu.matmul %0, %1, %cst {dimension_numbers = #tpu.dot_dimension_numbers<[1], [0], [0], [1], [0, 0, 1, 1], [], []>} : vector<32x144xbf16>, vector<144x32xbf16>, vector<32x32xf32> -> vector<32x32xf32>
    %c0_3 = arith.constant 0 : index
    %c0_4 = arith.constant 0 : index
    %3 = vector.load %arg3[%c0_3, %c0_4] : memref<32x1xf32, #tpu.memory_space<vmem>>, vector<32x1xf32>
    %4 = vector.broadcast %3 : vector<32x1xf32> to vector<32x32xf32>
    %5 = arith.addf %2, %4 : vector<32x32xf32>
    %cst_5 = arith.constant 0.000000e+00 : f32
    %6 = vector.broadcast %cst_5 : f32 to vector<32x32xf32>
    %7 = arith.maximumf %5, %6 : vector<32x32xf32>
    %c0_6 = arith.constant 0 : index
    %c0_7 = arith.constant 0 : index
    %8 = vector.load %arg4[%c0_6, %c0_7] : memref<32x32xf32, #tpu.memory_space<vmem>>, vector<32x32xf32>
    tpu.vector_store %arg4[%c0_6, %c0_7], %7 {strides = array<i32>} : memref<32x32xf32, #tpu.memory_space<vmem>>, vector<32x32xf32>,
    return
  }
  func.func @transform_0(%arg0: i32) -> (i32, i32) {
    %c0_i32 = arith.constant 0 : i32
    %c0_i32_0 = arith.constant 0 : i32
    %c0_i32_1 = arith.constant 0 : i32
    return %c0_i32, %c0_i32_0 : i32, i32
  }
  func.func @transform_1(%arg0: i32) -> (i32, i32) {
    %c0_i32 = arith.constant 0 : i32
    %c0_i32_0 = arith.constant 0 : i32
    return %c0_i32, %arg0 : i32, i32
  }
  func.func @transform_2(%arg0: i32) -> (i32, i32) {
    %c0_i32 = arith.constant 0 : i32
    %c0_i32_0 = arith.constant 0 : i32
    %c0_i32_1 = arith.constant 0 : i32
    return %c0_i32, %c0_i32_0 : i32, i32
  }
  func.func @transform_3(%arg0: i32) -> (i32, i32) {
    %c0_i32 = arith.constant 0 : i32
    %c0_i32_0 = arith.constant 0 : i32
    return %c0_i32, %arg0 : i32, i32
  }
}

module attributes {stable_mosaic.version = 11 : i64} {
  func.func @_block_tail_ds_kernel(%arg0: i32, %arg1: memref<288x32xbf16, #tpu.memory_space<vmem>>, %arg2: memref<32x288xbf16, #tpu.memory_space<vmem>>, %arg3: memref<32x1xf32, #tpu.memory_space<vmem>>, %arg4: memref<16x32xbf16, #tpu.memory_space<vmem>>, %arg5: memref<32x16xbf16, #tpu.memory_space<vmem>>, %arg6: memref<32x1xf32, #tpu.memory_space<vmem>>, %arg7: memref<32x8xf32, #tpu.memory_space<vmem>>, %arg8: memref<32x32xf32, #tpu.memory_space<vmem>>, %arg9: memref<32x8xf32, #tpu.memory_space<vmem>>) attributes {dimension_semantics = [#tpu.dimension_semantics<arbitrary>], iteration_bounds = array<i64: 1>, scalar_prefetch = 0 : i64, scratch_operands = 0 : i64, tpu.core_type = #tpu.core_type<tc>, window_params = [{pipeline_mode = #tpu.pipeline_mode<synchronous>, transform_indices = @transform_0, window_bounds = array<i64: 288, 32>}, {pipeline_mode = #tpu.pipeline_mode<synchronous>, transform_indices = @transform_1, window_bounds = array<i64: 32, 288>}, {pipeline_mode = #tpu.pipeline_mode<synchronous>, transform_indices = @transform_2, window_bounds = array<i64: 32, 1>}, {pipeline_mode = #tpu.pipeline_mode<synchronous>, transform_indices = @transform_3, window_bounds = array<i64: 16, 32>}, {pipeline_mode = #tpu.pipeline_mode<synchronous>, transform_indices = @transform_4, window_bounds = array<i64: 32, 16>}, {pipeline_mode = #tpu.pipeline_mode<synchronous>, transform_indices = @transform_5, window_bounds = array<i64: 32, 1>}, {pipeline_mode = #tpu.pipeline_mode<synchronous>, transform_indices = @transform_6, window_bounds = array<i64: 32, 8>}, {pipeline_mode = #tpu.pipeline_mode<synchronous>, transform_indices = @transform_7, window_bounds = array<i64: 32, 32>}, {pipeline_mode = #tpu.pipeline_mode<synchronous>, transform_indices = @transform_8, window_bounds = array<i64: 32, 8>}]} {
    %c0 = arith.constant 0 : index
    %c0_0 = arith.constant 0 : index
    %0 = vector.load %arg5[%c0, %c0_0] : memref<32x16xbf16, #tpu.memory_space<vmem>>, vector<32x16xbf16>
    %c0_1 = arith.constant 0 : index
    %c0_2 = arith.constant 0 : index
    %1 = vector.load %arg4[%c0_1, %c0_2] : memref<16x32xbf16, #tpu.memory_space<vmem>>, vector<16x32xbf16>
    %cst = arith.constant dense<0.000000e+00> : vector<32x32xf32>
    %2 = tpu.matmul %0, %1, %cst {dimension_numbers = #tpu.dot_dimension_numbers<[1], [0], [0], [1], [0, 0, 1, 1], [], []>} : vector<32x16xbf16>, vector<16x32xbf16>, vector<32x32xf32> -> vector<32x32xf32>
    %c0_3 = arith.constant 0 : index
    %c0_4 = arith.constant 0 : index
    %3 = vector.load %arg6[%c0_3, %c0_4] : memref<32x1xf32, #tpu.memory_space<vmem>>, vector<32x1xf32>
    %4 = vector.broadcast %3 : vector<32x1xf32> to vector<32x32xf32>
    %5 = arith.addf %2, %4 : vector<32x32xf32>
    %c0_5 = arith.constant 0 : index
    %c0_6 = arith.constant 0 : index
    %6 = vector.load %arg2[%c0_5, %c0_6] : memref<32x288xbf16, #tpu.memory_space<vmem>>, vector<32x288xbf16>
    %c0_7 = arith.constant 0 : index
    %c0_8 = arith.constant 0 : index
    %7 = vector.load %arg1[%c0_7, %c0_8] : memref<288x32xbf16, #tpu.memory_space<vmem>>, vector<288x32xbf16>
    %cst_9 = arith.constant dense<0.000000e+00> : vector<32x32xf32>
    %8 = tpu.matmul %6, %7, %cst_9 {dimension_numbers = #tpu.dot_dimension_numbers<[1], [0], [0], [1], [0, 0, 1, 1], [], []>} : vector<32x288xbf16>, vector<288x32xbf16>, vector<32x32xf32> -> vector<32x32xf32>
    %c0_10 = arith.constant 0 : index
    %c0_11 = arith.constant 0 : index
    %9 = vector.load %arg3[%c0_10, %c0_11] : memref<32x1xf32, #tpu.memory_space<vmem>>, vector<32x1xf32>
    %10 = vector.broadcast %9 : vector<32x1xf32> to vector<32x32xf32>
    %11 = arith.addf %8, %10 : vector<32x32xf32>
    %12 = arith.addf %11, %5 : vector<32x32xf32>
    %cst_12 = arith.constant 0.000000e+00 : f32
    %13 = vector.broadcast %cst_12 : f32 to vector<32x32xf32>
    %14 = arith.maximumf %12, %13 : vector<32x32xf32>
    %c0_13 = arith.constant 0 : index
    %c0_14 = arith.constant 0 : index
    %15 = vector.load %arg8[%c0_13, %c0_14] : memref<32x32xf32, #tpu.memory_space<vmem>>, vector<32x32xf32>
    tpu.vector_store %arg8[%c0_13, %c0_14], %14 {strides = array<i32>} : memref<32x32xf32, #tpu.memory_space<vmem>>, vector<32x32xf32>,
    %c0_15 = arith.constant 0 : index
    %c0_16 = arith.constant 0 : index
    %16 = vector.load %arg7[%c0_15, %c0_16] : memref<32x8xf32, #tpu.memory_space<vmem>>, vector<32x8xf32>
    %cst_17 = arith.constant dense<0.000000e+00> : vector<32x8xf32>
    %17 = tpu.matmul %14, %16, %cst_17 {dimension_numbers = #tpu.dot_dimension_numbers<[1], [0], [0], [1], [0, 0, 1, 1], [], []>} : vector<32x32xf32>, vector<32x8xf32>, vector<32x8xf32> -> vector<32x8xf32>
    %c0_18 = arith.constant 0 : index
    %c0_19 = arith.constant 0 : index
    %18 = vector.load %arg9[%c0_18, %c0_19] : memref<32x8xf32, #tpu.memory_space<vmem>>, vector<32x8xf32>
    tpu.vector_store %arg9[%c0_18, %c0_19], %17 {strides = array<i32>} : memref<32x8xf32, #tpu.memory_space<vmem>>, vector<32x8xf32>,
    return
  }
  func.func @transform_0(%arg0: i32) -> (i32, i32) {
    %c0_i32 = arith.constant 0 : i32
    %c0_i32_0 = arith.constant 0 : i32
    %c0_i32_1 = arith.constant 0 : i32
    return %c0_i32, %c0_i32_0 : i32, i32
  }
  func.func @transform_1(%arg0: i32) -> (i32, i32) {
    %c0_i32 = arith.constant 0 : i32
    %c0_i32_0 = arith.constant 0 : i32
    %c0_i32_1 = arith.constant 0 : i32
    return %c0_i32, %c0_i32_0 : i32, i32
  }
  func.func @transform_2(%arg0: i32) -> (i32, i32) {
    %c0_i32 = arith.constant 0 : i32
    %c0_i32_0 = arith.constant 0 : i32
    %c0_i32_1 = arith.constant 0 : i32
    return %c0_i32, %c0_i32_0 : i32, i32
  }
  func.func @transform_3(%arg0: i32) -> (i32, i32) {
    %c0_i32 = arith.constant 0 : i32
    %c0_i32_0 = arith.constant 0 : i32
    %c0_i32_1 = arith.constant 0 : i32
    return %c0_i32, %c0_i32_0 : i32, i32
  }
  func.func @transform_4(%arg0: i32) -> (i32, i32) {
    %c0_i32 = arith.constant 0 : i32
    %c0_i32_0 = arith.constant 0 : i32
    %c0_i32_1 = arith.constant 0 : i32
    return %c0_i32, %c0_i32_0 : i32, i32
  }
  func.func @transform_5(%arg0: i32) -> (i32, i32) {
    %c0_i32 = arith.constant 0 : i32
    %c0_i32_0 = arith.constant 0 : i32
    %c0_i32_1 = arith.constant 0 : i32
    return %c0_i32, %c0_i32_0 : i32, i32
  }
  func.func @transform_6(%arg0: i32) -> (i32, i32) {
    %c0_i32 = arith.constant 0 : i32
    %c0_i32_0 = arith.constant 0 : i32
    %c0_i32_1 = arith.constant 0 : i32
    return %c0_i32, %c0_i32_0 : i32, i32
  }
  func.func @transform_7(%arg0: i32) -> (i32, i32) {
    %c0_i32 = arith.constant 0 : i32
    %c0_i32_0 = arith.constant 0 : i32
    %c0_i32_1 = arith.constant 0 : i32
    return %c0_i32, %c0_i32_0 : i32, i32
  }
  func.func @transform_8(%arg0: i32) -> (i32, i32) {
    %c0_i32 = arith.constant 0 : i32
    %c0_i32_0 = arith.constant 0 : i32
    %c0_i32_1 = arith.constant 0 : i32
    return %c0_i32, %c0_i32_0 : i32, i32
  }
}

module attributes {stable_mosaic.version = 11 : i64} {
  func.func @_conv_bias_act_kernel(%arg0: i32, %arg1: memref<64x288xbf16, #tpu.memory_space<vmem>>, %arg2: memref<288x8xbf16, #tpu.memory_space<vmem>>, %arg3: memref<64x1xf32, #tpu.memory_space<vmem>>, %arg4: memref<64x8xf32, #tpu.memory_space<vmem>>) attributes {dimension_semantics = [#tpu.dimension_semantics<parallel>], iteration_bounds = array<i64: 1>, scalar_prefetch = 0 : i64, scratch_operands = 0 : i64, tpu.core_type = #tpu.core_type<tc>, window_params = [{pipeline_mode = #tpu.pipeline_mode<synchronous>, transform_indices = @transform_0, window_bounds = array<i64: 64, 288>}, {transform_indices = @transform_1, window_bounds = array<i64: 288, 8>}, {pipeline_mode = #tpu.pipeline_mode<synchronous>, transform_indices = @transform_2, window_bounds = array<i64: 64, 1>}, {transform_indices = @transform_3, window_bounds = array<i64: 64, 8>}]} {
    %c0 = arith.constant 0 : index
    %c0_0 = arith.constant 0 : index
    %0 = vector.load %arg1[%c0, %c0_0] : memref<64x288xbf16, #tpu.memory_space<vmem>>, vector<64x288xbf16>
    %c0_1 = arith.constant 0 : index
    %c0_2 = arith.constant 0 : index
    %1 = vector.load %arg2[%c0_1, %c0_2] : memref<288x8xbf16, #tpu.memory_space<vmem>>, vector<288x8xbf16>
    %cst = arith.constant dense<0.000000e+00> : vector<64x8xf32>
    %2 = tpu.matmul %0, %1, %cst {dimension_numbers = #tpu.dot_dimension_numbers<[1], [0], [0], [1], [0, 0, 1, 1], [], []>} : vector<64x288xbf16>, vector<288x8xbf16>, vector<64x8xf32> -> vector<64x8xf32>
    %c0_3 = arith.constant 0 : index
    %c0_4 = arith.constant 0 : index
    %3 = vector.load %arg3[%c0_3, %c0_4] : memref<64x1xf32, #tpu.memory_space<vmem>>, vector<64x1xf32>
    %4 = vector.broadcast %3 : vector<64x1xf32> to vector<64x8xf32>
    %5 = arith.addf %2, %4 : vector<64x8xf32>
    %cst_5 = arith.constant 0.000000e+00 : f32
    %6 = vector.broadcast %cst_5 : f32 to vector<64x8xf32>
    %7 = arith.maximumf %5, %6 : vector<64x8xf32>
    %c0_6 = arith.constant 0 : index
    %c0_7 = arith.constant 0 : index
    %8 = vector.load %arg4[%c0_6, %c0_7] : memref<64x8xf32, #tpu.memory_space<vmem>>, vector<64x8xf32>
    tpu.vector_store %arg4[%c0_6, %c0_7], %7 {strides = array<i32>} : memref<64x8xf32, #tpu.memory_space<vmem>>, vector<64x8xf32>,
    return
  }
  func.func @transform_0(%arg0: i32) -> (i32, i32) {
    %c0_i32 = arith.constant 0 : i32
    %c0_i32_0 = arith.constant 0 : i32
    %c0_i32_1 = arith.constant 0 : i32
    return %c0_i32, %c0_i32_0 : i32, i32
  }
  func.func @transform_1(%arg0: i32) -> (i32, i32) {
    %c0_i32 = arith.constant 0 : i32
    %c0_i32_0 = arith.constant 0 : i32
    return %c0_i32, %arg0 : i32, i32
  }
  func.func @transform_2(%arg0: i32) -> (i32, i32) {
    %c0_i32 = arith.constant 0 : i32
    %c0_i32_0 = arith.constant 0 : i32
    %c0_i32_1 = arith.constant 0 : i32
    return %c0_i32, %c0_i32_0 : i32, i32
  }
  func.func @transform_3(%arg0: i32) -> (i32, i32) {
    %c0_i32 = arith.constant 0 : i32
    %c0_i32_0 = arith.constant 0 : i32
    return %c0_i32, %arg0 : i32, i32
  }
}

module attributes {stable_mosaic.version = 11 : i64} {
  func.func @_block_tail_ds_kernel(%arg0: i32, %arg1: memref<576x8xbf16, #tpu.memory_space<vmem>>, %arg2: memref<64x576xbf16, #tpu.memory_space<vmem>>, %arg3: memref<64x1xf32, #tpu.memory_space<vmem>>, %arg4: memref<32x8xbf16, #tpu.memory_space<vmem>>, %arg5: memref<64x32xbf16, #tpu.memory_space<vmem>>, %arg6: memref<64x1xf32, #tpu.memory_space<vmem>>, %arg7: memref<8x8xf32, #tpu.memory_space<vmem>>, %arg8: memref<64x8xf32, #tpu.memory_space<vmem>>, %arg9: memref<64x8xf32, #tpu.memory_space<vmem>>) attributes {dimension_semantics = [#tpu.dimension_semantics<arbitrary>], iteration_bounds = array<i64: 1>, scalar_prefetch = 0 : i64, scratch_operands = 0 : i64, tpu.core_type = #tpu.core_type<tc>, window_params = [{pipeline_mode = #tpu.pipeline_mode<synchronous>, transform_indices = @transform_0, window_bounds = array<i64: 576, 8>}, {pipeline_mode = #tpu.pipeline_mode<synchronous>, transform_indices = @transform_1, window_bounds = array<i64: 64, 576>}, {pipeline_mode = #tpu.pipeline_mode<synchronous>, transform_indices = @transform_2, window_bounds = array<i64: 64, 1>}, {pipeline_mode = #tpu.pipeline_mode<synchronous>, transform_indices = @transform_3, window_bounds = array<i64: 32, 8>}, {pipeline_mode = #tpu.pipeline_mode<synchronous>, transform_indices = @transform_4, window_bounds = array<i64: 64, 32>}, {pipeline_mode = #tpu.pipeline_mode<synchronous>, transform_indices = @transform_5, window_bounds = array<i64: 64, 1>}, {pipeline_mode = #tpu.pipeline_mode<synchronous>, transform_indices = @transform_6, window_bounds = array<i64: 8, 8>}, {pipeline_mode = #tpu.pipeline_mode<synchronous>, transform_indices = @transform_7, window_bounds = array<i64: 64, 8>}, {pipeline_mode = #tpu.pipeline_mode<synchronous>, transform_indices = @transform_8, window_bounds = array<i64: 64, 8>}]} {
    %c0 = arith.constant 0 : index
    %c0_0 = arith.constant 0 : index
    %0 = vector.load %arg5[%c0, %c0_0] : memref<64x32xbf16, #tpu.memory_space<vmem>>, vector<64x32xbf16>
    %c0_1 = arith.constant 0 : index
    %c0_2 = arith.constant 0 : index
    %1 = vector.load %arg4[%c0_1, %c0_2] : memref<32x8xbf16, #tpu.memory_space<vmem>>, vector<32x8xbf16>
    %cst = arith.constant dense<0.000000e+00> : vector<64x8xf32>
    %2 = tpu.matmul %0, %1, %cst {dimension_numbers = #tpu.dot_dimension_numbers<[1], [0], [0], [1], [0, 0, 1, 1], [], []>} : vector<64x32xbf16>, vector<32x8xbf16>, vector<64x8xf32> -> vector<64x8xf32>
    %c0_3 = arith.constant 0 : index
    %c0_4 = arith.constant 0 : index
    %3 = vector.load %arg6[%c0_3, %c0_4] : memref<64x1xf32, #tpu.memory_space<vmem>>, vector<64x1xf32>
    %4 = vector.broadcast %3 : vector<64x1xf32> to vector<64x8xf32>
    %5 = arith.addf %2, %4 : vector<64x8xf32>
    %c0_5 = arith.constant 0 : index
    %c0_6 = arith.constant 0 : index
    %6 = vector.load %arg2[%c0_5, %c0_6] : memref<64x576xbf16, #tpu.memory_space<vmem>>, vector<64x576xbf16>
    %c0_7 = arith.constant 0 : index
    %c0_8 = arith.constant 0 : index
    %7 = vector.load %arg1[%c0_7, %c0_8] : memref<576x8xbf16, #tpu.memory_space<vmem>>, vector<576x8xbf16>
    %cst_9 = arith.constant dense<0.000000e+00> : vector<64x8xf32>
    %8 = tpu.matmul %6, %7, %cst_9 {dimension_numbers = #tpu.dot_dimension_numbers<[1], [0], [0], [1], [0, 0, 1, 1], [], []>} : vector<64x576xbf16>, vector<576x8xbf16>, vector<64x8xf32> -> vector<64x8xf32>
    %c0_10 = arith.constant 0 : index
    %c0_11 = arith.constant 0 : index
    %9 = vector.load %arg3[%c0_10, %c0_11] : memref<64x1xf32, #tpu.memory_space<vmem>>, vector<64x1xf32>
    %10 = vector.broadcast %9 : vector<64x1xf32> to vector<64x8xf32>
    %11 = arith.addf %8, %10 : vector<64x8xf32>
    %12 = arith.addf %11, %5 : vector<64x8xf32>
    %cst_12 = arith.constant 0.000000e+00 : f32
    %13 = vector.broadcast %cst_12 : f32 to vector<64x8xf32>
    %14 = arith.maximumf %12, %13 : vector<64x8xf32>
    %c0_13 = arith.constant 0 : index
    %c0_14 = arith.constant 0 : index
    %15 = vector.load %arg8[%c0_13, %c0_14] : memref<64x8xf32, #tpu.memory_space<vmem>>, vector<64x8xf32>
    tpu.vector_store %arg8[%c0_13, %c0_14], %14 {strides = array<i32>} : memref<64x8xf32, #tpu.memory_space<vmem>>, vector<64x8xf32>,
    %c0_15 = arith.constant 0 : index
    %c0_16 = arith.constant 0 : index
    %16 = vector.load %arg7[%c0_15, %c0_16] : memref<8x8xf32, #tpu.memory_space<vmem>>, vector<8x8xf32>
    %cst_17 = arith.constant dense<0.000000e+00> : vector<64x8xf32>
    %17 = tpu.matmul %14, %16, %cst_17 {dimension_numbers = #tpu.dot_dimension_numbers<[1], [0], [0], [1], [0, 0, 1, 1], [], []>} : vector<64x8xf32>, vector<8x8xf32>, vector<64x8xf32> -> vector<64x8xf32>
    %c0_18 = arith.constant 0 : index
    %c0_19 = arith.constant 0 : index
    %18 = vector.load %arg9[%c0_18, %c0_19] : memref<64x8xf32, #tpu.memory_space<vmem>>, vector<64x8xf32>
    tpu.vector_store %arg9[%c0_18, %c0_19], %17 {strides = array<i32>} : memref<64x8xf32, #tpu.memory_space<vmem>>, vector<64x8xf32>,
    return
  }
  func.func @transform_0(%arg0: i32) -> (i32, i32) {
    %c0_i32 = arith.constant 0 : i32
    %c0_i32_0 = arith.constant 0 : i32
    %c0_i32_1 = arith.constant 0 : i32
    return %c0_i32, %c0_i32_0 : i32, i32
  }
  func.func @transform_1(%arg0: i32) -> (i32, i32) {
    %c0_i32 = arith.constant 0 : i32
    %c0_i32_0 = arith.constant 0 : i32
    %c0_i32_1 = arith.constant 0 : i32
    return %c0_i32, %c0_i32_0 : i32, i32
  }
  func.func @transform_2(%arg0: i32) -> (i32, i32) {
    %c0_i32 = arith.constant 0 : i32
    %c0_i32_0 = arith.constant 0 : i32
    %c0_i32_1 = arith.constant 0 : i32
    return %c0_i32, %c0_i32_0 : i32, i32
  }
  func.func @transform_3(%arg0: i32) -> (i32, i32) {
    %c0_i32 = arith.constant 0 : i32
    %c0_i32_0 = arith.constant 0 : i32
    %c0_i32_1 = arith.constant 0 : i32
    return %c0_i32, %c0_i32_0 : i32, i32
  }
  func.func @transform_4(%arg0: i32) -> (i32, i32) {
    %c0_i32 = arith.constant 0 : i32
    %c0_i32_0 = arith.constant 0 : i32
    %c0_i32_1 = arith.constant 0 : i32
    return %c0_i32, %c0_i32_0 : i32, i32
  }
  func.func @transform_5(%arg0: i32) -> (i32, i32) {
    %c0_i32 = arith.constant 0 : i32
    %c0_i32_0 = arith.constant 0 : i32
    %c0_i32_1 = arith.constant 0 : i32
    return %c0_i32, %c0_i32_0 : i32, i32
  }
  func.func @transform_6(%arg0: i32) -> (i32, i32) {
    %c0_i32 = arith.constant 0 : i32
    %c0_i32_0 = arith.constant 0 : i32
    %c0_i32_1 = arith.constant 0 : i32
    return %c0_i32, %c0_i32_0 : i32, i32
  }
  func.func @transform_7(%arg0: i32) -> (i32, i32) {
    %c0_i32 = arith.constant 0 : i32
    %c0_i32_0 = arith.constant 0 : i32
    %c0_i32_1 = arith.constant 0 : i32
    return %c0_i32, %c0_i32_0 : i32, i32
  }
  func.func @transform_8(%arg0: i32) -> (i32, i32) {
    %c0_i32 = arith.constant 0 : i32
    %c0_i32_0 = arith.constant 0 : i32
    %c0_i32_1 = arith.constant 0 : i32
    return %c0_i32, %c0_i32_0 : i32, i32
  }
}

</mosaic_0001>

<bundles_post_ra>
// kernel: my_resnet_forward.10
= control target key start
LH: loop header
LB: loop body
LE: loop exit
PB: predicated region body
PF: predicated region fallthrough
CT: control target
= control target key end

     0   :  { %s872_s12 = smov 0   ;;  %s874_s13 = smov 0   ;;  %s1056_s0 = inlined_call_operand.vmem [shape: bf16[8,147], index: 0, kind: input, shape index: {}]   ;;  %s1057_s1 = inlined_call_operand.vmem [shape: bf16[147,2048], index: 1, kind: input, shape index: {}]   ;;  %s1058_s2 = inlined_call_operand.vmem [shape: f32[8,1], index: 2, kind: input, shape index: {}]   ;;  %s1059_s3 = inlined_call_operand.vmem [shape: f32[8,2048], index: 3, kind: output, shape index: {}]  }
   0x1   :  { %s876_s14 = smov 0  }
   0x2 LB: > { %s681_s15 = sadd.s32 4294967295, %s848_s14   ;;  %s889_s16 = sadd.s32 1, %s848_s14   ;;  %s848_s14 = sphi %s876_s14, %s1062_s14   ;;  %s844_s13 = sphi %s874_s13, %s1061_s13   ;;  %s840_s12 = sphi %s872_s12, %s1060_s12  }
   0x3   : > { %s38_s17 = ssub.s32 %s848_s14, %s889_s16  ;;  %s41_s18 = sadd.s32 1, %s844_s13 }
   0x4   : > { %p39_p0 = scmp.eq.s32.totalorder %s38_s17, 0  ;;  %p48_p1 = scmp.ne.s32.totalorder %s844_s13, %s840_s12 }
   0x5   : > { %p49_p2 = scmp.eq.s32.totalorder %s848_s14, 0  ;;  %p684_p4 = scmp.ge.s32.totalorder %s848_s14, 4 }
   0x6   : > { %s898_s19 = scalar_select %p39_p0, %s844_s13, %s41_s18  }
   0x7   : > { %p50_p3 = por %p49_p2, %p48_p1  ;;  %127 = sbr.rel (%p684_p4) target bundleno = 37 (0x25), region = 24 }
   0xe   : > { %130 = sbr.rel (!%p50_p3) target bundleno = 37 (0x25), region = 28  ;;  %s132_s20 = sand.u32 (%p50_p3), 1, %s844_s13  }
   0xf   : > { %s736_s21 = sshll.u32 (%p50_p3), %s848_s14, 4  ;;  %s737_s22 = smul.u32 (%p50_p3), 304, %s132_s20 }
  0x10   : > { %s906_s25 = scalar_lea.vmem (%p50_p3), %s1057_s1, %s736_s21 }
  0x11   : > { %v150_v0 = vld [vmem:[%s906_s25] sm:$0xff] (%p50_p3)  ;;  %v152_v1 = vld [vmem:[%s906_s25 + $0x8] sm:$0xff] (%p50_p3)  ;;  %s914_s26 = scalar_lea.vmem (%p50_p3), [#allocation2], %s737_s22 }
  0x12   : > { %v154_v2 = vld [vmem:[%s906_s25 + $0x40] sm:$0xff] (%p50_p3)  ;;  %v156_v3 = vld [vmem:[%s906_s25 + $0x48] sm:$0xff] (%p50_p3)  ;;  %151 = vst [vmem:[%s914_s26] sm:$0xff] (%p50_p3), %v150_v0  ;;  %153 = vst [vmem:[%s914_s26 + $0x8] sm:$0xff] (%p50_p3), %v152_v1 }
  0x13   : > { %v158_v4 = vld [vmem:[%s906_s25 + $0x80] sm:$0xff] (%p50_p3)  ;;  %v160_v5 = vld [vmem:[%s906_s25 + $0x88] sm:$0xff] (%p50_p3)  ;;  %155 = vst [vmem:[%s914_s26 + $0x10] sm:$0xff] (%p50_p3), %v154_v2  ;;  %157 = vst [vmem:[%s914_s26 + $0x18] sm:$0xff] (%p50_p3), %v156_v3 }
  0x14   : > { %159 = vst [vmem:[%s914_s26 + $0x20] sm:$0xff] (%p50_p3), %v158_v4  ;;  %161 = vst [vmem:[%s914_s26 + $0x28] sm:$0xff] (%p50_p3), %v160_v5  ;;  %v162_v6 = vld [vmem:[%s906_s25 + $0xc0] sm:$0xff] (%p50_p3)  ;;  %v164_v7 = vld [vmem:[%s906_s25 + $0xc8] sm:$0xff] (%p50_p3) }
  0x15   : > { %v166_v8 = vld [vmem:[%s906_s25 + $0x100] sm:$0xff]  ;;  %163 = vst [vmem:[%s914_s26 + $0x30] sm:$0xff] %v162_v6  ;;  %165 = vst [vmem:[%s914_s26 + $0x38] sm:$0xff] %v164_v7  ;;  %v168_v9 = vld [vmem:[%s906_s25 + $0x108] sm:$0xff] }
  0x16   : > { %167 = vst [vmem:[%s914_s26 + $0x40] sm:$0xff] %v166_v8  ;;  %v170_v10 = vld [vmem:[%s906_s25 + $0x140] sm:$0xff]  ;;  %v172_v11 = vld [vmem:[%s906_s25 + $0x148] sm:$0xff]  ;;  %169 = vst [vmem:[%s914_s26 + $0x48] sm:$0xff] %v168_v9 }
  0x17   : > { %171 = vst [vmem:[%s914_s26 + $0x50] sm:$0xff] %v170_v10  ;;  %173 = vst [vmem:[%s914_s26 + $0x58] sm:$0xff] %v172_v11  ;;  %v174_v12 = vld [vmem:[%s906_s25 + $0x180] sm:$0xff]  ;;  %v176_v13 = vld [vmem:[%s906_s25 + $0x188] sm:$0xff] }
  0x18   : > { %v178_v14 = vld [vmem:[%s906_s25 + $0x1c0] sm:$0xff]  ;;  %175 = vst [vmem:[%s914_s26 + $0x60] sm:$0xff] %v174_v12  ;;  %177 = vst [vmem:[%s914_s26 + $0x68] sm:$0xff] %v176_v13  ;;  %v180_v15 = vld [vmem:[%s906_s25 + $0x1c8] sm:$0xff] }
  0x19   : > { %179 = vst [vmem:[%s914_s26 + $0x70] sm:$0xff] %v178_v14  ;;  %v182_v16 = vld [vmem:[%s906_s25 + $0x200] sm:$0xff]  ;;  %v184_v17 = vld [vmem:[%s906_s25 + $0x208] sm:$0xff]  ;;  %181 = vst [vmem:[%s914_s26 + $0x78] sm:$0xff] %v180_v15 }
  0x1a   : > { %183 = vst [vmem:[%s914_s26 + $0x80] sm:$0xff] %v182_v16  ;;  %185 = vst [vmem:[%s914_s26 + $0x88] sm:$0xff] %v184_v17  ;;  %v186_v18 = vld [vmem:[%s906_s25 + $0x240] sm:$0xff]  ;;  %v188_v19 = vld [vmem:[%s906_s25 + $0x248] sm:$0xff] }
  0x1b   : > { %v190_v20 = vld [vmem:[%s906_s25 + $0x280] sm:$0xff]  ;;  %187 = vst [vmem:[%s914_s26 + $0x90] sm:$0xff] %v186_v18  ;;  %189 = vst [vmem:[%s914_s26 + $0x98] sm:$0xff] %v188_v19  ;;  %v192_v21 = vld [vmem:[%s906_s25 + $0x288] sm:$0xff] }
  0x1c   : > { %191 = vst [vmem:[%s914_s26 + $0xa0] sm:$0xff] %v190_v20  ;;  %v194_v22 = vld [vmem:[%s906_s25 + $0x2c0] sm:$0xff]  ;;  %v196_v23 = vld [vmem:[%s906_s25 + $0x2c8] sm:$0xff]  ;;  %193 = vst [vmem:[%s914_s26 + $0xa8] sm:$0xff] %v192_v21 }
  0x1d   : > { %195 = vst [vmem:[%s914_s26 + $0xb0] sm:$0xff] %v194_v22  ;;  %197 = vst [vmem:[%s914_s26 + $0xb8] sm:$0xff] %v196_v23  ;;  %v198_v24 = vld [vmem:[%s906_s25 + $0x300] sm:$0xff]  ;;  %v200_v25 = vld [vmem:[%s906_s25 + $0x308] sm:$0xff] }
  0x1e   : > { %v202_v26 = vld [vmem:[%s906_s25 + $0x340] sm:$0xff]  ;;  %199 = vst [vmem:[%s914_s26 + $0xc0] sm:$0xff] %v198_v24  ;;  %201 = vst [vmem:[%s914_s26 + $0xc8] sm:$0xff] %v200_v25  ;;  %v204_v27 = vld [vmem:[%s906_s25 + $0x348] sm:$0xff] }
  0x1f   : > { %203 = vst [vmem:[%s914_s26 + $0xd0] sm:$0xff] %v202_v26  ;;  %v206_v28 = vld [vmem:[%s906_s25 + $0x380] sm:$0xff]  ;;  %v208_v29 = vld [vmem:[%s906_s25 + $0x388] sm:$0xff]  ;;  %205 = vst [vmem:[%s914_s26 + $0xd8] sm:$0xff] %v204_v27 }
  0x20   : > { %207 = vst [vmem:[%s914_s26 + $0xe0] sm:$0xff] %v206_v28  ;;  %209 = vst [vmem:[%s914_s26 + $0xe8] sm:$0xff] %v208_v29  ;;  %v210_v30 = vld [vmem:[%s906_s25 + $0x3c0] sm:$0xff]  ;;  %v212_v31 = vld [vmem:[%s906_s25 + $0x3c8] sm:$0xff] }
  0x21   : > { %v214_v32 = vld [vmem:[%s906_s25 + $0x400] sm:$0xff]  ;;  %211 = vst [vmem:[%s914_s26 + $0xf0] sm:$0xff] %v210_v30  ;;  %213 = vst [vmem:[%s914_s26 + $0xf8] sm:$0xff] %v212_v31  ;;  %v216_v33 = vld [vmem:[%s906_s25 + $0x408] sm:$0xff] }
  0x22   : > { %215 = vst [vmem:[%s914_s26 + $0x100] sm:$0xff] %v214_v32  ;;  %v218_v34 = vld [vmem:[%s906_s25 + $0x440] sm:$0xff]  ;;  %v220_v35 = vld [vmem:[%s906_s25 + $0x448] sm:$0xff]  ;;  %217 = vst [vmem:[%s914_s26 + $0x108] sm:$0xff] %v216_v33 }
  0x23   : > { %219 = vst [vmem:[%s914_s26 + $0x110] sm:$0xff] %v218_v34  ;;  %221 = vst [vmem:[%s914_s26 + $0x118] sm:$0xff] %v220_v35  ;;  %v222_v36 = vld [vmem:[%s906_s25 + $0x480] sm:$0xff]  ;;  %v224_v37 = vld [vmem:[%s906_s25 + $0x488] sm:$0xff] }
  0x24   : > { %223 = vst [vmem:[%s914_s26 + $0x120] sm:$0xff] %v222_v36  ;;  %225 = vst [vmem:[%s914_s26 + $0x128] sm:$0xff] %v224_v37 }
  0x25 PF: > { %p687_p5 = scmp.ge.s32.totalorder %s848_s14, 1  ;;  %p230_p6 = scmp.lt.s32.totalorder %s848_s14, 5 }
  0x27   : > { %p231_p7 = pnand %p687_p5, %p230_p6 }
  0x28   : > { %s237_s27 = sand.u32 (!%p231_p7), 1, %s840_s12   ;;  %v992_v38 = vld [vmem:[%s1056_s0] sm:$0xff] (!%p231_p7)  ;;  %vm509_vm0 = vcmask (!%p231_p7), 154624   ;;  %v850_v41 = vmov (!%p231_p7), 0   ;;  %vm513_vm1 = vcmask (!%p231_p7), 1040384   ;;  %vm514_vm2 = vcmask (!%p231_p7), 1041408  }
  0x29   : > { %234 = sbr.rel (%p231_p7) target bundleno = 304 (0x130), region = 51  ;;  %v691_v39 = vcombine.high (!%p231_p7), %v992_v38, %v992_v38  ;;  %v307_v40 = vld [vmem:[%s1058_s2] sm:$0xff] (!%p231_p7)  ;;  %765 = vset.pattern.permute.xlu0 (!%p231_p7), %v850_v41  ;;  %v851_v10 = vmov (!%p231_p7), 65535   ;;  %v690_v27 = vcombine.low (!%p231_p7), %v992_v38, %v992_v38  ;;  %s688_s7 = sshll.u32 (!%p231_p7), %s681_s15, 2 }
  0x2a   : > { %s738_s30 = smul.u32 (!%p231_p7), 304, %s237_s27  ;;  %310 = vperm.xlu0 (!%p231_p7), %765, %v307_v40   ;;  %v515_v11 = vsel (!%p231_p7), %vm513_vm1, 4294967295, %v851_v10  ;;  %p262_p8 = scmp.lt.s32.totalorder (!%p231_p7), %s688_s7, 15 }
  0x2b   : > { %732 = vmatprep.mubr.msk.bf16.mxu0 (!%p231_p7), %vm509_vm0, %v691_v39  ;;  %733 = vmatprep.mubr.msk.bf16.mxu1 (!%p231_p7), %vm509_vm0, %v691_v39  ;;  %v516_v18 = vsel (!%p231_p7), %vm514_vm2, %v515_v11, 0 }
  0x2c   : > { %s999_s6 = scalar_lea.vmem (!%p231_p7), [#allocation2], %s738_s30 }
  0x2d   : > { %v766_v42 = vld [vmem:[%s999_s6 + $0x4] ss:$16 sps:$4 sm:$0xff] (!%p231_p7)   ;;  %v768_v43 = vld [vmem:[%s999_s6 + $0xc] ss:$16 sps:$4 sm:$0xff] (!%p231_p7)   ;;  %v770_v44 = vld [vmem:[%s999_s6] ss:$16 sps:$4 sm:$0xff] (!%p231_p7)  }
  0x2e   : > { %529 = vmatprep.subr.bf16.mxu0 (!%p231_p7), %v766_v42  ;;  %v771_v45 = vld [vmem:[%s999_s6 + $0x8] ss:$16 sps:$4 sm:$0xff] (!%p231_p7)   ;;  %570 = vmatprep.subr.bf16.mxu1 (!%p231_p7), %v768_v43  ;;  %v772_v46 = vld [vmem:[%s999_s6 + $0x24] ss:$16 sps:$4 sm:$0xff] (!%p231_p7)   ;;  %v774_v47 = vld [vmem:[%s999_s6 + $0x2c] ss:$16 sps:$4 sm:$0xff] (!%p231_p7)  }
  0x2f   : > { %530 = vmatpush1.bf16.msra.mxu0 (!%p231_p7), %v770_v44  ;;  %571 = vmatpush1.bf16.msra.mxu1 (!%p231_p7), %v771_v45  ;;  %v776_v48 = vld [vmem:[%s999_s6 + $0x20] ss:$16 sps:$4 sm:$0xff] (!%p231_p7)   ;;  %v777_v49 = vld [vmem:[%s999_s6 + $0x28] ss:$16 sps:$4 sm:$0xff] (!%p231_p7)   ;;  %v778_v50 = vld [vmem:[%s999_s6 + $0x44] ss:$16 sps:$4 sm:$0xff] (!%p231_p7)  }
  0x30   : > { %531 = vmatprep.subr.bf16.mxu0 %v772_v46  ;;  %572 = vmatprep.subr.bf16.mxu1 %v774_v47  ;;  %v780_v51 = vld [vmem:[%s999_s6 + $0x4c] ss:$16 sps:$4 sm:$0xff]   ;;  %v782_v52 = vld [vmem:[%s999_s6 + $0x40] ss:$16 sps:$4 sm:$0xff]   ;;  %v783_v53 = vld [vmem:[%s999_s6 + $0x48] ss:$16 sps:$4 sm:$0xff]  }
  0x31   : > { %v784_v54 = vld [vmem:[%s999_s6 + $0x64] ss:$16 sps:$4 sm:$0xff]   ;;  %v786_v55 = vld [vmem:[%s999_s6 + $0x6c] ss:$16 sps:$4 sm:$0xff]   ;;  %v788_v56 = vld [vmem:[%s999_s6 + $0x60] ss:$16 sps:$4 sm:$0xff]  }
  0x32   : > { %v789_v57 = vld [vmem:[%s999_s6 + $0x68] ss:$16 sps:$4 sm:$0xff]   ;;  %v790_v58 = vld [vmem:[%s999_s6 + $0x84] ss:$16 sps:$4 sm:$0xff]   ;;  %v792_v59 = vld [vmem:[%s999_s6 + $0x8c] ss:$16 sps:$4 sm:$0xff]  }
  0x33   : > { %532 = vmatpush1.bf16.msra.mxu0 %v776_v48  ;;  %573 = vmatpush1.bf16.msra.mxu1 %v777_v49  ;;  %v794_v60 = vld [vmem:[%s999_s6 + $0x80] ss:$16 sps:$4 sm:$0xff]   ;;  %v795_v61 = vld [vmem:[%s999_s6 + $0x88] ss:$16 sps:$4 sm:$0xff]   ;;  %v796_v62 = vld [vmem:[%s999_s6 + $0xa4] ss:$16 sps:$4 sm:$0xff]  }
  0x34   : > { %533 = vmatprep.subr.bf16.mxu0 %v778_v50  ;;  %574 = vmatprep.subr.bf16.mxu1 %v780_v51  ;;  %v798_v63 = vld [vmem:[%s999_s6 + $0xac] ss:$16 sps:$4 sm:$0xff]   ;;  %v800_v0 = vld [vmem:[%s999_s6 + $0xa0] ss:$16 sps:$4 sm:$0xff]   ;;  %v801_v1 = vld [vmem:[%s999_s6 + $0xa8] ss:$16 sps:$4 sm:$0xff]  }
  0x35   : > { %v802_v2 = vld [vmem:[%s999_s6 + $0xc4] ss:$16 sps:$4 sm:$0xff]   ;;  %v804_v3 = vld [vmem:[%s999_s6 + $0xcc] ss:$16 sps:$4 sm:$0xff]   ;;  %v806_v4 = vld [vmem:[%s999_s6 + $0xc0] ss:$16 sps:$4 sm:$0xff]  }
  0x36   : > { %v807_v5 = vld [vmem:[%s999_s6 + $0xc8] ss:$16 sps:$4 sm:$0xff]   ;;  %v808_v6 = vld [vmem:[%s999_s6 + $0xe4] ss:$16 sps:$4 sm:$0xff]   ;;  %v810_v7 = vld [vmem:[%s999_s6 + $0xec] ss:$16 sps:$4 sm:$0xff]  }
  0x37   : > { %534 = vmatpush1.bf16.msra.mxu0 %v782_v52  ;;  %575 = vmatpush1.bf16.msra.mxu1 %v783_v53  ;;  %v305_v8 = vld [vmem:[%s999_s6 + $0x120] sm:$0x33]  ;;  %v306_v9 = vld [vmem:[%s999_s6 + $0x128] sm:$0x33]  ;;  %s1064_s7 = smov (!%p262_p8, %s688_s7), 15 }
  0x38   : > { %535 = vmatprep.subr.bf16.mxu0 %v784_v54  ;;  %576 = vmatprep.subr.bf16.mxu1 %v786_v55  ;;  %v812_v12 = vld [vmem:[%s999_s6 + $0xe0] ss:$16 sps:$4 sm:$0xff]   ;;  %v813_v13 = vld [vmem:[%s999_s6 + $0xe8] ss:$16 sps:$4 sm:$0xff]   ;;  %v814_v14 = vld [vmem:[%s999_s6 + $0x104] ss:$16 sps:$4 sm:$0xff]   ;;  %v729_v16 = vcombine.high %v305_v8, %v305_v8  ;;  %v731_v17 = vcombine.high %v306_v9, %v306_v9  ;;  %v728_v21 = vcombine.low %v305_v8, %v305_v8 }
  0x39   : > { %v816_v15 = vld [vmem:[%s999_s6 + $0x10c] ss:$16 sps:$4 sm:$0xff]   ;;  %v818_v19 = vld [vmem:[%s999_s6 + $0x100] ss:$16 sps:$4 sm:$0xff]   ;;  %v819_v20 = vld [vmem:[%s999_s6 + $0x108] ss:$16 sps:$4 sm:$0xff]   ;;  %v730_v22 = vcombine.low %v306_v9, %v306_v9 }
  0x3a   : > { %v521_v23 = vand.u32 %v729_v16, %v516_v18  ;;  %v527_v24 = vand.u32 %v731_v17, %v516_v18  ;;  %v518_v25 = vand.u32 %v728_v21, %v516_v18  ;;  %s689_s8 = sshll.u32 %s1064_s7, 3 }
  0x3b   : > { %536 = vmatpush1.bf16.msra.mxu0 %v788_v56  ;;  %577 = vmatpush1.bf16.msra.mxu1 %v789_v57  ;;  %v524_v26 = vand.u32 %v730_v22, %v516_v18  ;;  %s265_s11 = scalar_lea.vmem %s1059_s3, %s689_s8 }
  0x3c   : > { %537 = vmatprep.subr.bf16.mxu0 %v790_v58  ;;  %578 = vmatprep.subr.bf16.mxu1 %v792_v59 }
  0x3f   : > { %538 = vmatpush1.bf16.msra.mxu0 %v794_v60  ;;  %579 = vmatpush1.bf16.msra.mxu1 %v795_v61 }
  0x40   : > { %539 = vmatprep.subr.bf16.mxu0 %v796_v62  ;;  %580 = vmatprep.subr.bf16.mxu1 %v798_v63 }
  0x43   : > { %540 = vmatpush1.bf16.msra.mxu0 %v800_v0  ;;  %581 = vmatpush1.bf16.msra.mxu1 %v801_v1 }
  0x44   : > { %541 = vmatprep.subr.bf16.mxu0 %v802_v2  ;;  %582 = vmatprep.subr.bf16.mxu1 %v804_v3 }
  0x47   : > { %542 = vmatpush1.bf16.msra.mxu0 %v806_v4  ;;  %583 = vmatpush1.bf16.msra.mxu1 %v807_v5 }
  0x48   : > { %543 = vmatprep.subr.bf16.mxu0 %v808_v6  ;;  %584 = vmatprep.subr.bf16.mxu1 %v810_v7 }
  0x4b   : > { %544 = vmatpush1.bf16.msra.mxu0 %v812_v12  ;;  %585 = vmatpush1.bf16.msra.mxu1 %v813_v13 }
  0x4c   : > { %545 = vmatprep.subr.bf16.mxu0 %v814_v14  ;;  %586 = vmatprep.subr.bf16.mxu1 %v816_v15 }
  0x4f   : > { %546 = vmatpush1.bf16.msra.mxu0 %v818_v19  ;;  %587 = vmatpush1.bf16.msra.mxu1 %v819_v20 }
  0x50   : > { %547 = vmatprep.subr.bf16.mxu0 %v521_v23  ;;  %588 = vmatprep.subr.bf16.mxu1 %v527_v24 }
  0x53   : > { %548 = vmatpush1.bf16.msra.mxu0 %v518_v25  ;;  %589 = vmatpush1.bf16.msra.mxu1 %v524_v26 }
  0x56   : > { %562 = vmatmul.mubr.bf16.vlgmr.msra.gmra.mrb[0].mxu0 %v690_v27  ;;  %603 = vmatmul.mubr.bf16.vlgmr.msra.gmra.mrb[0].mxu1 %v690_v27 }
  0xa9   : > { %v311_v28 = vpop.permute.xlu0 %310 }
 0x129   : > { %v563_v29 = vpop.f32.mrb[0].mxu0  ;;  %v604_v30 = vpop.f32.mrb[0].mxu1 }
 0x12a   : > { %v564_v31 = vadd.f32 %v563_v29, %v311_v28  ;;  %v605_v32 = vadd.f32 %v604_v30, %v311_v28  ;;  %v565_v33 = vpop.f32.mrb[1].mxu0  ;;  %v606_v34 = vpop.f32.mrb[1].mxu1 }
 0x12b   : > { %v566_v35 = vadd.f32 %v565_v33, %v311_v28  ;;  %v607_v36 = vadd.f32 %v606_v34, %v311_v28  ;;  %v567_v37 = vpop.f32.mrb[2].mxu0  ;;  %v608_v38 = vpop.f32.mrb[2].mxu1 }
 0x12c   : > { %v611_v39 = vmax.f32 %v564_v31, 0.0  ;;  %v613_v40 = vmax.f32 %v605_v32, 0.0  ;;  %v568_v41 = vpop.f32.mrb[3].mxu0  ;;  %v609_v42 = vpop.f32.mrb[3].mxu1 }
 0x12d   : > { %v612_v43 = vmax.f32 %v566_v35, 0.0  ;;  %v614_v44 = vmax.f32 %v607_v36, 0.0 }
 0x12e   : > { %615 = vst [vmem:[%s265_s11] sm:$0xff] %v611_v39  ;;  %617 = vst [vmem:[%s265_s11 + $0x10] sm:$0xff] %v613_v40 }
 0x12f   : > { %616 = vst [vmem:[%s265_s11 + $0x8] sm:$0xff] %v612_v43  ;;  %618 = vst [vmem:[%s265_s11 + $0x18] sm:$0xff] %v614_v44 }
 0x130 PF: > { %p10_p9 = scmp.ge.s32.totalorder %s889_s16, 6   ;;  %s1060_s12 = smov %s844_s13 }
 0x131   : > { %s1061_s13 = smov %s898_s19  ;;  %s1062_s14 = smov %s889_s16 }
 0x132   :  { %12 = sbr.rel (!%p10_p9) target bundleno = 2 (0x2), region = 90 }

// kernel: my_resnet_forward.11
= control target key start
LH: loop header
LB: loop body
LE: loop exit
PB: predicated region body
PF: predicated region fallthrough
CT: control target
= control target key end

     0   :  { %s254_s0 = inlined_call_operand.vmem [shape: f32[9,16,256], index: 0, kind: input, shape index: {}]   ;;  %s255_s1 = inlined_call_operand.vmem [shape: f32[16,256], index: 1, kind: output, shape index: {}]  }
   0x1   :  { %v8_v0 = vld [vmem:[%s254_s0] sm:$0xff]  ;;  %v9_v6 = vld [vmem:[%s254_s0 + $0x8] sm:$0xff]  ;;  %v10_v15 = vld [vmem:[%s254_s0 + $0x10] sm:$0xff] }
   0x2   :  { %v92_v1 = vld [vmem:[%s254_s0 + $0x20] sm:$0xff]  ;;  %v93_v7 = vld [vmem:[%s254_s0 + $0x28] sm:$0xff]  ;;  %v94_v16 = vld [vmem:[%s254_s0 + $0x30] sm:$0xff] }
   0x3   :  { %v96_v2 = vld [vmem:[%s254_s0 + $0x40] sm:$0xff]  ;;  %v17_v3 = vmax.f32 %v8_v0, %v92_v1  ;;  %v97_v8 = vld [vmem:[%s254_s0 + $0x48] sm:$0xff]  ;;  %v18_v10 = vmax.f32 %v9_v6, %v93_v7  ;;  %v98_v17 = vld [vmem:[%s254_s0 + $0x50] sm:$0xff]  ;;  %v19_v20 = vmax.f32 %v10_v15, %v94_v16 }
   0x4   :  { %v100_v4 = vld [vmem:[%s254_s0 + $0x60] sm:$0xff]  ;;  %v101_v13 = vld [vmem:[%s254_s0 + $0x68] sm:$0xff]  ;;  %v102_v24 = vld [vmem:[%s254_s0 + $0x70] sm:$0xff] }
   0x5   :  { %v26_v5 = vmax.f32 %v17_v3, %v96_v2  ;;  %v104_v9 = vld [vmem:[%s254_s0 + $0x80] sm:$0xff]  ;;  %v27_v14 = vmax.f32 %v18_v10, %v97_v8  ;;  %v105_v19 = vld [vmem:[%s254_s0 + $0x88] sm:$0xff]  ;;  %v28_v26 = vmax.f32 %v19_v20, %v98_v17  ;;  %v11_v27 = vld [vmem:[%s254_s0 + $0x18] sm:$0xff] }
   0x6   :  { %v108_v12 = vld [vmem:[%s254_s0 + $0xa0] sm:$0xff]  ;;  %v109_v23 = vld [vmem:[%s254_s0 + $0xa8] sm:$0xff]  ;;  %v95_v28 = vld [vmem:[%s254_s0 + $0x38] sm:$0xff] }
   0x7   :  { %v35_v11 = vmax.f32 %v26_v5, %v100_v4  ;;  %v112_v21 = vld [vmem:[%s254_s0 + $0xc0] sm:$0xff]  ;;  %v36_v22 = vmax.f32 %v27_v14, %v101_v13  ;;  %v99_v29 = vld [vmem:[%s254_s0 + $0x58] sm:$0xff]  ;;  %v106_v32 = vld [vmem:[%s254_s0 + $0x90] sm:$0xff]  ;;  %v20_v33 = vmax.f32 %v11_v27, %v95_v28  ;;  %v37_v36 = vmax.f32 %v28_v26, %v102_v24 }
   0x8   :  { %v116_v30 = vld [vmem:[%s254_s0 + $0xe0] sm:$0xff]  ;;  %v113_v35 = vld [vmem:[%s254_s0 + $0xc8] sm:$0xff]  ;;  %v103_v37 = vld [vmem:[%s254_s0 + $0x78] sm:$0xff] }
   0x9   :  { %v44_v18 = vmax.f32 %v35_v11, %v104_v9  ;;  %v45_v31 = vmax.f32 %v36_v22, %v105_v19  ;;  %v120_v38 = vld [vmem:[%s254_s0 + $0x100] sm:$0xff]  ;;  %v110_v40 = vld [vmem:[%s254_s0 + $0xb0] sm:$0xff]  ;;  %v29_v41 = vmax.f32 %v20_v33, %v99_v29  ;;  %v117_v43 = vld [vmem:[%s254_s0 + $0xe8] sm:$0xff]  ;;  %v46_v44 = vmax.f32 %v37_v36, %v106_v32 }
   0xa   :  { %v107_v45 = vld [vmem:[%s254_s0 + $0x98] sm:$0xff]  ;;  %v114_v47 = vld [vmem:[%s254_s0 + $0xd0] sm:$0xff]  ;;  %v121_v50 = vld [vmem:[%s254_s0 + $0x108] sm:$0xff] }
   0xb   :  { %v53_v25 = vmax.f32 %v44_v18, %v108_v12  ;;  %v54_v39 = vmax.f32 %v45_v31, %v109_v23  ;;  %v38_v48 = vmax.f32 %v29_v41, %v103_v37  ;;  %v55_v51 = vmax.f32 %v46_v44, %v110_v40  ;;  %v111_v52 = vld [vmem:[%s254_s0 + $0xb8] sm:$0xff]  ;;  %v118_v54 = vld [vmem:[%s254_s0 + $0xf0] sm:$0xff] }
   0xc   :  { %v115_v57 = vld [vmem:[%s254_s0 + $0xd8] sm:$0xff]  ;;  %v122_v59 = vld [vmem:[%s254_s0 + $0x110] sm:$0xff] }
   0xd   :  { %v62_v34 = vmax.f32 %v53_v25, %v112_v21  ;;  %v63_v46 = vmax.f32 %v54_v39, %v113_v35  ;;  %v47_v55 = vmax.f32 %v38_v48, %v107_v45  ;;  %v64_v56 = vmax.f32 %v55_v51, %v114_v47  ;;  %v119_v62 = vld [vmem:[%s254_s0 + $0xf8] sm:$0xff] }
   0xe   :  { %v123_v1 = vld [vmem:[%s254_s0 + $0x118] sm:$0xff] }
   0xf   :  { %v71_v42 = vmax.f32 %v62_v34, %v116_v30  ;;  %v72_v53 = vmax.f32 %v63_v46, %v117_v43  ;;  %v56_v60 = vmax.f32 %v47_v55, %v111_v52  ;;  %v73_v61 = vmax.f32 %v64_v56, %v118_v54 }
  0x11   :  { %v80_v49 = vmax.f32 %v71_v42, %v120_v38  ;;  %v81_v58 = vmax.f32 %v72_v53, %v121_v50  ;;  %v65_v63 = vmax.f32 %v56_v60, %v115_v57  ;;  %v82_v0 = vmax.f32 %v73_v61, %v122_v59 }
  0x13   :  { %84 = vst [vmem:[%s255_s1] sm:$0xff] %v80_v49  ;;  %85 = vst [vmem:[%s255_s1 + $0x8] sm:$0xff] %v81_v58  ;;  %v74_v2 = vmax.f32 %v65_v63, %v119_v62 }
  0x14   :  { %86 = vst [vmem:[%s255_s1 + $0x10] sm:$0xff] %v82_v0 }
  0x15   :  { %v83_v3 = vmax.f32 %v74_v2, %v123_v1 }
  0x17   :  { %87 = vst [vmem:[%s255_s1 + $0x18] sm:$0xff] %v83_v3 }

// kernel: my_resnet_forward.12
= control target key start
LH: loop header
LB: loop body
LE: loop exit
PB: predicated region body
PF: predicated region fallthrough
CT: control target
= control target key end

     0   :  { %v295_v1 = vmov 0   ;;  %vm134_vm0 = vcmask 1043456   ;;  %vm130_vm1 = vcmask 588800   ;;  %s388_s1 = inlined_call_operand.vmem [shape: bf16[72,512], index: 1, kind: input, shape index: {}]   ;;  %s389_s2 = inlined_call_operand.vmem [shape: f32[8,1], index: 2, kind: input, shape index: {}]   ;;  %s390_s0 = inlined_call_operand.vmem [shape: bf16[8,72], index: 0, kind: input, shape index: {}]   ;;  %s391_s3 = inlined_call_operand.vmem [shape: f32[8,512], index: 3, kind: output, shape index: {}]  }
   0x1   :  { %v267_v0 = vld [vmem:[%s388_s1 + $0x4] ss:$16 sps:$4 sm:$0xff]   ;;  %179 = vmatprep.mubr.bf16.mxu0 %v295_v1  ;;  %220 = vmatprep.mubr.bf16.mxu1 %v295_v1  ;;  %v269_v2 = vld [vmem:[%s388_s1 + $0xc] ss:$16 sps:$4 sm:$0xff]   ;;  %v271_v3 = vld [vmem:[%s388_s1] ss:$16 sps:$4 sm:$0xff]  }
   0x2   :  { %266 = vset.pattern.permute.xlu0 %v295_v1  ;;  %147 = vmatprep.subr.bf16.mxu0 %v267_v0  ;;  %v272_v4 = vld [vmem:[%s388_s1 + $0x8] ss:$16 sps:$4 sm:$0xff]   ;;  %v273_v5 = vld [vmem:[%s388_s1 + $0x24] ss:$16 sps:$4 sm:$0xff]   ;;  %v275_v6 = vld [vmem:[%s388_s1 + $0x2c] ss:$16 sps:$4 sm:$0xff]  }
   0x3   :  { %188 = vmatprep.subr.bf16.mxu1 %v269_v2  ;;  %148 = vmatpush1.bf16.msra.mxu0 %v271_v3  ;;  %v277_v7 = vld [vmem:[%s388_s1 + $0x20] ss:$16 sps:$4 sm:$0xff]   ;;  %v278_v8 = vld [vmem:[%s388_s1 + $0x28] ss:$16 sps:$4 sm:$0xff]   ;;  %v279_v9 = vld [vmem:[%s388_s1 + $0x44] ss:$16 sps:$4 sm:$0xff]  }
   0x4   :  { %189 = vmatpush1.bf16.msra.mxu1 %v272_v4  ;;  %149 = vmatprep.subr.bf16.mxu0 %v273_v5  ;;  %v281_v10 = vld [vmem:[%s388_s1 + $0x4c] ss:$16 sps:$4 sm:$0xff]   ;;  %v283_v11 = vld [vmem:[%s388_s1 + $0x40] ss:$16 sps:$4 sm:$0xff]   ;;  %v284_v12 = vld [vmem:[%s388_s1 + $0x48] ss:$16 sps:$4 sm:$0xff]  }
   0x5   :  { %190 = vmatprep.subr.bf16.mxu1 %v275_v6  ;;  %v285_v13 = vld [vmem:[%s388_s1 + $0x64] ss:$16 sps:$4 sm:$0xff]   ;;  %v287_v14 = vld [vmem:[%s388_s1 + $0x6c] ss:$16 sps:$4 sm:$0xff]   ;;  %v289_v18 = vld [vmem:[%s388_s1 + $0x60] ss:$16 sps:$4 sm:$0xff]  }
   0x6   :  { %v32_v15 = vld [vmem:[%s388_s1 + $0x80] sm:$0xff]  ;;  %v33_v16 = vld [vmem:[%s388_s1 + $0x88] sm:$0xff] }
   0x7   :  { %150 = vmatpush1.bf16.msra.mxu0 %v277_v7  ;;  %v34_v17 = vld [vmem:[%s389_s2] sm:$0xff]  ;;  %v290_v19 = vld [vmem:[%s388_s1 + $0x68] ss:$16 sps:$4 sm:$0xff]   ;;  %v258_v20 = vcombine.high %v32_v15, %v32_v15  ;;  %v260_v21 = vcombine.high %v33_v16, %v33_v16  ;;  %v257_v22 = vcombine.low %v32_v15, %v32_v15  ;;  %v259_v23 = vcombine.low %v33_v16, %v33_v16 }
   0x8   :  { %191 = vmatpush1.bf16.msra.mxu1 %v278_v8  ;;  %151 = vmatprep.subr.bf16.mxu0 %v279_v9  ;;  %v15_v26 = vld [vmem:[%s390_s0] sm:$0xf] }
   0x9   :  { %192 = vmatprep.subr.bf16.mxu1 %v281_v10  ;;  %37 = vperm.xlu0 %266, %v34_v17   ;;  %v136_v24 = vsel %vm134_vm0, %v257_v22, 0  ;;  %v142_v25 = vsel %vm134_vm0, %v259_v23, 0 }
   0xb   :  { %152 = vmatpush1.bf16.msra.mxu0 %v283_v11 }
   0xc   :  { %193 = vmatpush1.bf16.msra.mxu1 %v284_v12  ;;  %153 = vmatprep.subr.bf16.mxu0 %v285_v13 }
   0xd   :  { %194 = vmatprep.subr.bf16.mxu1 %v287_v14 }
   0xf   :  { %154 = vmatpush1.bf16.msra.mxu0 %v289_v18 }
  0x10   :  { %195 = vmatpush1.bf16.msra.mxu1 %v290_v19  ;;  %261 = vmatprep.subr.msk.bf16.mxu0 %vm134_vm0, %v258_v20 }
  0x11   :  { %263 = vmatprep.subr.msk.bf16.mxu1 %vm134_vm0, %v260_v21 }
  0x13   :  { %156 = vmatpush1.bf16.msra.mxu0 %v136_v24 }
  0x14   :  { %197 = vmatpush1.bf16.msra.mxu1 %v142_v25 }
  0x16   :  { %262 = vmatmul.mubr.msk.bf16.vlgmr.msra.gmra.mrb[0].mxu0 %vm130_vm1, %v15_v26 }
  0x17   :  { %264 = vmatmul.mubr.msk.bf16.vlgmr.msra.gmra.mrb[0].mxu1 %vm130_vm1, %v15_v26 }
  0x88   :  { %v38_v27 = vpop.permute.xlu0 %37 }
  0xe9   :  { %v181_v28 = vpop.f32.mrb[0].mxu0 }
  0xea   :  { %v222_v29 = vpop.f32.mrb[0].mxu1  ;;  %v182_v30 = vadd.f32 %v181_v28, %v38_v27  ;;  %v183_v32 = vpop.f32.mrb[1].mxu0 }
  0xeb   :  { %v223_v31 = vadd.f32 %v222_v29, %v38_v27  ;;  %v224_v33 = vpop.f32.mrb[1].mxu1  ;;  %v184_v34 = vadd.f32 %v183_v32, %v38_v27  ;;  %v185_v36 = vpop.f32.mrb[2].mxu0 }
  0xec   :  { %v225_v35 = vadd.f32 %v224_v33, %v38_v27  ;;  %v226_v37 = vpop.f32.mrb[2].mxu1  ;;  %v229_v38 = vmax.f32 %v182_v30, 0.0  ;;  %v186_v40 = vpop.f32.mrb[3].mxu0 }
  0xed   :  { %v231_v39 = vmax.f32 %v223_v31, 0.0  ;;  %v227_v41 = vpop.f32.mrb[3].mxu1  ;;  %v230_v42 = vmax.f32 %v184_v34, 0.0 }
  0xee   :  { %v232_v43 = vmax.f32 %v225_v35, 0.0  ;;  %233 = vst [vmem:[%s391_s3] sm:$0xff] %v229_v38 }
  0xef   :  { %235 = vst [vmem:[%s391_s3 + $0x10] sm:$0xff] %v231_v39  ;;  %234 = vst [vmem:[%s391_s3 + $0x8] sm:$0xff] %v230_v42 }
  0xf0   :  { %236 = vst [vmem:[%s391_s3 + $0x18] sm:$0xff] %v232_v43 }

// kernel: my_resnet_forward.13
= control target key start
LH: loop header
LB: loop body
LE: loop exit
PB: predicated region body
PF: predicated region fallthrough
CT: control target
= control target key end

     0   :  { %v655_v1 = vmov 0   ;;  %vm142_vm0 = vcmask 1043456   ;;  %vm138_vm1 = vcmask 588800   ;;  %vm457_vm2 = vcmask 64512   ;;  %s972_s0 = inlined_call_operand.vmem [shape: bf16[72,512], index: 0, kind: input, shape index: {}]   ;;  %s973_s2 = inlined_call_operand.vmem [shape: f32[8,1], index: 2, kind: input, shape index: {}]   ;;  %s974_s4 = inlined_call_operand.vmem [shape: f32[512,8], index: 4, kind: input, shape index: {}]   ;;  %s975_s1 = inlined_call_operand.vmem [shape: bf16[8,72], index: 1, kind: input, shape index: {}]   ;;  %s976_s3 = inlined_call_operand.vmem [shape: f32[8,512], index: 3, kind: input, shape index: {}]   ;;  %s977_s5 = inlined_call_operand.vmem [shape: f32[8,512], index: 5, kind: output, shape index: {0}]   ;;  %s978_s6 = inlined_call_operand.vmem [shape: f32[8,8], index: 6, kind: output, shape index: {1}]  }
   0x1   :  { %v627_v0 = vld [vmem:[%s972_s0 + $0x4] ss:$16 sps:$4 sm:$0xff]   ;;  %187 = vmatprep.mubr.bf16.mxu0 %v655_v1  ;;  %228 = vmatprep.mubr.bf16.mxu1 %v655_v1  ;;  %v629_v2 = vld [vmem:[%s972_s0 + $0xc] ss:$16 sps:$4 sm:$0xff]   ;;  %v631_v3 = vld [vmem:[%s972_s0] ss:$16 sps:$4 sm:$0xff]  }
   0x2   :  { %626 = vset.pattern.permute.xlu0 %v655_v1  ;;  %155 = vmatprep.subr.bf16.mxu0 %v627_v0  ;;  %v632_v4 = vld [vmem:[%s972_s0 + $0x8] ss:$16 sps:$4 sm:$0xff]   ;;  %v633_v5 = vld [vmem:[%s972_s0 + $0x24] ss:$16 sps:$4 sm:$0xff]   ;;  %v635_v6 = vld [vmem:[%s972_s0 + $0x2c] ss:$16 sps:$4 sm:$0xff]  }
   0x3   :  { %196 = vmatprep.subr.bf16.mxu1 %v629_v2  ;;  %156 = vmatpush1.bf16.msra.mxu0 %v631_v3  ;;  %v637_v7 = vld [vmem:[%s972_s0 + $0x20] ss:$16 sps:$4 sm:$0xff]   ;;  %v638_v8 = vld [vmem:[%s972_s0 + $0x28] ss:$16 sps:$4 sm:$0xff]   ;;  %v639_v9 = vld [vmem:[%s972_s0 + $0x44] ss:$16 sps:$4 sm:$0xff]  }
   0x4   :  { %197 = vmatpush1.bf16.msra.mxu1 %v632_v4  ;;  %157 = vmatprep.subr.bf16.mxu0 %v633_v5  ;;  %v641_v10 = vld [vmem:[%s972_s0 + $0x4c] ss:$16 sps:$4 sm:$0xff]   ;;  %v643_v11 = vld [vmem:[%s972_s0 + $0x40] ss:$16 sps:$4 sm:$0xff]   ;;  %v644_v12 = vld [vmem:[%s972_s0 + $0x48] ss:$16 sps:$4 sm:$0xff]  }
   0x5   :  { %198 = vmatprep.subr.bf16.mxu1 %v635_v6  ;;  %v645_v13 = vld [vmem:[%s972_s0 + $0x64] ss:$16 sps:$4 sm:$0xff]   ;;  %v647_v14 = vld [vmem:[%s972_s0 + $0x6c] ss:$16 sps:$4 sm:$0xff]   ;;  %v649_v18 = vld [vmem:[%s972_s0 + $0x60] ss:$16 sps:$4 sm:$0xff]  }
   0x6   :  { %v40_v15 = vld [vmem:[%s972_s0 + $0x80] sm:$0xff]  ;;  %v41_v16 = vld [vmem:[%s972_s0 + $0x88] sm:$0xff]  ;;  %v271_v36 = vld [vmem:[%s974_s4 + $0x90] sm:$0xff] }
   0x7   :  { %158 = vmatpush1.bf16.msra.mxu0 %v637_v7  ;;  %v42_v17 = vld [vmem:[%s973_s2] sm:$0xff]  ;;  %v650_v19 = vld [vmem:[%s972_s0 + $0x68] ss:$16 sps:$4 sm:$0xff]   ;;  %v484_v20 = vcombine.high %v40_v15, %v40_v15  ;;  %v486_v21 = vcombine.high %v41_v16, %v41_v16  ;;  %v483_v22 = vcombine.low %v40_v15, %v40_v15  ;;  %v485_v23 = vcombine.low %v41_v16, %v41_v16  ;;  %v303_v38 = vld [vmem:[%s974_s4 + $0x190] sm:$0xff] }
   0x8   :  { %199 = vmatpush1.bf16.msra.mxu1 %v638_v8  ;;  %159 = vmatprep.subr.bf16.mxu0 %v639_v9  ;;  %v269_v24 = vld [vmem:[%s974_s4 + $0x80] sm:$0xff]  ;;  %v270_v25 = vld [vmem:[%s974_s4 + $0x88] sm:$0xff]  ;;  %v272_v37 = vld [vmem:[%s974_s4 + $0x98] sm:$0xff] }
   0x9   :  { %200 = vmatprep.subr.bf16.mxu1 %v641_v10  ;;  %45 = vperm.xlu0 %626, %v42_v17   ;;  %v301_v26 = vld [vmem:[%s974_s4 + $0x180] sm:$0xff]  ;;  %v302_v27 = vld [vmem:[%s974_s4 + $0x188] sm:$0xff]  ;;  %v144_v30 = vsel %vm142_vm0, %v483_v22, 0  ;;  %v150_v31 = vsel %vm142_vm0, %v485_v23, 0  ;;  %v561_v32 = vpack.c.bf16 %v270_v25, %v269_v24  ;;  %v304_v39 = vld [vmem:[%s974_s4 + $0x198] sm:$0xff]  ;;  %v565_v45 = vpack.c.bf16 %v272_v37, %v271_v36 }
   0xa   :  { %v253_v28 = vld [vmem:[%s974_s4] sm:$0xff]  ;;  %v254_v29 = vld [vmem:[%s974_s4 + $0x8] sm:$0xff]  ;;  %v593_v33 = vpack.c.bf16 %v302_v27, %v301_v26  ;;  %v255_v43 = vld [vmem:[%s974_s4 + $0x10] sm:$0xff]  ;;  %v597_v46 = vpack.c.bf16 %v304_v39, %v303_v38 }
   0xb   :  { %160 = vmatpush1.bf16.msra.mxu0 %v643_v11  ;;  %v285_v34 = vld [vmem:[%s974_s4 + $0x100] sm:$0xff]  ;;  %v286_v35 = vld [vmem:[%s974_s4 + $0x108] sm:$0xff]  ;;  %v563_v41 = vpack.c.bf16 %v254_v29, %v253_v28  ;;  %v256_v44 = vld [vmem:[%s974_s4 + $0x18] sm:$0xff] }
   0xc   :  { %201 = vmatpush1.bf16.msra.mxu1 %v644_v12  ;;  %161 = vmatprep.subr.bf16.mxu0 %v645_v13  ;;  %v23_v40 = vld [vmem:[%s975_s1] sm:$0xf]  ;;  %v595_v42 = vpack.c.bf16 %v286_v35, %v285_v34  ;;  %v287_v47 = vld [vmem:[%s974_s4 + $0x110] sm:$0xff]  ;;  %v288_v48 = vld [vmem:[%s974_s4 + $0x118] sm:$0xff]  ;;  %v567_v53 = vpack.c.bf16 %v256_v44, %v255_v43 }
   0xd   :  { %202 = vmatprep.subr.bf16.mxu1 %v647_v14  ;;  %v273_v49 = vld [vmem:[%s974_s4 + $0xa0] sm:$0xff]  ;;  %v274_v50 = vld [vmem:[%s974_s4 + $0xa8] sm:$0xff]  ;;  %v599_v54 = vpack.c.bf16 %v288_v48, %v287_v47  ;;  %v275_v61 = vld [vmem:[%s974_s4 + $0xb0] sm:$0xff] }
   0xe   :  { %v305_v51 = vld [vmem:[%s974_s4 + $0x1a0] sm:$0xff]  ;;  %v306_v52 = vld [vmem:[%s974_s4 + $0x1a8] sm:$0xff]  ;;  %v569_v57 = vpack.c.bf16 %v274_v50, %v273_v49  ;;  %v276_v62 = vld [vmem:[%s974_s4 + $0xb8] sm:$0xff] }
   0xf   :  { %162 = vmatpush1.bf16.msra.mxu0 %v649_v18  ;;  %v257_v55 = vld [vmem:[%s974_s4 + $0x20] sm:$0xff]  ;;  %v258_v56 = vld [vmem:[%s974_s4 + $0x28] sm:$0xff]  ;;  %v601_v58 = vpack.c.bf16 %v306_v52, %v305_v51  ;;  %v307_v63 = vld [vmem:[%s974_s4 + $0x1b0] sm:$0xff]  ;;  %v573_v5 = vpack.c.bf16 %v276_v62, %v275_v61 }
  0x10   :  { %203 = vmatpush1.bf16.msra.mxu1 %v650_v19  ;;  %487 = vmatprep.subr.msk.bf16.mxu0 %vm142_vm0, %v484_v20  ;;  %v289_v59 = vld [vmem:[%s974_s4 + $0x120] sm:$0xff]  ;;  %v290_v60 = vld [vmem:[%s974_s4 + $0x128] sm:$0xff]  ;;  %v308_v0 = vld [vmem:[%s974_s4 + $0x1b8] sm:$0xff]  ;;  %v571_v1 = vpack.c.bf16 %v258_v56, %v257_v55 }
  0x11   :  { %489 = vmatprep.subr.msk.bf16.mxu1 %vm142_vm0, %v486_v21  ;;  %v603_v2 = vpack.c.bf16 %v290_v60, %v289_v59  ;;  %v259_v3 = vld [vmem:[%s974_s4 + $0x30] sm:$0xff]  ;;  %v260_v4 = vld [vmem:[%s974_s4 + $0x38] sm:$0xff]  ;;  %v605_v6 = vpack.c.bf16 %v308_v0, %v307_v63  ;;  %v277_v9 = vld [vmem:[%s974_s4 + $0xc0] sm:$0xff] }
  0x12   :  { %v291_v7 = vld [vmem:[%s974_s4 + $0x130] sm:$0xff]  ;;  %v292_v8 = vld [vmem:[%s974_s4 + $0x138] sm:$0xff]  ;;  %v278_v10 = vld [vmem:[%s974_s4 + $0xc8] sm:$0xff]  ;;  %v575_v13 = vpack.c.bf16 %v260_v4, %v259_v3 }
  0x13   :  { %164 = vmatpush1.bf16.msra.mxu0 %v144_v30  ;;  %v309_v11 = vld [vmem:[%s974_s4 + $0x1c0] sm:$0xff]  ;;  %v310_v12 = vld [vmem:[%s974_s4 + $0x1c8] sm:$0xff]  ;;  %v607_v14 = vpack.c.bf16 %v292_v8, %v291_v7  ;;  %v577_v17 = vpack.c.bf16 %v278_v10, %v277_v9  ;;  %v279_v21 = vld [vmem:[%s974_s4 + $0xd0] sm:$0xff] }
  0x14   :  { %205 = vmatpush1.bf16.msra.mxu1 %v150_v31  ;;  %562 = vmatprep.subr.bf16.mxu0 %v561_v32  ;;  %v261_v15 = vld [vmem:[%s974_s4 + $0x40] sm:$0xff]  ;;  %v262_v16 = vld [vmem:[%s974_s4 + $0x48] sm:$0xff]  ;;  %v609_v18 = vpack.c.bf16 %v310_v12, %v309_v11  ;;  %v280_v22 = vld [vmem:[%s974_s4 + $0xd8] sm:$0xff] }
  0x15   :  { %594 = vmatprep.subr.bf16.mxu1 %v593_v33  ;;  %v293_v19 = vld [vmem:[%s974_s4 + $0x140] sm:$0xff]  ;;  %v294_v20 = vld [vmem:[%s974_s4 + $0x148] sm:$0xff]  ;;  %v311_v23 = vld [vmem:[%s974_s4 + $0x1d0] sm:$0xff]  ;;  %v579_v25 = vpack.c.bf16 %v262_v16, %v261_v15  ;;  %v581_v28 = vpack.c.bf16 %v280_v22, %v279_v21 }
  0x16   :  { %488 = vmatmul.mubr.msk.bf16.vlgmr.msra.gmra.mrb[0].mxu0 %vm138_vm1, %v23_v40  ;;  %v312_v24 = vld [vmem:[%s974_s4 + $0x1d8] sm:$0xff]  ;;  %v611_v26 = vpack.c.bf16 %v294_v20, %v293_v19  ;;  %v263_v27 = vld [vmem:[%s974_s4 + $0x50] sm:$0xff]  ;;  %v281_v35 = vld [vmem:[%s974_s4 + $0xe0] sm:$0xff] }
  0x17   :  { %490 = vmatmul.mubr.msk.bf16.vlgmr.msra.gmra.mrb[0].mxu1 %vm138_vm1, %v23_v40  ;;  %564 = vmatpush3.bf16.msra.mxu0 %v563_v41  ;;  %v613_v29 = vpack.c.bf16 %v312_v24, %v311_v23  ;;  %v264_v30 = vld [vmem:[%s974_s4 + $0x58] sm:$0xff]  ;;  %v295_v31 = vld [vmem:[%s974_s4 + $0x150] sm:$0xff]  ;;  %v282_v36 = vld [vmem:[%s974_s4 + $0xe8] sm:$0xff] }
  0x18   :  { %596 = vmatpush3.bf16.msra.mxu1 %v595_v42  ;;  %566 = vmatprep.subr.bf16.mxu0 %v565_v45  ;;  %v296_v32 = vld [vmem:[%s974_s4 + $0x158] sm:$0xff]  ;;  %v583_v33 = vpack.c.bf16 %v264_v30, %v263_v27  ;;  %v313_v37 = vld [vmem:[%s974_s4 + $0x1e0] sm:$0xff]  ;;  %v585_v38 = vpack.c.bf16 %v282_v36, %v281_v35  ;;  %v314_v39 = vld [vmem:[%s974_s4 + $0x1e8] sm:$0xff] }
  0x19   :  { %598 = vmatprep.subr.bf16.mxu1 %v597_v46  ;;  %v615_v34 = vpack.c.bf16 %v296_v32, %v295_v31  ;;  %v265_v40 = vld [vmem:[%s974_s4 + $0x60] sm:$0xff]  ;;  %v266_v41 = vld [vmem:[%s974_s4 + $0x68] sm:$0xff]  ;;  %v617_v42 = vpack.c.bf16 %v314_v39, %v313_v37  ;;  %v283_v47 = vld [vmem:[%s974_s4 + $0xf0] sm:$0xff] }
  0x1a   :  { %v587_v43 = vpack.c.bf16 %v266_v41, %v265_v40  ;;  %v297_v44 = vld [vmem:[%s974_s4 + $0x160] sm:$0xff]  ;;  %v298_v45 = vld [vmem:[%s974_s4 + $0x168] sm:$0xff]  ;;  %v284_v48 = vld [vmem:[%s974_s4 + $0xf8] sm:$0xff] }
  0x1b   :  { %568 = vmatpush3.bf16.msra.mxu0 %v567_v53  ;;  %v619_v46 = vpack.c.bf16 %v298_v45, %v297_v44  ;;  %v589_v49 = vpack.c.bf16 %v284_v48, %v283_v47  ;;  %v315_v50 = vld [vmem:[%s974_s4 + $0x1f0] sm:$0xff]  ;;  %v316_v51 = vld [vmem:[%s974_s4 + $0x1f8] sm:$0xff]  ;;  %v237_v61 = vld [vmem:[%s976_s3] sm:$0xff] }
  0x1c   :  { %600 = vmatpush3.bf16.msra.mxu1 %v599_v54  ;;  %570 = vmatprep.subr.bf16.mxu0 %v569_v57  ;;  %v267_v52 = vld [vmem:[%s974_s4 + $0x70] sm:$0xff]  ;;  %v268_v53 = vld [vmem:[%s974_s4 + $0x78] sm:$0xff]  ;;  %v621_v54 = vpack.c.bf16 %v316_v51, %v315_v50  ;;  %v238_v3 = vld [vmem:[%s976_s3 + $0x8] sm:$0xff] }
  0x1d   :  { %602 = vmatprep.subr.bf16.mxu1 %v601_v58  ;;  %v591_v55 = vpack.c.bf16 %v268_v53, %v267_v52  ;;  %v299_v56 = vld [vmem:[%s974_s4 + $0x170] sm:$0xff]  ;;  %v300_v57 = vld [vmem:[%s974_s4 + $0x178] sm:$0xff] }
  0x1e   :  { %v623_v58 = vpack.c.bf16 %v300_v57, %v299_v56  ;;  %v239_v63 = vld [vmem:[%s976_s3 + $0x10] sm:$0xff] }
  0x1f   :  { %572 = vmatpush3.bf16.msra.mxu0 %v571_v1 }
  0x20   :  { %604 = vmatpush3.bf16.msra.mxu1 %v603_v2  ;;  %574 = vmatprep.subr.bf16.mxu0 %v573_v5  ;;  %v240_v5 = vld [vmem:[%s976_s3 + $0x18] sm:$0xff] }
  0x21   :  { %606 = vmatprep.subr.bf16.mxu1 %v605_v6 }
  0x23   :  { %576 = vmatpush3.bf16.msra.mxu0 %v575_v13 }
  0x24   :  { %608 = vmatpush3.bf16.msra.mxu1 %v607_v14  ;;  %578 = vmatprep.subr.bf16.mxu0 %v577_v17 }
  0x25   :  { %610 = vmatprep.subr.bf16.mxu1 %v609_v18 }
  0x27   :  { %580 = vmatpush3.bf16.msra.mxu0 %v579_v25 }
  0x28   :  { %612 = vmatpush3.bf16.msra.mxu1 %v611_v26  ;;  %582 = vmatprep.subr.bf16.mxu0 %v581_v28 }
  0x29   :  { %614 = vmatprep.subr.bf16.mxu1 %v613_v29 }
  0x2b   :  { %584 = vmatpush3.bf16.msra.mxu0 %v583_v33 }
  0x2c   :  { %616 = vmatpush3.bf16.msra.mxu1 %v615_v34  ;;  %586 = vmatprep.subr.bf16.mxu0 %v585_v38 }
  0x2d   :  { %618 = vmatprep.subr.bf16.mxu1 %v617_v42 }
  0x2f   :  { %588 = vmatpush3.bf16.msra.mxu0 %v587_v43 }
  0x30   :  { %620 = vmatpush3.bf16.msra.mxu1 %v619_v46  ;;  %590 = vmatprep.subr.bf16.mxu0 %v589_v49 }
  0x31   :  { %622 = vmatprep.subr.bf16.mxu1 %v621_v54 }
  0x33   :  { %592 = vmatpush3.bf16.msra.mxu0 %v591_v55 }
  0x34   :  { %624 = vmatpush3.bf16.msra.mxu1 %v623_v58 }
  0x88   :  { %v46_v59 = vpop.permute.xlu0 %45 }
  0xe9   :  { %v189_v60 = vpop.f32.mrb[0].mxu0 }
  0xea   :  { %v230_v62 = vpop.f32.mrb[0].mxu1  ;;  %v190_v0 = vadd.f32 %v189_v60, %v46_v59  ;;  %v191_v2 = vpop.f32.mrb[1].mxu0 }
  0xeb   :  { %v231_v1 = vadd.f32 %v230_v62, %v46_v59  ;;  %v232_v4 = vpop.f32.mrb[1].mxu1  ;;  %v192_v6 = vadd.f32 %v191_v2, %v46_v59  ;;  %v193_v8 = vpop.f32.mrb[2].mxu0 }
  0xec   :  { %v233_v7 = vadd.f32 %v232_v4, %v46_v59  ;;  %v234_v9 = vpop.f32.mrb[2].mxu1  ;;  %v241_v10 = vadd.f32 %v237_v61, %v190_v0  ;;  %v194_v12 = vpop.f32.mrb[3].mxu0 }
  0xed   :  { %v243_v11 = vadd.f32 %v239_v63, %v231_v1  ;;  %v235_v13 = vpop.f32.mrb[3].mxu1  ;;  %v242_v14 = vadd.f32 %v238_v3, %v192_v6 }
  0xee   :  { %v244_v15 = vadd.f32 %v240_v5, %v233_v7  ;;  %v245_v16 = vmax.f32 %v241_v10, 0.0 }
  0xef   :  { %v247_v17 = vmax.f32 %v243_v11, 0.0  ;;  %v246_v18 = vmax.f32 %v242_v14, 0.0 }
  0xf0   :  { %v248_v19 = vmax.f32 %v244_v15, 0.0  ;;  %249 = vst [vmem:[%s977_s5] sm:$0xff] %v245_v16 }
  0xf1   :  { %251 = vst [vmem:[%s977_s5 + $0x10] sm:$0xff] %v247_v17  ;;  %250 = vst [vmem:[%s977_s5 + $0x8] sm:$0xff] %v246_v18  ;;  %381 = vmatprep.mubr.f32.mxu0 %v246_v18 }
  0xf2   :  { %252 = vst [vmem:[%s977_s5 + $0x18] sm:$0xff] %v248_v19  ;;  %451 = vmatprep.mubr.f32.mxu1 %v248_v19  ;;  %382 = vmatmul.mubr.f32.vlgmr.msra.gmra.mrb[4].mxu0 %v245_v16 }
  0xf3   :  { %452 = vmatmul.mubr.f32.vlgmr.msra.gmra.mrb[4].mxu1 %v247_v17 }
 0x1c5   :  { %v523_v20 = vpop.f32.mrb[4].mxu0 }
 0x1c6   :  { %v558_v21 = vpop.f32.mrb[4].mxu1  ;;  %v524_v22 = vpop.f32.mrb[5].mxu0 }
 0x1c7   :  { %v559_v23 = vpop.f32.mrb[5].mxu1  ;;  %v525_v24 = vadd.f32 %v524_v22, %v523_v20 }
 0x1c8   :  { %v560_v25 = vadd.f32 %v559_v23, %v558_v21 }
 0x1ca   :  { %v454_v26 = vadd.f32 %v560_v25, %v525_v24 }
 0x1cc   :  { %458 = vst.msk [vmem:[%s978_s6] sm:$0xff] %vm457_vm2, %v454_v26 }

// kernel: my_resnet_forward.14
= control target key start
LH: loop header
LB: loop body
LE: loop exit
PB: predicated region body
PF: predicated region fallthrough
CT: control target
= control target key end

     0   :  { %v164_v0 = vmov 0.0   ;;  %vm165_vm0 = vmmov 0   ;;  %v166_v2 = vmov 0   ;;  %vm74_vm1 = vcmask 1043456   ;;  %s217_s1 = inlined_call_operand.vmem [shape: bf16[72,128], index: 1, kind: input, shape index: {}]   ;;  %s218_s2 = inlined_call_operand.vmem [shape: f32[16,1], index: 2, kind: input, shape index: {}]   ;;  %s219_s0 = inlined_call_operand.vmem [shape: bf16[16,72], index: 0, kind: input, shape index: {}]   ;;  %s220_s3 = inlined_call_operand.vmem [shape: f32[16,128], index: 3, kind: output, shape index: {}]  }
   0x1   :  { %140 = vmatprep.subr.bf16.mxu0 %v164_v0  ;;  %v158_v1 = vld [vmem:[%s217_s1] sm:$0xff]   ;;  %150 = vmatprep.mubr.msk.bf16.mxu0 %vm165_vm0, %v164_v0  ;;  %v159_v3 = vld [vmem:[%s217_s1 + $0x8] sm:$0xff]   ;;  %v160_v5 = vld [vmem:[%s217_s1 + $0x10] sm:$0xff]   ;;  %vm70_vm2 = vcmask 588800  }
   0x2   :  { %157 = vset.pattern.permute.xlu0 %v166_v2  ;;  %141 = vmatpush3.bf16.msra.mxu0 %v158_v1  ;;  %v26_v4 = vld [vmem:[%s218_s2] sm:$0xff]  ;;  %v27_v6 = vld [vmem:[%s218_s2 + $0x8] sm:$0xff]  ;;  %v161_v7 = vld [vmem:[%s217_s1 + $0x18] sm:$0xff]  }
   0x3   :  { %142 = vmatprep.subr.bf16.mxu0 %v164_v0  ;;  %30 = vperm.xlu0 %157, %v26_v4   ;;  %v162_v8 = vld [vmem:[%s217_s1 + $0x20] ss:$0 sps:$4 sm:$0xff]  }
   0x4   :  { %v76_v9 = vsel %vm74_vm1, %v162_v8, 0  ;;  %v163_v10 = vld [vmem:[%s219_s0] sm:$0xff]  }
   0x6   :  { %143 = vmatpush3.bf16.msra.mxu0 %v159_v3 }
   0x7   :  { %144 = vmatprep.subr.bf16.mxu0 %v164_v0  ;;  %35 = vperm.xlu0 %157, %v27_v6  }
   0xa   :  { %145 = vmatpush3.bf16.msra.mxu0 %v160_v5 }
   0xb   :  { %146 = vmatprep.subr.bf16.mxu0 %v164_v0 }
   0xe   :  { %147 = vmatpush3.bf16.msra.mxu0 %v161_v7 }
   0xf   :  { %148 = vmatprep.subr.bf16.mxu0 %v164_v0 }
  0x12   :  { %149 = vmatpush3.bf16.msra.mxu0 %v76_v9 }
  0x15   :  { %151 = vmatmul.mubr.msk.bf16.vlgmr.msra.gmra.mrb[0].mxu0 %vm70_vm2, %v163_v10 }
  0x82   :  { %v31_v11 = vpop.permute.xlu0 %30 }
  0x86   :  { %v36_v15 = vpop.permute.xlu0 %35 }
  0xe8   :  { %v112_v12 = vpop.f32.mrb[0].mxu0 }
  0xe9   :  { %v113_v13 = vadd.f32 %v112_v12, %v31_v11  ;;  %v152_v14 = vpop.f32.mrb[1].mxu0 }
  0xea   :  { %v115_v16 = vpop.f32.mrb[2].mxu0 }
  0xeb   :  { %v119_v17 = vmax.f32 %v113_v13, 0.0  ;;  %v116_v18 = vadd.f32 %v115_v16, %v36_v15  ;;  %v153_v19 = vpop.f32.mrb[3].mxu0 }
  0xed   :  { %121 = vst [vmem:[%s220_s3] sm:$0xff] %v119_v17  ;;  %v120_v20 = vmax.f32 %v116_v18, 0.0 }
  0xef   :  { %122 = vst [vmem:[%s220_s3 + $0x8] sm:$0xff] %v120_v20 }

// kernel: my_resnet_forward.15
= control target key start
LH: loop header
LB: loop body
LE: loop exit
PB: predicated region body
PF: predicated region fallthrough
CT: control target
= control target key end

     0   :  { %v476_v0 = vmov 0   ;;  %v477_v2 = vmov 0.0   ;;  %vm478_vm0 = vmmov 0   ;;  %vm53_vm1 = vcmask 1043456   ;;  %s649_s0 = inlined_call_operand.vmem [shape: bf16[144,128], index: 0, kind: input, shape index: {}]   ;;  %s650_s3 = inlined_call_operand.vmem [shape: bf16[8,128], index: 3, kind: input, shape index: {}]   ;;  %s651_s4 = inlined_call_operand.vmem [shape: bf16[16,8], index: 4, kind: input, shape index: {}]   ;;  %s652_s1 = inlined_call_operand.vmem [shape: bf16[16,144], index: 1, kind: input, shape index: {}]   ;;  %s653_s5 = inlined_call_operand.vmem [shape: f32[16,1], index: 5, kind: input, shape index: {}]   ;;  %s654_s2 = inlined_call_operand.vmem [shape: f32[16,1], index: 2, kind: input, shape index: {}]   ;;  %s655_s6 = inlined_call_operand.vmem [shape: f32[128,8], index: 6, kind: input, shape index: {}]   ;;  %s656_s7 = inlined_call_operand.vmem [shape: f32[16,128], index: 7, kind: output, shape index: {0}]   ;;  %s657_s8 = inlined_call_operand.vmem [shape: f32[16,8], index: 8, kind: output, shape index: {1}]  }
   0x1   :  { %197 = vmatprep.subr.bf16.mxu0 %v476_v0  ;;  %v463_v1 = vld [vmem:[%s649_s0] sm:$0xff]   ;;  %379 = vmatprep.subr.bf16.mxu1 %v477_v2  ;;  %v464_v3 = vld [vmem:[%s649_s0 + $0x8] sm:$0xff]   ;;  %v465_v4 = vld [vmem:[%s649_s0 + $0x10] sm:$0xff]   ;;  %vm49_vm2 = vcmask 64512   ;;  %vm193_vm3 = vcmask 130048  }
   0x2   :  { %381 = vmatprep.mubr.msk.bf16.mxu1 %vm478_vm0, %v477_v2  ;;  %461 = vset.pattern.permute.xlu0 %v476_v0  ;;  %v31_v5 = vld [vmem:[%s650_s3] sm:$0xf]  ;;  %v466_v8 = vld [vmem:[%s649_s0 + $0x18] sm:$0xff]   ;;  %v475_v9 = vld [vmem:[%s652_s1 + $0x4] ss:$8 sps:$4 sm:$0xff]  }
   0x3   :  { %198 = vmatpush1.bf16.msra.mxu0 %v463_v1  ;;  %462 = vset.pattern.permute.xlu1 %v476_v0  ;;  %v55_v6 = vsel %vm53_vm1, %v31_v5, 0  ;;  %v470_v7 = vld [vmem:[%s651_s4] sm:$0xff]   ;;  %v33_v12 = vld [vmem:[%s653_s5 + $0x8] sm:$0xff]  ;;  %v246_v15 = vld [vmem:[%s655_s6 + $0x10] sm:$0xff] }
   0x4   :  { %199 = vmatprep.subr.bf16.mxu0 %v476_v0  ;;  %380 = vmatpush3.bf16.msra.mxu1 %v55_v6  ;;  %v32_v10 = vld [vmem:[%s653_s5] sm:$0xff]  ;;  %v245_v14 = vld [vmem:[%s655_s6 + $0x8] sm:$0xff]  ;;  %v247_v19 = vld [vmem:[%s655_s6 + $0x18] sm:$0xff] }
   0x5   :  { %36 = vperm.xlu0 %461, %v32_v10   ;;  %v118_v11 = vld [vmem:[%s654_s2] sm:$0xff]  ;;  %358 = vmatprep.mubr.msk.bf16.mxu0 %vm193_vm3, %v475_v9  ;;  %v119_v17 = vld [vmem:[%s654_s2 + $0x8] sm:$0xff]  ;;  %v424_v20 = vpack.c.bf16 %v247_v19, %v246_v15  ;;  %v250_v25 = vld [vmem:[%s655_s6 + $0x30] sm:$0xff] }
   0x6   :  { %122 = vperm.xlu1 %462, %v118_v11   ;;  %v244_v13 = vld [vmem:[%s655_s6] sm:$0xff]  ;;  %v249_v22 = vld [vmem:[%s655_s6 + $0x28] sm:$0xff]  ;;  %v251_v26 = vld [vmem:[%s655_s6 + $0x38] sm:$0xff] }
   0x7   :  { %200 = vmatpush1.bf16.msra.mxu0 %v464_v3  ;;  %382 = vmatmul.mubr.msk.bf16.vlgmr.msra.gmra.mrb[0].mxu1 %vm49_vm2, %v470_v7  ;;  %v467_v16 = vld [vmem:[%s649_s0 + $0x20] sm:$0xff]   ;;  %v420_v18 = vpack.c.bf16 %v245_v14, %v244_v13  ;;  %v468_v23 = vld [vmem:[%s649_s0 + $0x28] sm:$0xff]   ;;  %v469_v27 = vld [vmem:[%s649_s0 + $0x30] sm:$0xff]   ;;  %v432_v28 = vpack.c.bf16 %v251_v26, %v250_v25 }
   0x8   :  { %201 = vmatprep.subr.bf16.mxu0 %v476_v0  ;;  %v248_v21 = vld [vmem:[%s655_s6 + $0x20] sm:$0xff]  ;;  %v253_v30 = vld [vmem:[%s655_s6 + $0x48] sm:$0xff]  ;;  %v471_v31 = vld [vmem:[%s649_s0 + $0x38] sm:$0xff]  }
   0x9   :  { %41 = vperm.xlu0 %461, %v33_v12   ;;  %421 = vmatprep.subr.bf16.mxu1 %v420_v18  ;;  %v428_v24 = vpack.c.bf16 %v249_v22, %v248_v21  ;;  %v252_v29 = vld [vmem:[%s655_s6 + $0x40] sm:$0xff]  ;;  %v254_v35 = vld [vmem:[%s655_s6 + $0x50] sm:$0xff]  ;;  %v255_v36 = vld [vmem:[%s655_s6 + $0x58] sm:$0xff] }
   0xa   :  { %127 = vperm.xlu1 %462, %v119_v17   ;;  %423 = vmatpush3.bf16.msra.mxu1 %v420_v18  ;;  %v436_v32 = vpack.c.bf16 %v253_v30, %v252_v29  ;;  %v472_v33 = vld [vmem:[%s649_s0 + $0x40] sm:$0xff]   ;;  %v440_v37 = vpack.c.bf16 %v255_v36, %v254_v35  ;;  %v257_v39 = vld [vmem:[%s655_s6 + $0x68] sm:$0xff]  ;;  %v258_v41 = vld [vmem:[%s655_s6 + $0x70] sm:$0xff] }
   0xb   :  { %202 = vmatpush1.bf16.msra.mxu0 %v465_v4  ;;  %425 = vmatprep.subr.bf16.mxu1 %v424_v20  ;;  %v473_v34 = vld [vmem:[%s652_s1] ss:$8 sps:$4 sm:$0xff]   ;;  %v259_v42 = vld [vmem:[%s655_s6 + $0x78] sm:$0xff] }
   0xc   :  { %203 = vmatprep.subr.bf16.mxu0 %v476_v0  ;;  %v256_v38 = vld [vmem:[%s655_s6 + $0x60] sm:$0xff]  ;;  %v448_v43 = vpack.c.bf16 %v259_v42, %v258_v41 }
   0xd   :  { %v444_v40 = vpack.c.bf16 %v257_v39, %v256_v38 }
   0xe   :  { %427 = vmatpush3.bf16.msra.mxu1 %v424_v20 }
   0xf   :  { %204 = vmatpush1.bf16.msra.mxu0 %v466_v8  ;;  %429 = vmatprep.subr.bf16.mxu1 %v428_v24 }
  0x10   :  { %205 = vmatprep.subr.bf16.mxu0 %v476_v0 }
  0x12   :  { %431 = vmatpush3.bf16.msra.mxu1 %v428_v24 }
  0x13   :  { %206 = vmatpush1.bf16.msra.mxu0 %v467_v16  ;;  %433 = vmatprep.subr.bf16.mxu1 %v432_v28 }
  0x14   :  { %207 = vmatprep.subr.bf16.mxu0 %v476_v0 }
  0x16   :  { %435 = vmatpush3.bf16.msra.mxu1 %v432_v28 }
  0x17   :  { %208 = vmatpush1.bf16.msra.mxu0 %v468_v23  ;;  %437 = vmatprep.subr.bf16.mxu1 %v436_v32 }
  0x18   :  { %209 = vmatprep.subr.bf16.mxu0 %v476_v0 }
  0x1a   :  { %439 = vmatpush3.bf16.msra.mxu1 %v436_v32 }
  0x1b   :  { %210 = vmatpush1.bf16.msra.mxu0 %v469_v27  ;;  %441 = vmatprep.subr.bf16.mxu1 %v440_v37 }
  0x1c   :  { %211 = vmatprep.subr.bf16.mxu0 %v476_v0 }
  0x1e   :  { %443 = vmatpush3.bf16.msra.mxu1 %v440_v37 }
  0x1f   :  { %212 = vmatpush1.bf16.msra.mxu0 %v471_v31  ;;  %445 = vmatprep.subr.bf16.mxu1 %v444_v40 }
  0x20   :  { %213 = vmatprep.subr.bf16.mxu0 %v476_v0 }
  0x22   :  { %447 = vmatpush3.bf16.msra.mxu1 %v444_v40 }
  0x23   :  { %214 = vmatpush1.bf16.msra.mxu0 %v472_v33  ;;  %449 = vmatprep.subr.bf16.mxu1 %v448_v43 }
  0x26   :  { %230 = vmatmul.mubr.bf16.vlgmr.msra.gmra.mrb[0].mxu0 %v473_v34  ;;  %451 = vmatpush3.bf16.msra.mxu1 %v448_v43 }
  0x84   :  { %v37_v48 = vpop.permute.xlu0 %36 }
  0x85   :  { %v123_v49 = vpop.permute.xlu1 %122 }
  0x88   :  { %v42_v50 = vpop.permute.xlu0 %41 }
  0x89   :  { %v128_v53 = vpop.permute.xlu1 %127 }
  0xda   :  { %v91_v44 = vpop.f32.mrb[0].mxu1 }
  0xdb   :  { %v383_v45 = vpop.f32.mrb[1].mxu1  ;;  %v92_v51 = vadd.f32 %v91_v44, %v37_v48 }
  0xdc   :  { %v94_v46 = vpop.f32.mrb[2].mxu1 }
  0xdd   :  { %v384_v47 = vpop.f32.mrb[3].mxu1  ;;  %v95_v52 = vadd.f32 %v94_v46, %v42_v50  ;;  %v453_v54 = vadd.f32 %v123_v49, %v92_v51 }
  0xdf   :  { %v456_v56 = vadd.f32 %v128_v53, %v95_v52 }
  0xf9   :  { %v231_v55 = vpop.f32.mrb[0].mxu0 }
  0xfa   :  { %v454_v57 = vadd.f32 %v453_v54, %v231_v55  ;;  %v233_v58 = vpop.f32.mrb[1].mxu0 }
  0xfb   :  { %v234_v59 = vpop.f32.mrb[2].mxu0 }
  0xfc   :  { %v240_v60 = vmax.f32 %v454_v57, 0.0  ;;  %v457_v61 = vadd.f32 %v456_v56, %v234_v59  ;;  %v236_v62 = vpop.f32.mrb[3].mxu0 }
  0xfe   :  { %242 = vst [vmem:[%s656_s7] sm:$0xff] %v240_v60  ;;  %v241_v63 = vmax.f32 %v457_v61, 0.0  ;;  %417 = vmatprep.mubr.f32.mxu1 %v240_v60 }
 0x100   :  { %243 = vst [vmem:[%s656_s7 + $0x8] sm:$0xff] %v241_v63  ;;  %418 = vmatmul.mubr.f32.vlgmr.msra.gmra.mrb[4].mxu1 %v241_v63 }
 0x1d3   :  { %v419_v0 = vpop.f32.mrb[4].mxu1 }
 0x1d4   :  { %336 = vst.msk [vmem:[%s657_s8 + $0x8] sm:$0xff] %vm49_vm2, %v419_v0  ;;  %v326_v1 = vpop.f32.mrb[5].mxu1 }
 0x1d5   :  { %335 = vst.msk [vmem:[%s657_s8] sm:$0xff] %vm49_vm2, %v326_v1 }

// kernel: my_resnet_forward.16
= control target key start
LH: loop header
LB: loop body
LE: loop exit
PB: predicated region body
PF: predicated region fallthrough
CT: control target
= control target key end

     0   :  { %v253_v0 = vmov 0   ;;  %vm133_vm0 = vcmask 130048   ;;  %vm193_vm1 = vcmask 261120   ;;  %s337_s1 = inlined_call_operand.vmem [shape: bf16[144,32], index: 1, kind: input, shape index: {}]   ;;  %s338_s0 = inlined_call_operand.vmem [shape: bf16[32,144], index: 0, kind: input, shape index: {}]   ;;  %s339_s2 = inlined_call_operand.vmem [shape: f32[32,1], index: 2, kind: input, shape index: {}]   ;;  %s340_s3 = inlined_call_operand.vmem [shape: f32[32,32], index: 3, kind: output, shape index: {}]  }
   0x1   :  { %140 = vmatprep.subr.bf16.mxu0 %v253_v0  ;;  %217 = vmatprep.subr.bf16.mxu1 %v253_v0  ;;  %v238_v1 = vld [vmem:[%s337_s1] sm:$0xff]   ;;  %v239_v2 = vld [vmem:[%s337_s1 + $0x8] sm:$0xff]   ;;  %v240_v3 = vld [vmem:[%s337_s1 + $0x10] sm:$0xff]  }
   0x2   :  { %237 = vset.pattern.permute.xlu1 %v253_v0  ;;  %236 = vset.pattern.permute.xlu0 %v253_v0  ;;  %v241_v4 = vld [vmem:[%s337_s1 + $0x18] sm:$0xff]   ;;  %v249_v5 = vld [vmem:[%s338_s0 + $0x4] ss:$8 sps:$4 sm:$0xff]   ;;  %v39_v7 = vld [vmem:[%s339_s2 + $0x10] sm:$0xff] }
   0x3   :  { %141 = vmatpush1.bf16.msra.mxu0 %v238_v1  ;;  %226 = vmatpush1.bf16.msra.mxu1 %v238_v1  ;;  %v252_v6 = vld [vmem:[%s338_s0 + $0x14] ss:$8 sps:$4 sm:$0xff]   ;;  %v37_v8 = vld [vmem:[%s339_s2] sm:$0xff]  ;;  %v38_v11 = vld [vmem:[%s339_s2 + $0x8] sm:$0xff] }
   0x4   :  { %142 = vmatprep.subr.bf16.mxu0 %v253_v0  ;;  %218 = vmatprep.subr.bf16.mxu1 %v253_v0  ;;  %v40_v9 = vld [vmem:[%s339_s2 + $0x18] sm:$0xff]  ;;  %v242_v10 = vld [vmem:[%s337_s1 + $0x20] sm:$0xff]   ;;  %v243_v12 = vld [vmem:[%s337_s1 + $0x28] sm:$0xff]  }
   0x5   :  { %215 = vmatprep.mubr.msk.bf16.mxu0 %vm133_vm0, %v249_v5  ;;  %53 = vperm.xlu1 %237, %v39_v7   ;;  %v244_v13 = vld [vmem:[%s337_s1 + $0x30] sm:$0xff]   ;;  %v245_v14 = vld [vmem:[%s337_s1 + $0x38] sm:$0xff]   ;;  %v246_v15 = vld [vmem:[%s337_s1 + $0x40] sm:$0xff]  }
   0x6   :  { %216 = vmatprep.mubr.msk.bf16.mxu1 %vm133_vm0, %v252_v6  ;;  %43 = vperm.xlu0 %236, %v37_v8   ;;  %v247_v16 = vld [vmem:[%s338_s0] ss:$8 sps:$4 sm:$0xff]   ;;  %v250_v17 = vld [vmem:[%s338_s0 + $0x10] ss:$8 sps:$4 sm:$0xff]  }
   0x7   :  { %143 = vmatpush1.bf16.msra.mxu0 %v239_v2  ;;  %227 = vmatpush1.bf16.msra.mxu1 %v239_v2 }
   0x8   :  { %144 = vmatprep.subr.bf16.mxu0 %v253_v0  ;;  %219 = vmatprep.subr.bf16.mxu1 %v253_v0 }
   0x9   :  { %58 = vperm.xlu1 %237, %v40_v9  }
   0xa   :  { %48 = vperm.xlu0 %236, %v38_v11  }
   0xb   :  { %145 = vmatpush1.bf16.msra.mxu0 %v240_v3  ;;  %228 = vmatpush1.bf16.msra.mxu1 %v240_v3 }
   0xc   :  { %146 = vmatprep.subr.bf16.mxu0 %v253_v0  ;;  %220 = vmatprep.subr.bf16.mxu1 %v253_v0 }
   0xf   :  { %147 = vmatpush1.bf16.msra.mxu0 %v241_v4  ;;  %229 = vmatpush1.bf16.msra.mxu1 %v241_v4 }
  0x10   :  { %148 = vmatprep.subr.bf16.mxu0 %v253_v0  ;;  %221 = vmatprep.subr.bf16.mxu1 %v253_v0 }
  0x13   :  { %149 = vmatpush1.bf16.msra.mxu0 %v242_v10  ;;  %230 = vmatpush1.bf16.msra.mxu1 %v242_v10 }
  0x14   :  { %150 = vmatprep.subr.bf16.mxu0 %v253_v0  ;;  %222 = vmatprep.subr.bf16.mxu1 %v253_v0 }
  0x17   :  { %151 = vmatpush1.bf16.msra.mxu0 %v243_v12  ;;  %231 = vmatpush1.bf16.msra.mxu1 %v243_v12 }
  0x18   :  { %152 = vmatprep.subr.bf16.mxu0 %v253_v0  ;;  %223 = vmatprep.subr.bf16.mxu1 %v253_v0 }
  0x1b   :  { %153 = vmatpush1.bf16.msra.mxu0 %v244_v13  ;;  %232 = vmatpush1.bf16.msra.mxu1 %v244_v13 }
  0x1c   :  { %154 = vmatprep.subr.bf16.mxu0 %v253_v0  ;;  %224 = vmatprep.subr.bf16.mxu1 %v253_v0 }
  0x1f   :  { %155 = vmatpush1.bf16.msra.mxu0 %v245_v14  ;;  %233 = vmatpush1.bf16.msra.mxu1 %v245_v14 }
  0x20   :  { %156 = vmatprep.subr.bf16.mxu0 %v253_v0  ;;  %225 = vmatprep.subr.bf16.mxu1 %v253_v0 }
  0x23   :  { %157 = vmatpush1.bf16.msra.mxu0 %v246_v15  ;;  %234 = vmatpush1.bf16.msra.mxu1 %v246_v15 }
  0x26   :  { %173 = vmatmul.mubr.bf16.vlgmr.msra.gmra.mrb[0].mxu0 %v247_v16  ;;  %181 = vmatmul.mubr.bf16.vlgmr.msra.gmra.mrb[0].mxu1 %v250_v17 }
  0x84   :  { %v54_v18 = vpop.permute.xlu1 %53 }
  0x85   :  { %v44_v19 = vpop.permute.xlu0 %43 }
  0x88   :  { %v59_v20 = vpop.permute.xlu1 %58 }
  0x89   :  { %v49_v21 = vpop.permute.xlu0 %48 }
  0xf9   :  { %v174_v22 = vpop.f32.mrb[0].mxu0  ;;  %v182_v23 = vpop.f32.mrb[0].mxu1 }
  0xfa   :  { %v175_v24 = vadd.f32 %v174_v22, %v44_v19  ;;  %v183_v25 = vadd.f32 %v182_v23, %v54_v18  ;;  %v176_v26 = vpop.f32.mrb[1].mxu0  ;;  %v184_v27 = vpop.f32.mrb[1].mxu1 }
  0xfb   :  { %v177_v28 = vpop.f32.mrb[2].mxu0  ;;  %v185_v29 = vpop.f32.mrb[2].mxu1 }
  0xfc   :  { %v189_v30 = vmax.f32 %v175_v24, 0.0  ;;  %v191_v31 = vmax.f32 %v183_v25, 0.0  ;;  %v178_v32 = vadd.f32 %v177_v28, %v49_v21  ;;  %v186_v33 = vadd.f32 %v185_v29, %v59_v20  ;;  %v179_v34 = vpop.f32.mrb[3].mxu0  ;;  %v187_v35 = vpop.f32.mrb[3].mxu1 }
  0xfe   :  { %194 = vst.msk [vmem:[%s340_s3] sm:$0xff] %vm193_vm1, %v189_v30  ;;  %196 = vst.msk [vmem:[%s340_s3 + $0x10] sm:$0xff] %vm193_vm1, %v191_v31  ;;  %v190_v36 = vmax.f32 %v178_v32, 0.0  ;;  %v192_v37 = vmax.f32 %v186_v33, 0.0 }
 0x100   :  { %195 = vst.msk [vmem:[%s340_s3 + $0x8] sm:$0xff] %vm193_vm1, %v190_v36  ;;  %197 = vst.msk [vmem:[%s340_s3 + $0x18] sm:$0xff] %vm193_vm1, %v192_v37 }

// kernel: my_resnet_forward.17
= control target key start
LH: loop header
LB: loop body
LE: loop exit
PB: predicated region body
PF: predicated region fallthrough
CT: control target
= control target key end

     0   :  { %v726_v1 = vmov 0   ;;  %vm75_vm0 = vcmask 130048   ;;  %vm337_vm1 = vcmask 261120   ;;  %vm555_vm2 = vcmask 64512   ;;  %s923_s0 = inlined_call_operand.vmem [shape: bf16[288,32], index: 0, kind: input, shape index: {}]   ;;  %s924_s3 = inlined_call_operand.vmem [shape: bf16[16,32], index: 3, kind: input, shape index: {}]   ;;  %s925_s4 = inlined_call_operand.vmem [shape: bf16[32,16], index: 4, kind: input, shape index: {}]   ;;  %s926_s1 = inlined_call_operand.vmem [shape: bf16[32,288], index: 1, kind: input, shape index: {}]   ;;  %s927_s2 = inlined_call_operand.vmem [shape: f32[32,1], index: 2, kind: input, shape index: {}]   ;;  %s928_s5 = inlined_call_operand.vmem [shape: f32[32,1], index: 5, kind: input, shape index: {}]   ;;  %s929_s6 = inlined_call_operand.vmem [shape: f32[32,8], index: 6, kind: input, shape index: {}]   ;;  %s930_s7 = inlined_call_operand.vmem [shape: f32[32,32], index: 7, kind: output, shape index: {0}]   ;;  %s931_s8 = inlined_call_operand.vmem [shape: f32[32,8], index: 8, kind: output, shape index: {1}]  }
   0x1   :  { %v697_v0 = vld [vmem:[%s923_s0 + $0x40] sm:$0xff]   ;;  %695 = vset.pattern.permute.xlu0 %v726_v1  ;;  %696 = vset.pattern.permute.xlu1 %v726_v1  ;;  %v699_v3 = vld [vmem:[%s923_s0 + $0x48] sm:$0xff]   ;;  %v701_v5 = vld [vmem:[%s923_s0 + $0x50] sm:$0xff]  }
   0x2   :  { %v698_v2 = vld [vmem:[%s923_s0] sm:$0xff]   ;;  %606 = vmatprep.subr.bf16.mxu1 %v697_v0  ;;  %v700_v4 = vld [vmem:[%s923_s0 + $0x8] sm:$0xff]   ;;  %v702_v7 = vld [vmem:[%s923_s0 + $0x10] sm:$0xff]  }
   0x3   :  { %607 = vmatpush3.bf16.msra.mxu1 %v698_v2  ;;  %v703_v6 = vld [vmem:[%s924_s3] sm:$0xff]   ;;  %v704_v8 = vld [vmem:[%s923_s0 + $0x58] sm:$0xff]   ;;  %v707_v10 = vld [vmem:[%s925_s4 + $0x8] sm:$0xff]  }
   0x4   :  { %608 = vmatprep.subr.bf16.mxu1 %v699_v3  ;;  %646 = vmatprep.subr.bf16.mxu0 %v703_v6  ;;  %v706_v9 = vld [vmem:[%s925_s4] sm:$0xff]   ;;  %v705_v11 = vld [vmem:[%s923_s0 + $0x18] sm:$0xff]   ;;  %v711_v15 = vld [vmem:[%s923_s0 + $0x68] sm:$0xff]  }
   0x5   :  { %647 = vmatpush3.bf16.msra.mxu0 %v703_v6  ;;  %648 = vmatprep.mubr.msk.bf16.mxu0 %vm75_vm0, %v706_v9  ;;  %v708_v12 = vld [vmem:[%s923_s0 + $0x60] sm:$0xff]   ;;  %v713_v16 = vld [vmem:[%s923_s0 + $0x88] sm:$0xff]   ;;  %v714_v18 = vld [vmem:[%s923_s0 + $0x70] sm:$0xff]  }
   0x6   :  { %v710_v13 = vld [vmem:[%s923_s0 + $0x80] sm:$0xff]   ;;  %v712_v17 = vld [vmem:[%s923_s0 + $0x28] sm:$0xff]   ;;  %v715_v21 = vld [vmem:[%s923_s0 + $0x30] sm:$0xff]  }
   0x7   :  { %609 = vmatpush3.bf16.msra.mxu1 %v700_v4  ;;  %v709_v14 = vld [vmem:[%s923_s0 + $0x20] sm:$0xff]   ;;  %652 = vmatprep.subr.bf16.mxu0 %v710_v13  ;;  %v716_v19 = vld [vmem:[%s926_s1 + $0x8] ss:$12 sps:$4 sm:$0xff]   ;;  %v718_v22 = vld [vmem:[%s923_s0 + $0x78] sm:$0xff]  }
   0x8   :  { %610 = vmatprep.subr.bf16.mxu1 %v701_v5  ;;  %649 = vmatmul.mubr.msk.bf16.vlgmr.msra.gmra.mrb[0].mxu0 %vm75_vm0, %v707_v10  ;;  %v717_v20 = vld [vmem:[%s926_s1 + $0x20] ss:$12 sps:$4 sm:$0xff]   ;;  %v722_v23 = vld [vmem:[%s926_s1 + $0x4] ss:$12 sps:$4 sm:$0xff]   ;;  %v719_v26 = vld [vmem:[%s923_s0 + $0x38] sm:$0xff]  }
   0x9   :  { %653 = vmatpush3.bf16.msra.mxu0 %v710_v13  ;;  %656 = vmatprep.mubr.msk.bf16.mxu0 %vm337_vm1, %v716_v19  ;;  %v175_v24 = vld [vmem:[%s927_s2] sm:$0xff]  ;;  %v176_v27 = vld [vmem:[%s927_s2 + $0x8] sm:$0xff]  ;;  %v177_v31 = vld [vmem:[%s927_s2 + $0x10] sm:$0xff] }
   0xa   :  { %654 = vmatprep.subr.bf16.mxu0 %v713_v16  ;;  %376 = vmatprep.mubr.bf16.mxu1 %v722_v23  ;;  %v35_v25 = vld [vmem:[%s928_s5] sm:$0xff]  ;;  %v36_v28 = vld [vmem:[%s928_s5 + $0x8] sm:$0xff]  ;;  %v178_v32 = vld [vmem:[%s927_s2 + $0x18] sm:$0xff] }
   0xb   :  { %611 = vmatpush3.bf16.msra.mxu1 %v702_v7  ;;  %181 = vperm.xlu0 %695, %v175_v24   ;;  %v720_v29 = vld [vmem:[%s926_s1] ss:$12 sps:$4 sm:$0xff]   ;;  %v723_v30 = vld [vmem:[%s926_s1 + $0x1c] ss:$12 sps:$4 sm:$0xff]   ;;  %v37_v33 = vld [vmem:[%s928_s5 + $0x10] sm:$0xff] }
   0xc   :  { %612 = vmatprep.subr.bf16.mxu1 %v704_v8  ;;  %41 = vperm.xlu1 %696, %v35_v25   ;;  %v38_v34 = vld [vmem:[%s928_s5 + $0x18] sm:$0xff]  ;;  %v454_v36 = vld [vmem:[%s929_s6] sm:$0xff]  ;;  %v455_v37 = vld [vmem:[%s929_s6 + $0x8] sm:$0xff] }
   0xd   :  { %655 = vmatpush3.bf16.msra.mxu0 %v713_v16  ;;  %v725_v35 = vld [vmem:[%s926_s1 + $0x18] ss:$12 sps:$4 sm:$0xff]   ;;  %v674_v38 = vpack.c.bf16 %v455_v37, %v454_v36  ;;  %v456_v39 = vld [vmem:[%s929_s6 + $0x10] sm:$0xff] }
   0xe   :  { %v457_v40 = vld [vmem:[%s929_s6 + $0x18] sm:$0xff] }
   0xf   :  { %613 = vmatpush3.bf16.msra.mxu1 %v705_v11  ;;  %186 = vperm.xlu0 %695, %v176_v27   ;;  %v678_v41 = vpack.c.bf16 %v457_v40, %v456_v39 }
  0x10   :  { %614 = vmatprep.subr.bf16.mxu1 %v708_v12  ;;  %46 = vperm.xlu1 %696, %v36_v28  }
  0x11   :  { %675 = vmatprep.subr.bf16.mxu0 %v674_v38 }
  0x13   :  { %615 = vmatpush3.bf16.msra.mxu1 %v709_v14  ;;  %191 = vperm.xlu0 %695, %v177_v31  }
  0x14   :  { %616 = vmatprep.subr.bf16.mxu1 %v711_v15  ;;  %657 = vmatmul.mubr.msk.bf16.vlgmr.msra.gmra.mrb[0].mxu0 %vm337_vm1, %v717_v20 }
  0x15   :  { %196 = vperm.xlu1 %696, %v178_v32   ;;  %677 = vmatpush3.bf16.msra.mxu0 %v674_v38 }
  0x16   :  { %679 = vmatprep.subr.bf16.mxu0 %v678_v41 }
  0x17   :  { %617 = vmatpush3.bf16.msra.mxu1 %v712_v17  ;;  %51 = vperm.xlu0 %695, %v37_v33  }
  0x18   :  { %618 = vmatprep.subr.bf16.mxu1 %v714_v18 }
  0x19   :  { %56 = vperm.xlu1 %696, %v38_v34   ;;  %681 = vmatpush3.bf16.msra.mxu0 %v678_v41 }
  0x1b   :  { %619 = vmatpush3.bf16.msra.mxu1 %v715_v21 }
  0x1c   :  { %620 = vmatprep.subr.bf16.mxu1 %v718_v22 }
  0x1f   :  { %621 = vmatpush3.bf16.msra.mxu1 %v719_v26 }
  0x22   :  { %377 = vmatmul.mubr.bf16.vlgmr.msra.gmra.mrb[0].mxu1 %v720_v29 }
  0x23   :  { %384 = vmatprep.mubr.bf16.mxu1 %v723_v30 }
  0x2a   :  { %385 = vmatmul.mubr.bf16.gmra.mrb[4].mxu1 %v725_v35 }
  0x8a   :  { %v182_v46 = vpop.permute.xlu0 %181 }
  0x8b   :  { %v42_v47 = vpop.permute.xlu1 %41 }
  0x8e   :  { %v187_v49 = vpop.permute.xlu0 %186 }
  0x8f   :  { %v47_v53 = vpop.permute.xlu1 %46 }
  0x92   :  { %v192_v59 = vpop.permute.xlu0 %191 }
  0x94   :  { %v197_v63 = vpop.permute.xlu1 %196 }
  0x96   :  { %v52_v9 = vpop.permute.xlu0 %51 }
  0x98   :  { %v57_v12 = vpop.permute.xlu1 %56 }
  0xe7   :  { %v658_v42 = vpop.f32.mrb[0].mxu0 }
  0xe8   :  { %v427_v43 = vpop.f32.mrb[1].mxu0 }
  0xe9   :  { %v659_v44 = vpop.f32.mrb[2].mxu0 }
  0xea   :  { %v430_v45 = vpop.f32.mrb[3].mxu0 }
  0xf5   :  { %v622_v48 = vpop.f32.mrb[0].mxu1 }
  0xf6   :  { %v623_v50 = vpop.f32.mrb[1].mxu1 }
  0xf7   :  { %v624_v51 = vadd.f32 %v623_v50, %v622_v48  ;;  %v625_v52 = vpop.f32.mrb[2].mxu1 }
  0xf8   :  { %v626_v54 = vpop.f32.mrb[3].mxu1 }
  0xf9   :  { %v379_v55 = vadd.f32 %v624_v51, %v182_v46  ;;  %v627_v56 = vadd.f32 %v626_v54, %v625_v52 }
  0xfb   :  { %v684_v57 = vadd.f32 %v379_v55, %v42_v47  ;;  %v382_v58 = vadd.f32 %v627_v56, %v187_v49 }
  0xfd   :  { %v685_v60 = vadd.f32 %v684_v57, %v427_v43  ;;  %v688_v61 = vadd.f32 %v382_v58, %v47_v53  ;;  %v628_v62 = vpop.f32.mrb[4].mxu1 }
  0xfe   :  { %v629_v0 = vpop.f32.mrb[5].mxu1 }
  0xff   :  { %v446_v1 = vmax.f32 %v685_v60, 0.0  ;;  %v689_v2 = vadd.f32 %v688_v61, %v430_v45  ;;  %v630_v3 = vadd.f32 %v629_v0, %v628_v62  ;;  %v631_v4 = vpop.f32.mrb[6].mxu1 }
 0x100   :  { %v632_v5 = vpop.f32.mrb[7].mxu1 }
 0x101   :  { %450 = vst.msk [vmem:[%s930_s7] sm:$0xff] %vm337_vm1, %v446_v1  ;;  %v447_v6 = vmax.f32 %v689_v2, 0.0  ;;  %v387_v7 = vadd.f32 %v630_v3, %v192_v59  ;;  %v633_v8 = vadd.f32 %v632_v5, %v631_v4  ;;  %668 = vmatprep.mubr.msk.f32.mxu0 %vm337_vm1, %v446_v1 }
 0x103   :  { %451 = vst.msk [vmem:[%s930_s7 + $0x8] sm:$0xff] %vm337_vm1, %v447_v6  ;;  %v682_v10 = vadd.f32 %v387_v7, %v52_v9  ;;  %v390_v11 = vadd.f32 %v633_v8, %v197_v63  ;;  %669 = vmatmul.mubr.msk.f32.vlgmr.msra.gmra.mrb[4].mxu0 %vm337_vm1, %v447_v6 }
 0x105   :  { %v683_v13 = vadd.f32 %v682_v10, %v658_v42  ;;  %v686_v14 = vadd.f32 %v390_v11, %v57_v12 }
 0x107   :  { %v448_v15 = vmax.f32 %v683_v13, 0.0  ;;  %v687_v16 = vadd.f32 %v686_v14, %v659_v44 }
 0x109   :  { %452 = vst.msk [vmem:[%s930_s7 + $0x10] sm:$0xff] %vm337_vm1, %v448_v15  ;;  %v449_v17 = vmax.f32 %v687_v16, 0.0  ;;  %671 = vmatprep.mubr.msk.f32.mxu0 %vm337_vm1, %v448_v15 }
 0x10b   :  { %453 = vst.msk [vmem:[%s930_s7 + $0x18] sm:$0xff] %vm337_vm1, %v449_v17  ;;  %672 = vmatmul.mubr.msk.f32.gmra.mrb[6].mxu0 %vm337_vm1, %v449_v17 }
 0x1d6   :  { %v670_v18 = vpop.f32.mrb[4].mxu0 }
 0x1d7   :  { %557 = vst.msk [vmem:[%s931_s8 + $0x8] sm:$0xff] %vm555_vm2, %v670_v18  ;;  %v536_v19 = vpop.f32.mrb[5].mxu0 }
 0x1d8   :  { %556 = vst.msk [vmem:[%s931_s8] sm:$0xff] %vm555_vm2, %v536_v19 }
 0x1de   :  { %v673_v20 = vpop.f32.mrb[6].mxu0 }
 0x1df   :  { %559 = vst.msk [vmem:[%s931_s8 + $0x18] sm:$0xff] %vm555_vm2, %v673_v20  ;;  %v546_v21 = vpop.f32.mrb[7].mxu0 }
 0x1e0   :  { %558 = vst.msk [vmem:[%s931_s8 + $0x10] sm:$0xff] %vm555_vm2, %v546_v21 }

// kernel: my_resnet_forward.18
= control target key start
LH: loop header
LB: loop body
LE: loop exit
PB: predicated region body
PF: predicated region fallthrough
CT: control target
= control target key end

     0   :  { %v592_v1 = vmov 0   ;;  %vm283_vm0 = vcmask 261120   ;;  %vm434_vm1 = vcmask 64512   ;;  %s763_s1 = inlined_call_operand.vmem [shape: bf16[288,8], index: 1, kind: input, shape index: {}]   ;;  %s764_s0 = inlined_call_operand.vmem [shape: bf16[64,288], index: 0, kind: input, shape index: {}]   ;;  %s765_s2 = inlined_call_operand.vmem [shape: f32[64,1], index: 2, kind: input, shape index: {}]   ;;  %s766_s3 = inlined_call_operand.vmem [shape: f32[64,8], index: 3, kind: output, shape index: {}]  }
   0x1   :  { %v558_v0 = vld [vmem:[%s763_s1 + $0x40] sm:$0xff]   ;;  %557 = vset.pattern.permute.xlu1 %v592_v1  ;;  %556 = vset.pattern.permute.xlu0 %v592_v1  ;;  %v560_v3 = vld [vmem:[%s763_s1 + $0x48] sm:$0xff]   ;;  %v562_v5 = vld [vmem:[%s763_s1 + $0x50] sm:$0xff]  }
   0x2   :  { %v559_v2 = vld [vmem:[%s763_s1] sm:$0xff]   ;;  %481 = vmatprep.subr.bf16.mxu0 %v558_v0  ;;  %539 = vmatprep.subr.bf16.mxu1 %v558_v0  ;;  %v561_v4 = vld [vmem:[%s763_s1 + $0x8] sm:$0xff]   ;;  %v563_v6 = vld [vmem:[%s763_s1 + $0x10] sm:$0xff]  }
   0x3   :  { %482 = vmatpush3.bf16.msra.mxu0 %v559_v2  ;;  %547 = vmatpush3.bf16.msra.mxu1 %v559_v2  ;;  %v564_v7 = vld [vmem:[%s763_s1 + $0x58] sm:$0xff]   ;;  %v566_v9 = vld [vmem:[%s763_s1 + $0x60] sm:$0xff]   ;;  %v568_v11 = vld [vmem:[%s763_s1 + $0x68] sm:$0xff]  }
   0x4   :  { %483 = vmatprep.subr.bf16.mxu0 %v560_v3  ;;  %540 = vmatprep.subr.bf16.mxu1 %v560_v3  ;;  %v565_v8 = vld [vmem:[%s763_s1 + $0x18] sm:$0xff]   ;;  %v567_v10 = vld [vmem:[%s763_s1 + $0x20] sm:$0xff]   ;;  %v569_v14 = vld [vmem:[%s763_s1 + $0x28] sm:$0xff]  }
   0x5   :  { %v576_v12 = vld [vmem:[%s764_s0 + $0x4] ss:$12 sps:$4 sm:$0xff]   ;;  %v579_v13 = vld [vmem:[%s764_s0 + $0x4c] ss:$12 sps:$4 sm:$0xff]   ;;  %v577_v23 = vld [vmem:[%s764_s0 + $0x48] ss:$12 sps:$4 sm:$0xff]  }
   0x6   :  { %v570_v15 = vld [vmem:[%s763_s1 + $0x70] sm:$0xff]   ;;  %328 = vmatprep.mubr.bf16.mxu0 %v576_v12  ;;  %352 = vmatprep.mubr.bf16.mxu1 %v579_v13  ;;  %v572_v17 = vld [vmem:[%s763_s1 + $0x78] sm:$0xff]   ;;  %v67_v20 = vld [vmem:[%s765_s2] sm:$0xff] }
   0x7   :  { %484 = vmatpush3.bf16.msra.mxu0 %v561_v4  ;;  %548 = vmatpush3.bf16.msra.mxu1 %v561_v4  ;;  %v571_v16 = vld [vmem:[%s763_s1 + $0x30] sm:$0xff]   ;;  %v573_v18 = vld [vmem:[%s763_s1 + $0x38] sm:$0xff]   ;;  %v580_v21 = vld [vmem:[%s763_s1 + $0x80] sm:$0xff]  }
   0x8   :  { %485 = vmatprep.subr.bf16.mxu0 %v562_v5  ;;  %541 = vmatprep.subr.bf16.mxu1 %v562_v5  ;;  %v69_v19 = vld [vmem:[%s765_s2 + $0x10] sm:$0xff]  ;;  %v574_v22 = vld [vmem:[%s764_s0] ss:$12 sps:$4 sm:$0xff]   ;;  %v70_v24 = vld [vmem:[%s765_s2 + $0x18] sm:$0xff] }
   0x9   :  { %87 = vperm.xlu1 %557, %v69_v19   ;;  %77 = vperm.xlu0 %556, %v67_v20   ;;  %v68_v25 = vld [vmem:[%s765_s2 + $0x8] sm:$0xff]  ;;  %v71_v30 = vld [vmem:[%s765_s2 + $0x20] sm:$0xff]  ;;  %v74_v33 = vld [vmem:[%s765_s2 + $0x38] sm:$0xff] }
   0xa   :  { %v582_v26 = vld [vmem:[%s764_s0 + $0x1c] ss:$12 sps:$4 sm:$0xff]   ;;  %v585_v31 = vld [vmem:[%s764_s0 + $0x18] ss:$12 sps:$4 sm:$0xff]   ;;  %v586_v32 = vld [vmem:[%s764_s0 + $0x20] ss:$12 sps:$4 sm:$0xff]  }
   0xb   :  { %486 = vmatpush3.bf16.msra.mxu0 %v563_v6  ;;  %549 = vmatpush3.bf16.msra.mxu1 %v563_v6  ;;  %v581_v27 = vld [vmem:[%s763_s1 + $0x88] sm:$0xff]   ;;  %v73_v34 = vld [vmem:[%s765_s2 + $0x30] sm:$0xff]  ;;  %v589_v36 = vld [vmem:[%s764_s0 + $0x38] ss:$12 sps:$4 sm:$0xff]  }
   0xc   :  { %487 = vmatprep.subr.bf16.mxu0 %v564_v7  ;;  %542 = vmatprep.subr.bf16.mxu1 %v564_v7  ;;  %v584_v28 = vld [vmem:[%s764_s0 + $0x8] ss:$12 sps:$4 sm:$0xff]   ;;  %v590_v37 = vld [vmem:[%s764_s0 + $0x30] ss:$12 sps:$4 sm:$0xff]  }
   0xd   :  { %92 = vperm.xlu1 %557, %v70_v24   ;;  %82 = vperm.xlu0 %556, %v68_v25   ;;  %v72_v29 = vld [vmem:[%s765_s2 + $0x28] sm:$0xff]  ;;  %v587_v35 = vld [vmem:[%s764_s0 + $0x34] ss:$12 sps:$4 sm:$0xff]   ;;  %v591_v38 = vld [vmem:[%s764_s0 + $0x50] ss:$12 sps:$4 sm:$0xff]  }
   0xf   :  { %488 = vmatpush3.bf16.msra.mxu0 %v565_v8  ;;  %550 = vmatpush3.bf16.msra.mxu1 %v565_v8 }
  0x10   :  { %489 = vmatprep.subr.bf16.mxu0 %v566_v9  ;;  %543 = vmatprep.subr.bf16.mxu1 %v566_v9 }
  0x11   :  { %102 = vperm.xlu1 %557, %v72_v29   ;;  %97 = vperm.xlu0 %556, %v71_v30  }
  0x13   :  { %490 = vmatpush3.bf16.msra.mxu0 %v567_v10  ;;  %551 = vmatpush3.bf16.msra.mxu1 %v567_v10 }
  0x14   :  { %491 = vmatprep.subr.bf16.mxu0 %v568_v11  ;;  %544 = vmatprep.subr.bf16.mxu1 %v568_v11 }
  0x15   :  { %112 = vperm.xlu1 %557, %v74_v33   ;;  %107 = vperm.xlu0 %556, %v73_v34  }
  0x17   :  { %492 = vmatpush3.bf16.msra.mxu0 %v569_v14  ;;  %552 = vmatpush3.bf16.msra.mxu1 %v569_v14 }
  0x18   :  { %493 = vmatprep.subr.bf16.mxu0 %v570_v15  ;;  %545 = vmatprep.subr.bf16.mxu1 %v570_v15 }
  0x1b   :  { %494 = vmatpush3.bf16.msra.mxu0 %v571_v16  ;;  %553 = vmatpush3.bf16.msra.mxu1 %v571_v16 }
  0x1c   :  { %495 = vmatprep.subr.bf16.mxu0 %v572_v17  ;;  %546 = vmatprep.subr.bf16.mxu1 %v572_v17 }
  0x1f   :  { %496 = vmatpush3.bf16.msra.mxu0 %v573_v18  ;;  %554 = vmatpush3.bf16.msra.mxu1 %v573_v18 }
  0x20   :  { %527 = vmatprep.subr.bf16.mxu1 %v580_v21 }
  0x22   :  { %329 = vmatmul.mubr.bf16.vlgmr.msra.gmra.mrb[0].mxu0 %v574_v22  ;;  %353 = vmatmul.mubr.bf16.vlgmr.msra.gmra.mrb[0].mxu1 %v577_v23 }
  0x23   :  { %528 = vmatpush3.bf16.msra.mxu1 %v580_v21  ;;  %336 = vmatprep.mubr.bf16.mxu0 %v582_v26 }
  0x24   :  { %529 = vmatprep.subr.bf16.mxu1 %v581_v27  ;;  %531 = vmatprep.mubr.msk.bf16.mxu1 %vm283_vm0, %v584_v28 }
  0x27   :  { %530 = vmatpush3.bf16.msra.mxu1 %v581_v27 }
  0x2a   :  { %337 = vmatmul.mubr.bf16.gmra.mrb[4].mxu0 %v585_v31  ;;  %532 = vmatmul.mubr.msk.bf16.vlgmr.msra.gmra.mrb[4].mxu1 %vm283_vm0, %v586_v32 }
  0x2b   :  { %344 = vmatprep.mubr.bf16.mxu0 %v587_v35  ;;  %535 = vmatprep.mubr.msk.bf16.mxu1 %vm283_vm0, %v589_v36 }
  0x32   :  { %345 = vmatmul.mubr.bf16.gmra.mrb[8].mxu0 %v590_v37  ;;  %536 = vmatmul.mubr.msk.bf16.gmra.mrb[8].mxu1 %vm283_vm0, %v591_v38 }
  0x88   :  { %v88_v39 = vpop.permute.xlu1 %87  ;;  %v78_v40 = vpop.permute.xlu0 %77 }
  0x8c   :  { %v93_v41 = vpop.permute.xlu1 %92  ;;  %v83_v42 = vpop.permute.xlu0 %82 }
  0x90   :  { %v98_v55 = vpop.permute.xlu0 %97  ;;  %v103_v56 = vpop.permute.xlu1 %102 }
  0x94   :  { %v108_v5 = vpop.permute.xlu0 %107  ;;  %v113_v10 = vpop.permute.xlu1 %112 }
  0xf5   :  { %v497_v43 = vpop.f32.mrb[0].mxu0  ;;  %v515_v44 = vpop.f32.mrb[0].mxu1 }
  0xf6   :  { %v498_v45 = vpop.f32.mrb[1].mxu0  ;;  %v516_v46 = vpop.f32.mrb[1].mxu1 }
  0xf7   :  { %v499_v47 = vadd.f32 %v498_v45, %v497_v43  ;;  %v500_v48 = vpop.f32.mrb[2].mxu0  ;;  %v517_v49 = vadd.f32 %v516_v46, %v515_v44  ;;  %v518_v50 = vpop.f32.mrb[2].mxu1 }
  0xf8   :  { %v501_v51 = vpop.f32.mrb[3].mxu0  ;;  %v519_v52 = vpop.f32.mrb[3].mxu1 }
  0xf9   :  { %v502_v53 = vadd.f32 %v501_v51, %v500_v48  ;;  %v520_v54 = vadd.f32 %v519_v52, %v518_v50  ;;  %v331_v59 = vadd.f32 %v499_v47, %v78_v40  ;;  %v355_v14 = vadd.f32 %v517_v49, %v108_v5 }
  0xfb   :  { %v334_v2 = vadd.f32 %v502_v53, %v83_v42  ;;  %v358_v19 = vadd.f32 %v520_v54, %v113_v10 }
  0xfd   :  { %v503_v57 = vpop.f32.mrb[4].mxu0  ;;  %v533_v58 = vpop.f32.mrb[4].mxu1 }
  0xfe   :  { %v504_v60 = vpop.f32.mrb[5].mxu0  ;;  %v395_v61 = vpop.f32.mrb[5].mxu1 }
  0xff   :  { %v505_v62 = vadd.f32 %v504_v60, %v503_v57  ;;  %v396_v63 = vadd.f32 %v395_v61, %v331_v59  ;;  %v506_v0 = vpop.f32.mrb[6].mxu0  ;;  %v534_v1 = vpop.f32.mrb[6].mxu1 }
 0x100   :  { %v507_v3 = vpop.f32.mrb[7].mxu0  ;;  %v398_v4 = vpop.f32.mrb[7].mxu1 }
 0x101   :  { %v339_v6 = vadd.f32 %v505_v62, %v88_v39  ;;  %v426_v7 = vmax.f32 %v396_v63, 0.0  ;;  %v508_v8 = vadd.f32 %v507_v3, %v506_v0  ;;  %v399_v9 = vadd.f32 %v398_v4, %v334_v2 }
 0x103   :  { %v404_v11 = vadd.f32 %v533_v58, %v339_v6  ;;  %435 = vst.msk [vmem:[%s766_s3] sm:$0xff] %vm434_vm1, %v426_v7  ;;  %v342_v12 = vadd.f32 %v508_v8, %v93_v41  ;;  %v427_v13 = vmax.f32 %v399_v9, 0.0 }
 0x105   :  { %v428_v15 = vmax.f32 %v404_v11, 0.0  ;;  %v407_v16 = vadd.f32 %v534_v1, %v342_v12  ;;  %436 = vst.msk [vmem:[%s766_s3 + $0x8] sm:$0xff] %vm434_vm1, %v427_v13  ;;  %v509_v17 = vpop.f32.mrb[8].mxu0  ;;  %v537_v18 = vpop.f32.mrb[8].mxu1 }
 0x106   :  { %v420_v20 = vadd.f32 %v537_v18, %v355_v14  ;;  %v510_v21 = vpop.f32.mrb[9].mxu0  ;;  %v411_v22 = vpop.f32.mrb[9].mxu1 }
 0x107   :  { %437 = vst.msk [vmem:[%s766_s3 + $0x10] sm:$0xff] %vm434_vm1, %v428_v15  ;;  %v429_v23 = vmax.f32 %v407_v16, 0.0  ;;  %v511_v24 = vadd.f32 %v510_v21, %v509_v17  ;;  %v512_v25 = vpop.f32.mrb[10].mxu0  ;;  %v538_v26 = vpop.f32.mrb[10].mxu1 }
 0x108   :  { %v432_v27 = vmax.f32 %v420_v20, 0.0  ;;  %v423_v28 = vadd.f32 %v538_v26, %v358_v19  ;;  %v513_v29 = vpop.f32.mrb[11].mxu0  ;;  %v414_v30 = vpop.f32.mrb[11].mxu1 }
 0x109   :  { %438 = vst.msk [vmem:[%s766_s3 + $0x18] sm:$0xff] %vm434_vm1, %v429_v23  ;;  %v347_v31 = vadd.f32 %v511_v24, %v98_v55  ;;  %v514_v32 = vadd.f32 %v513_v29, %v512_v25 }
 0x10a   :  { %441 = vst.msk [vmem:[%s766_s3 + $0x30] sm:$0xff] %vm434_vm1, %v432_v27  ;;  %v433_v33 = vmax.f32 %v423_v28, 0.0 }
 0x10b   :  { %v412_v34 = vadd.f32 %v411_v22, %v347_v31  ;;  %v350_v35 = vadd.f32 %v514_v32, %v103_v56 }
 0x10c   :  { %442 = vst.msk [vmem:[%s766_s3 + $0x38] sm:$0xff] %vm434_vm1, %v433_v33 }
 0x10d   :  { %v430_v36 = vmax.f32 %v412_v34, 0.0  ;;  %v415_v37 = vadd.f32 %v414_v30, %v350_v35 }
 0x10f   :  { %439 = vst.msk [vmem:[%s766_s3 + $0x20] sm:$0xff] %vm434_vm1, %v430_v36  ;;  %v431_v38 = vmax.f32 %v415_v37, 0.0 }
 0x111   :  { %440 = vst.msk [vmem:[%s766_s3 + $0x28] sm:$0xff] %vm434_vm1, %v431_v38 }

// kernel: reverse
= control target key start
LH: loop header
LB: loop body
LE: loop exit
PB: predicated region body
PF: predicated region fallthrough
CT: control target
= control target key end

     0   :  { %s5265_s0 = inlined_call_operand.vmem [shape: bf16[576,64,3,3], index: 0, kind: input, shape index: {}]   ;;  %s5266_s1 = inlined_call_operand.vmem [shape: bf16[576,64,3,3], index: 1, kind: output, shape index: {}]  }
   0x1   :  { %v3815_v0 = vld [vmem:[%s5265_s0 + $0x500] sm:$0xff]   ;;  %v3824_v9 = vld [vmem:[%s5265_s0 + $0x514] sm:$0xff]   ;;  %v3833_v18 = vld [vmem:[%s5265_s0 + $0x528] sm:$0xff]  }
   0x2   :  { %v3816_v1 = vld [vmem:[%s5265_s0 + $0x320] sm:$0xff]   ;;  %3026 = vst [vmem:[%s5266_s1] sm:$0xff] %v3815_v0  ;;  %v3825_v10 = vld [vmem:[%s5265_s0 + $0x334] sm:$0xff]   ;;  %3062 = vst [vmem:[%s5266_s1 + $0x14] sm:$0xff] %v3824_v9 }
   0x3   :  { %v3817_v2 = vld [vmem:[%s5265_s0 + $0x140] sm:$0xff]   ;;  %3030 = vst [vmem:[%s5266_s1 + $0x1e0] sm:$0xff] %v3816_v1  ;;  %v3826_v11 = vld [vmem:[%s5265_s0 + $0x154] sm:$0xff]   ;;  %3066 = vst [vmem:[%s5266_s1 + $0x1f4] sm:$0xff] %v3825_v10 }
   0x4   :  { %v3818_v3 = vld [vmem:[%s5265_s0 + $0x460] sm:$0xff]   ;;  %3034 = vst [vmem:[%s5266_s1 + $0x3c0] sm:$0xff] %v3817_v2  ;;  %v3827_v12 = vld [vmem:[%s5265_s0 + $0x474] sm:$0xff]   ;;  %3070 = vst [vmem:[%s5266_s1 + $0x3d4] sm:$0xff] %v3826_v11 }
   0x5   :  { %v3819_v4 = vld [vmem:[%s5265_s0 + $0x280] sm:$0xff]   ;;  %3038 = vst [vmem:[%s5266_s1 + $0xa0] sm:$0xff] %v3818_v3  ;;  %v3828_v13 = vld [vmem:[%s5265_s0 + $0x294] sm:$0xff]   ;;  %3074 = vst [vmem:[%s5266_s1 + $0xb4] sm:$0xff] %v3827_v12 }
   0x6   :  { %v3820_v5 = vld [vmem:[%s5265_s0 + $0xa0] sm:$0xff]   ;;  %3042 = vst [vmem:[%s5266_s1 + $0x280] sm:$0xff] %v3819_v4  ;;  %v3829_v14 = vld [vmem:[%s5265_s0 + $0xb4] sm:$0xff]   ;;  %3078 = vst [vmem:[%s5266_s1 + $0x294] sm:$0xff] %v3828_v13 }
   0x7   :  { %v3821_v6 = vld [vmem:[%s5265_s0 + $0x3c0] sm:$0xff]   ;;  %3046 = vst [vmem:[%s5266_s1 + $0x460] sm:$0xff] %v3820_v5  ;;  %v3830_v15 = vld [vmem:[%s5265_s0 + $0x3d4] sm:$0xff]   ;;  %3082 = vst [vmem:[%s5266_s1 + $0x474] sm:$0xff] %v3829_v14 }
   0x8   :  { %v3822_v7 = vld [vmem:[%s5265_s0 + $0x1e0] sm:$0xff]   ;;  %3050 = vst [vmem:[%s5266_s1 + $0x140] sm:$0xff] %v3821_v6  ;;  %v3831_v16 = vld [vmem:[%s5265_s0 + $0x1f4] sm:$0xff]   ;;  %3086 = vst [vmem:[%s5266_s1 + $0x154] sm:$0xff] %v3830_v15 }
   0x9   :  { %v3823_v8 = vld [vmem:[%s5265_s0] sm:$0xff]   ;;  %3054 = vst [vmem:[%s5266_s1 + $0x320] sm:$0xff] %v3822_v7  ;;  %v3832_v17 = vld [vmem:[%s5265_s0 + $0x14] sm:$0xff]   ;;  %3090 = vst [vmem:[%s5266_s1 + $0x334] sm:$0xff] %v3831_v16 }
   0xa   :  { %3058 = vst [vmem:[%s5266_s1 + $0x500] sm:$0xff] %v3823_v8  ;;  %3094 = vst [vmem:[%s5266_s1 + $0x514] sm:$0xff] %v3832_v17  ;;  %v3834_v19 = vld [vmem:[%s5265_s0 + $0x348] sm:$0xff]   ;;  %v3842_v27 = vld [vmem:[%s5265_s0 + $0x53c] sm:$0xff]  }
   0xb   :  { %v3835_v20 = vld [vmem:[%s5265_s0 + $0x168] sm:$0xff]   ;;  %3098 = vst [vmem:[%s5266_s1 + $0x28] sm:$0xff] %v3833_v18  ;;  %3102 = vst [vmem:[%s5266_s1 + $0x208] sm:$0xff] %v3834_v19  ;;  %v3843_v28 = vld [vmem:[%s5265_s0 + $0x35c] sm:$0xff]  }
   0xc   :  { %v3836_v21 = vld [vmem:[%s5265_s0 + $0x488] sm:$0xff]   ;;  %3106 = vst [vmem:[%s5266_s1 + $0x3e8] sm:$0xff] %v3835_v20  ;;  %v3844_v29 = vld [vmem:[%s5265_s0 + $0x17c] sm:$0xff]   ;;  %3134 = vst [vmem:[%s5266_s1 + $0x3c] sm:$0xff] %v3842_v27 }
   0xd   :  { %v3837_v22 = vld [vmem:[%s5265_s0 + $0x2a8] sm:$0xff]   ;;  %3110 = vst [vmem:[%s5266_s1 + $0xc8] sm:$0xff] %v3836_v21  ;;  %v3845_v30 = vld [vmem:[%s5265_s0 + $0x49c] sm:$0xff]   ;;  %3138 = vst [vmem:[%s5266_s1 + $0x21c] sm:$0xff] %v3843_v28 }
   0xe   :  { %v3838_v23 = vld [vmem:[%s5265_s0 + $0xc8] sm:$0xff]   ;;  %3114 = vst [vmem:[%s5266_s1 + $0x2a8] sm:$0xff] %v3837_v22  ;;  %3142 = vst [vmem:[%s5266_s1 + $0x3fc] sm:$0xff] %v3844_v29  ;;  %v3846_v31 = vld [vmem:[%s5265_s0 + $0x2bc] sm:$0xff]  }
   0xf   :  { %v3839_v24 = vld [vmem:[%s5265_s0 + $0x3e8] sm:$0xff]   ;;  %3118 = vst [vmem:[%s5266_s1 + $0x488] sm:$0xff] %v3838_v23  ;;  %v3847_v32 = vld [vmem:[%s5265_s0 + $0xdc] sm:$0xff]   ;;  %3146 = vst [vmem:[%s5266_s1 + $0xdc] sm:$0xff] %v3845_v30 }
  0x10   :  { %v3840_v25 = vld [vmem:[%s5265_s0 + $0x208] sm:$0xff]   ;;  %3122 = vst [vmem:[%s5266_s1 + $0x168] sm:$0xff] %v3839_v24  ;;  %v3848_v33 = vld [vmem:[%s5265_s0 + $0x3fc] sm:$0xff]   ;;  %3150 = vst [vmem:[%s5266_s1 + $0x2bc] sm:$0xff] %v3846_v31 }
  0x11   :  { %v3841_v26 = vld [vmem:[%s5265_s0 + $0x28] sm:$0xff]   ;;  %3126 = vst [vmem:[%s5266_s1 + $0x348] sm:$0xff] %v3840_v25  ;;  %3154 = vst [vmem:[%s5266_s1 + $0x49c] sm:$0xff] %v3847_v32  ;;  %v3849_v34 = vld [vmem:[%s5265_s0 + $0x21c] sm:$0xff]  }
  0x12   :  { %3130 = vst [vmem:[%s5266_s1 + $0x528] sm:$0xff] %v3841_v26  ;;  %v3850_v35 = vld [vmem:[%s5265_s0 + $0x3c] sm:$0xff]   ;;  %3158 = vst [vmem:[%s5266_s1 + $0x17c] sm:$0xff] %v3848_v33  ;;  %v3851_v36 = vld [vmem:[%s5265_s0 + $0x550] sm:$0xff]  }
  0x13   :  { %3162 = vst [vmem:[%s5266_s1 + $0x35c] sm:$0xff] %v3849_v34  ;;  %3166 = vst [vmem:[%s5266_s1 + $0x53c] sm:$0xff] %v3850_v35  ;;  %v3852_v37 = vld [vmem:[%s5265_s0 + $0x370] sm:$0xff]   ;;  %v3860_v45 = vld [vmem:[%s5265_s0 + $0x564] sm:$0xff]  }
  0x14   :  { %v3853_v38 = vld [vmem:[%s5265_s0 + $0x190] sm:$0xff]   ;;  %3170 = vst [vmem:[%s5266_s1 + $0x50] sm:$0xff] %v3851_v36  ;;  %3174 = vst [vmem:[%s5266_s1 + $0x230] sm:$0xff] %v3852_v37  ;;  %v3861_v46 = vld [vmem:[%s5265_s0 + $0x384] sm:$0xff]  }
  0x15   :  { %v3854_v39 = vld [vmem:[%s5265_s0 + $0x4b0] sm:$0xff]   ;;  %3178 = vst [vmem:[%s5266_s1 + $0x410] sm:$0xff] %v3853_v38  ;;  %v3862_v47 = vld [vmem:[%s5265_s0 + $0x1a4] sm:$0xff]   ;;  %3206 = vst [vmem:[%s5266_s1 + $0x64] sm:$0xff] %v3860_v45 }
  0x16   :  { %v3855_v40 = vld [vmem:[%s5265_s0 + $0x2d0] sm:$0xff]   ;;  %3182 = vst [vmem:[%s5266_s1 + $0xf0] sm:$0xff] %v3854_v39  ;;  %v3863_v48 = vld [vmem:[%s5265_s0 + $0x4c4] sm:$0xff]   ;;  %3210 = vst [vmem:[%s5266_s1 + $0x244] sm:$0xff] %v3861_v46 }
  0x17   :  { %v3856_v41 = vld [vmem:[%s5265_s0 + $0xf0] sm:$0xff]   ;;  %3186 = vst [vmem:[%s5266_s1 + $0x2d0] sm:$0xff] %v3855_v40  ;;  %3214 = vst [vmem:[%s5266_s1 + $0x424] sm:$0xff] %v3862_v47  ;;  %v3864_v49 = vld [vmem:[%s5265_s0 + $0x2e4] sm:$0xff]  }
  0x18   :  { %v3857_v42 = vld [vmem:[%s5265_s0 + $0x410] sm:$0xff]   ;;  %3190 = vst [vmem:[%s5266_s1 + $0x4b0] sm:$0xff] %v3856_v41  ;;  %v3865_v50 = vld [vmem:[%s5265_s0 + $0x104] sm:$0xff]   ;;  %3218 = vst [vmem:[%s5266_s1 + $0x104] sm:$0xff] %v3863_v48 }
  0x19   :  { %v3858_v43 = vld [vmem:[%s5265_s0 + $0x230] sm:$0xff]   ;;  %3194 = vst [vmem:[%s5266_s1 + $0x190] sm:$0xff] %v3857_v42  ;;  %v3866_v51 = vld [vmem:[%s5265_s0 + $0x424] sm:$0xff]   ;;  %3222 = vst [vmem:[%s5266_s1 + $0x2e4] sm:$0xff] %v3864_v49 }
  0x1a   :  { %v3859_v44 = vld [vmem:[%s5265_s0 + $0x50] sm:$0xff]   ;;  %3198 = vst [vmem:[%s5266_s1 + $0x370] sm:$0xff] %v3858_v43  ;;  %3226 = vst [vmem:[%s5266_s1 + $0x4c4] sm:$0xff] %v3865_v50  ;;  %v3867_v52 = vld [vmem:[%s5265_s0 + $0x244] sm:$0xff]  }
  0x1b   :  { %3202 = vst [vmem:[%s5266_s1 + $0x550] sm:$0xff] %v3859_v44  ;;  %v3868_v53 = vld [vmem:[%s5265_s0 + $0x64] sm:$0xff]   ;;  %3230 = vst [vmem:[%s5266_s1 + $0x1a4] sm:$0xff] %v3866_v51  ;;  %v3869_v54 = vld [vmem:[%s5265_s0 + $0x578] sm:$0xff]  }
  0x1c   :  { %3234 = vst [vmem:[%s5266_s1 + $0x384] sm:$0xff] %v3867_v52  ;;  %3238 = vst [vmem:[%s5266_s1 + $0x564] sm:$0xff] %v3868_v53  ;;  %v3870_v55 = vld [vmem:[%s5265_s0 + $0x398] sm:$0xff]   ;;  %v3878_v63 = vld [vmem:[%s5265_s0 + $0x58c] sm:$0xff]  }
  0x1d   :  { %v3871_v56 = vld [vmem:[%s5265_s0 + $0x1b8] sm:$0xff]   ;;  %3242 = vst [vmem:[%s5266_s1 + $0x78] sm:$0xff] %v3869_v54  ;;  %3246 = vst [vmem:[%s5266_s1 + $0x258] sm:$0xff] %v3870_v55  ;;  %v3879_v0 = vld [vmem:[%s5265_s0 + $0x3ac] sm:$0xff]  }
  0x1e   :  { %v3872_v57 = vld [vmem:[%s5265_s0 + $0x4d8] sm:$0xff]   ;;  %3250 = vst [vmem:[%s5266_s1 + $0x438] sm:$0xff] %v3871_v56  ;;  %v3880_v1 = vld [vmem:[%s5265_s0 + $0x1cc] sm:$0xff]   ;;  %3278 = vst [vmem:[%s5266_s1 + $0x8c] sm:$0xff] %v3878_v63 }
  0x1f   :  { %v3873_v58 = vld [vmem:[%s5265_s0 + $0x2f8] sm:$0xff]   ;;  %3254 = vst [vmem:[%s5266_s1 + $0x118] sm:$0xff] %v3872_v57  ;;  %v3881_v2 = vld [vmem:[%s5265_s0 + $0x4ec] sm:$0xff]   ;;  %3282 = vst [vmem:[%s5266_s1 + $0x26c] sm:$0xff] %v3879_v0 }
  0x20   :  { %v3874_v59 = vld [vmem:[%s5265_s0 + $0x118] sm:$0xff]   ;;  %3258 = vst [vmem:[%s5266_s1 + $0x2f8] sm:$0xff] %v3873_v58  ;;  %3286 = vst [vmem:[%s5266_s1 + $0x44c] sm:$0xff] %v3880_v1  ;;  %v3882_v3 = vld [vmem:[%s5265_s0 + $0x30c] sm:$0xff]  }
  0x21   :  { %v3875_v60 = vld [vmem:[%s5265_s0 + $0x438] sm:$0xff]   ;;  %3262 = vst [vmem:[%s5266_s1 + $0x4d8] sm:$0xff] %v3874_v59  ;;  %v3883_v4 = vld [vmem:[%s5265_s0 + $0x12c] sm:$0xff]   ;;  %3290 = vst [vmem:[%s5266_s1 + $0x12c] sm:$0xff] %v3881_v2 }
  0x22   :  { %v3876_v61 = vld [vmem:[%s5265_s0 + $0x258] sm:$0xff]   ;;  %3266 = vst [vmem:[%s5266_s1 + $0x1b8] sm:$0xff] %v3875_v60  ;;  %v3884_v5 = vld [vmem:[%s5265_s0 + $0x44c] sm:$0xff]   ;;  %3294 = vst [vmem:[%s5266_s1 + $0x30c] sm:$0xff] %v3882_v3 }
  0x23   :  { %v3877_v62 = vld [vmem:[%s5265_s0 + $0x78] sm:$0xff]   ;;  %3270 = vst [vmem:[%s5266_s1 + $0x398] sm:$0xff] %v3876_v61  ;;  %3298 = vst [vmem:[%s5266_s1 + $0x4ec] sm:$0xff] %v3883_v4  ;;  %v3885_v6 = vld [vmem:[%s5265_s0 + $0x26c] sm:$0xff]  }
  0x24   :  { %3274 = vst [vmem:[%s5266_s1 + $0x578] sm:$0xff] %v3877_v62  ;;  %v3886_v7 = vld [vmem:[%s5265_s0 + $0x8c] sm:$0xff]   ;;  %3302 = vst [vmem:[%s5266_s1 + $0x1cc] sm:$0xff] %v3884_v5  ;;  %v3896_v17 = vld [vmem:[%s5265_s0 + $0x51c] sm:$0xff]  }
  0x25   :  { %3306 = vst [vmem:[%s5266_s1 + $0x3ac] sm:$0xff] %v3885_v6  ;;  %3310 = vst [vmem:[%s5266_s1 + $0x58c] sm:$0xff] %v3886_v7  ;;  %v3887_v8 = vld [vmem:[%s5265_s0 + $0x508] sm:$0xff]   ;;  %v3897_v18 = vld [vmem:[%s5265_s0 + $0x33c] sm:$0xff]  }
  0x26   :  { %v3888_v9 = vld [vmem:[%s5265_s0 + $0x328] sm:$0xff]   ;;  %3386 = vst [vmem:[%s5266_s1 + $0x8] sm:$0xff] %v3887_v8  ;;  %v3898_v19 = vld [vmem:[%s5265_s0 + $0x15c] sm:$0xff]   ;;  %3422 = vst [vmem:[%s5266_s1 + $0x1c] sm:$0xff] %v3896_v17 }
  0x27   :  { %v3889_v10 = vld [vmem:[%s5265_s0 + $0x148] sm:$0xff]   ;;  %3390 = vst [vmem:[%s5266_s1 + $0x1e8] sm:$0xff] %v3888_v9  ;;  %v3899_v20 = vld [vmem:[%s5265_s0 + $0x47c] sm:$0xff]   ;;  %3426 = vst [vmem:[%s5266_s1 + $0x1fc] sm:$0xff] %v3897_v18 }
  0x28   :  { %v3890_v11 = vld [vmem:[%s5265_s0 + $0x468] sm:$0xff]   ;;  %3394 = vst [vmem:[%s5266_s1 + $0x3c8] sm:$0xff] %v3889_v10  ;;  %3430 = vst [vmem:[%s5266_s1 + $0x3dc] sm:$0xff] %v3898_v19  ;;  %v3900_v21 = vld [vmem:[%s5265_s0 + $0x29c] sm:$0xff]  }
  0x29   :  { %v3891_v12 = vld [vmem:[%s5265_s0 + $0x288] sm:$0xff]   ;;  %3398 = vst [vmem:[%s5266_s1 + $0xa8] sm:$0xff] %v3890_v11  ;;  %v3901_v22 = vld [vmem:[%s5265_s0 + $0xbc] sm:$0xff]   ;;  %3434 = vst [vmem:[%s5266_s1 + $0xbc] sm:$0xff] %v3899_v20 }
  0x2a   :  { %v3892_v13 = vld [vmem:[%s5265_s0 + $0xa8] sm:$0xff]   ;;  %3402 = vst [vmem:[%s5266_s1 + $0x288] sm:$0xff] %v3891_v12  ;;  %v3902_v23 = vld [vmem:[%s5265_s0 + $0x3dc] sm:$0xff]   ;;  %3438 = vst [vmem:[%s5266_s1 + $0x29c] sm:$0xff] %v3900_v21 }
  0x2b   :  { %v3893_v14 = vld [vmem:[%s5265_s0 + $0x3c8] sm:$0xff]   ;;  %3406 = vst [vmem:[%s5266_s1 + $0x468] sm:$0xff] %v3892_v13  ;;  %3442 = vst [vmem:[%s5266_s1 + $0x47c] sm:$0xff] %v3901_v22  ;;  %v3903_v24 = vld [vmem:[%s5265_s0 + $0x1fc] sm:$0xff]  }
  0x2c   :  { %v3894_v15 = vld [vmem:[%s5265_s0 + $0x1e8] sm:$0xff]   ;;  %3410 = vst [vmem:[%s5266_s1 + $0x148] sm:$0xff] %v3893_v14  ;;  %v3904_v25 = vld [vmem:[%s5265_s0 + $0x1c] sm:$0xff]   ;;  %3446 = vst [vmem:[%s5266_s1 + $0x15c] sm:$0xff] %v3902_v23 }
  0x2d   :  { %v3895_v16 = vld [vmem:[%s5265_s0 + $0x8] sm:$0xff]   ;;  %3414 = vst [vmem:[%s5266_s1 + $0x328] sm:$0xff] %v3894_v15  ;;  %v3905_v26 = vld [vmem:[%s5265_s0 + $0x530] sm:$0xff]   ;;  %3450 = vst [vmem:[%s5266_s1 + $0x33c] sm:$0xff] %v3903_v24 }
  0x2e   :  { %3418 = vst [vmem:[%s5266_s1 + $0x508] sm:$0xff] %v3895_v16  ;;  %3454 = vst [vmem:[%s5266_s1 + $0x51c] sm:$0xff] %v3904_v25  ;;  %v3906_v27 = vld [vmem:[%s5265_s0 + $0x350] sm:$0xff]   ;;  %v3914_v35 = vld [vmem:[%s5265_s0 + $0x544] sm:$0xff]  }
  0x2f   :  { %v3907_v28 = vld [vmem:[%s5265_s0 + $0x170] sm:$0xff]   ;;  %3458 = vst [vmem:[%s5266_s1 + $0x30] sm:$0xff] %v3905_v26  ;;  %3462 = vst [vmem:[%s5266_s1 + $0x210] sm:$0xff] %v3906_v27  ;;  %v3915_v36 = vld [vmem:[%s5265_s0 + $0x364] sm:$0xff]  }
  0x30   :  { %v3908_v29 = vld [vmem:[%s5265_s0 + $0x490] sm:$0xff]   ;;  %3466 = vst [vmem:[%s5266_s1 + $0x3f0] sm:$0xff] %v3907_v28  ;;  %v3916_v37 = vld [vmem:[%s5265_s0 + $0x184] sm:$0xff]   ;;  %3494 = vst [vmem:[%s5266_s1 + $0x44] sm:$0xff] %v3914_v35 }
  0x31   :  { %v3909_v30 = vld [vmem:[%s5265_s0 + $0x2b0] sm:$0xff]   ;;  %3470 = vst [vmem:[%s5266_s1 + $0xd0] sm:$0xff] %v3908_v29  ;;  %v3917_v38 = vld [vmem:[%s5265_s0 + $0x4a4] sm:$0xff]   ;;  %3498 = vst [vmem:[%s5266_s1 + $0x224] sm:$0xff] %v3915_v36 }
  0x32   :  { %v3910_v31 = vld [vmem:[%s5265_s0 + $0xd0] sm:$0xff]   ;;  %3474 = vst [vmem:[%s5266_s1 + $0x2b0] sm:$0xff] %v3909_v30  ;;  %3502 = vst [vmem:[%s5266_s1 + $0x404] sm:$0xff] %v3916_v37  ;;  %v3918_v39 = vld [vmem:[%s5265_s0 + $0x2c4] sm:$0xff]  }
  0x33   :  { %v3911_v32 = vld [vmem:[%s5265_s0 + $0x3f0] sm:$0xff]   ;;  %3478 = vst [vmem:[%s5266_s1 + $0x490] sm:$0xff] %v3910_v31  ;;  %v3919_v40 = vld [vmem:[%s5265_s0 + $0xe4] sm:$0xff]   ;;  %3506 = vst [vmem:[%s5266_s1 + $0xe4] sm:$0xff] %v3917_v38 }
  0x34   :  { %v3912_v33 = vld [vmem:[%s5265_s0 + $0x210] sm:$0xff]   ;;  %3482 = vst [vmem:[%s5266_s1 + $0x170] sm:$0xff] %v3911_v32  ;;  %v3920_v41 = vld [vmem:[%s5265_s0 + $0x404] sm:$0xff]   ;;  %3510 = vst [vmem:[%s5266_s1 + $0x2c4] sm:$0xff] %v3918_v39 }
  0x35   :  { %v3913_v34 = vld [vmem:[%s5265_s0 + $0x30] sm:$0xff]   ;;  %3486 = vst [vmem:[%s5266_s1 + $0x350] sm:$0xff] %v3912_v33  ;;  %3514 = vst [vmem:[%s5266_s1 + $0x4a4] sm:$0xff] %v3919_v40  ;;  %v3921_v42 = vld [vmem:[%s5265_s0 + $0x224] sm:$0xff]  }
  0x36   :  { %3490 = vst [vmem:[%s5266_s1 + $0x530] sm:$0xff] %v3913_v34  ;;  %v3922_v43 = vld [vmem:[%s5265_s0 + $0x44] sm:$0xff]   ;;  %3518 = vst [vmem:[%s5266_s1 + $0x184] sm:$0xff] %v3920_v41  ;;  %v3923_v44 = vld [vmem:[%s5265_s0 + $0x558] sm:$0xff]  }
  0x37   :  { %3522 = vst [vmem:[%s5266_s1 + $0x364] sm:$0xff] %v3921_v42  ;;  %3526 = vst [vmem:[%s5266_s1 + $0x544] sm:$0xff] %v3922_v43  ;;  %v3924_v45 = vld [vmem:[%s5265_s0 + $0x378] sm:$0xff]   ;;  %v3932_v53 = vld [vmem:[%s5265_s0 + $0x56c] sm:$0xff]  }
  0x38   :  { %v3925_v46 = vld [vmem:[%s5265_s0 + $0x198] sm:$0xff]   ;;  %3530 = vst [vmem:[%s5266_s1 + $0x58] sm:$0xff] %v3923_v44  ;;  %3534 = vst [vmem:[%s5266_s1 + $0x238] sm:$0xff] %v3924_v45  ;;  %v3933_v54 = vld [vmem:[%s5265_s0 + $0x38c] sm:$0xff]  }
  0x39   :  { %v3926_v47 = vld [vmem:[%s5265_s0 + $0x4b8] sm:$0xff]   ;;  %3538 = vst [vmem:[%s5266_s1 + $0x418] sm:$0xff] %v3925_v46  ;;  %v3934_v55 = vld [vmem:[%s5265_s0 + $0x1ac] sm:$0xff]   ;;  %3566 = vst [vmem:[%s5266_s1 + $0x6c] sm:$0xff] %v3932_v53 }
  0x3a   :  { %v3927_v48 = vld [vmem:[%s5265_s0 + $0x2d8] sm:$0xff]   ;;  %3542 = vst [vmem:[%s5266_s1 + $0xf8] sm:$0xff] %v3926_v47  ;;  %v3935_v56 = vld [vmem:[%s5265_s0 + $0x4cc] sm:$0xff]   ;;  %3570 = vst [vmem:[%s5266_s1 + $0x24c] sm:$0xff] %v3933_v54 }
  0x3b   :  { %v3928_v49 = vld [vmem:[%s5265_s0 + $0xf8] sm:$0xff]   ;;  %3546 = vst [vmem:[%s5266_s1 + $0x2d8] sm:$0xff] %v3927_v48  ;;  %3574 = vst [vmem:[%s5266_s1 + $0x42c] sm:$0xff] %v3934_v55  ;;  %v3936_v57 = vld [vmem:[%s5265_s0 + $0x2ec] sm:$0xff]  }
  0x3c   :  { %v3929_v50 = vld [vmem:[%s5265_s0 + $0x418] sm:$0xff]   ;;  %3550 = vst [vmem:[%s5266_s1 + $0x4b8] sm:$0xff] %v3928_v49  ;;  %v3937_v58 = vld [vmem:[%s5265_s0 + $0x10c] sm:$0xff]   ;;  %3578 = vst [vmem:[%s5266_s1 + $0x10c] sm:$0xff] %v3935_v56 }
  0x3d   :  { %v3930_v51 = vld [vmem:[%s5265_s0 + $0x238] sm:$0xff]   ;;  %3554 = vst [vmem:[%s5266_s1 + $0x198] sm:$0xff] %v3929_v50  ;;  %v3938_v59 = vld [vmem:[%s5265_s0 + $0x42c] sm:$0xff]   ;;  %3582 = vst [vmem:[%s5266_s1 + $0x2ec] sm:$0xff] %v3936_v57 }
  0x3e   :  { %v3931_v52 = vld [vmem:[%s5265_s0 + $0x58] sm:$0xff]   ;;  %3558 = vst [vmem:[%s5266_s1 + $0x378] sm:$0xff] %v3930_v51  ;;  %3586 = vst [vmem:[%s5266_s1 + $0x4cc] sm:$0xff] %v3937_v58  ;;  %v3939_v60 = vld [vmem:[%s5265_s0 + $0x24c] sm:$0xff]  }
  0x3f   :  { %3562 = vst [vmem:[%s5266_s1 + $0x558] sm:$0xff] %v3931_v52  ;;  %v3940_v61 = vld [vmem:[%s5265_s0 + $0x6c] sm:$0xff]   ;;  %3590 = vst [vmem:[%s5266_s1 + $0x1ac] sm:$0xff] %v3938_v59  ;;  %v3941_v62 = vld [vmem:[%s5265_s0 + $0x580] sm:$0xff]  }
  0x40   :  { %3594 = vst [vmem:[%s5266_s1 + $0x38c] sm:$0xff] %v3939_v60  ;;  %3598 = vst [vmem:[%s5266_s1 + $0x56c] sm:$0xff] %v3940_v61  ;;  %v3942_v63 = vld [vmem:[%s5265_s0 + $0x3a0] sm:$0xff]   ;;  %v3950_v7 = vld [vmem:[%s5265_s0 + $0x594] sm:$0xff]  }
  0x41   :  { %v3943_v0 = vld [vmem:[%s5265_s0 + $0x1c0] sm:$0xff]   ;;  %3602 = vst [vmem:[%s5266_s1 + $0x80] sm:$0xff] %v3941_v62  ;;  %3606 = vst [vmem:[%s5266_s1 + $0x260] sm:$0xff] %v3942_v63  ;;  %v3951_v8 = vld [vmem:[%s5265_s0 + $0x3b4] sm:$0xff]  }
  0x42   :  { %v3944_v1 = vld [vmem:[%s5265_s0 + $0x4e0] sm:$0xff]   ;;  %3610 = vst [vmem:[%s5266_s1 + $0x440] sm:$0xff] %v3943_v0  ;;  %v3952_v9 = vld [vmem:[%s5265_s0 + $0x1d4] sm:$0xff]   ;;  %3638 = vst [vmem:[%s5266_s1 + $0x94] sm:$0xff] %v3950_v7 }
  0x43   :  { %v3945_v2 = vld [vmem:[%s5265_s0 + $0x300] sm:$0xff]   ;;  %3614 = vst [vmem:[%s5266_s1 + $0x120] sm:$0xff] %v3944_v1  ;;  %v3953_v10 = vld [vmem:[%s5265_s0 + $0x4f4] sm:$0xff]   ;;  %3642 = vst [vmem:[%s5266_s1 + $0x274] sm:$0xff] %v3951_v8 }
  0x44   :  { %v3946_v3 = vld [vmem:[%s5265_s0 + $0x120] sm:$0xff]   ;;  %3618 = vst [vmem:[%s5266_s1 + $0x300] sm:$0xff] %v3945_v2  ;;  %3646 = vst [vmem:[%s5266_s1 + $0x454] sm:$0xff] %v3952_v9  ;;  %v3954_v11 = vld [vmem:[%s5265_s0 + $0x314] sm:$0xff]  }
  0x45   :  { %v3947_v4 = vld [vmem:[%s5265_s0 + $0x440] sm:$0xff]   ;;  %3622 = vst [vmem:[%s5266_s1 + $0x4e0] sm:$0xff] %v3946_v3  ;;  %v3955_v12 = vld [vmem:[%s5265_s0 + $0x134] sm:$0xff]   ;;  %3650 = vst [vmem:[%s5266_s1 + $0x134] sm:$0xff] %v3953_v10 }
  0x46   :  { %v3948_v5 = vld [vmem:[%s5265_s0 + $0x260] sm:$0xff]   ;;  %3626 = vst [vmem:[%s5266_s1 + $0x1c0] sm:$0xff] %v3947_v4  ;;  %v3956_v13 = vld [vmem:[%s5265_s0 + $0x454] sm:$0xff]   ;;  %3654 = vst [vmem:[%s5266_s1 + $0x314] sm:$0xff] %v3954_v11 }
  0x47   :  { %v3949_v6 = vld [vmem:[%s5265_s0 + $0x80] sm:$0xff]   ;;  %3630 = vst [vmem:[%s5266_s1 + $0x3a0] sm:$0xff] %v3948_v5  ;;  %3658 = vst [vmem:[%s5266_s1 + $0x4f4] sm:$0xff] %v3955_v12  ;;  %v3957_v14 = vld [vmem:[%s5265_s0 + $0x274] sm:$0xff]  }
  0x48   :  { %3634 = vst [vmem:[%s5266_s1 + $0x580] sm:$0xff] %v3949_v6  ;;  %v3958_v15 = vld [vmem:[%s5265_s0 + $0x94] sm:$0xff]   ;;  %3662 = vst [vmem:[%s5266_s1 + $0x1d4] sm:$0xff] %v3956_v13  ;;  %v3671_v16 = vld [vmem:[%s5265_s0 + $0x510] sm:$0xf] }
  0x49   :  { %v3673_v17 = vld [vmem:[%s5265_s0 + $0x330] sm:$0xf]  ;;  %3666 = vst [vmem:[%s5266_s1 + $0x3b4] sm:$0xff] %v3957_v14  ;;  %3670 = vst [vmem:[%s5266_s1 + $0x594] sm:$0xff] %v3958_v15  ;;  %v3689_v25 = vld [vmem:[%s5265_s0 + $0x524] sm:$0xf] }
  0x4a   :  { %v3675_v18 = vld [vmem:[%s5265_s0 + $0x150] sm:$0xf]  ;;  %3672 = vst [vmem:[%s5266_s1 + $0x10] sm:$0xf] %v3671_v16  ;;  %3674 = vst [vmem:[%s5266_s1 + $0x1f0] sm:$0xf] %v3673_v17 }
  0x4b   :  { %3676 = vst [vmem:[%s5266_s1 + $0x3d0] sm:$0xf] %v3675_v18  ;;  %v3677_v19 = vld [vmem:[%s5265_s0 + $0x470] sm:$0xf]  ;;  %v3691_v26 = vld [vmem:[%s5265_s0 + $0x344] sm:$0xf] }
  0x4c   :  { %v3679_v20 = vld [vmem:[%s5265_s0 + $0x290] sm:$0xf]  ;;  %3678 = vst [vmem:[%s5266_s1 + $0xb0] sm:$0xf] %v3677_v19  ;;  %v3693_v27 = vld [vmem:[%s5265_s0 + $0x164] sm:$0xf] }
  0x4d   :  { %v3681_v21 = vld [vmem:[%s5265_s0 + $0xb0] sm:$0xf]  ;;  %3680 = vst [vmem:[%s5266_s1 + $0x290] sm:$0xf] %v3679_v20  ;;  %3690 = vst [vmem:[%s5266_s1 + $0x24] sm:$0xf] %v3689_v25 }
  0x4e   :  { %3682 = vst [vmem:[%s5266_s1 + $0x470] sm:$0xf] %v3681_v21  ;;  %v3683_v22 = vld [vmem:[%s5265_s0 + $0x3d0] sm:$0xf]  ;;  %3692 = vst [vmem:[%s5266_s1 + $0x204] sm:$0xf] %v3691_v26 }
  0x4f   :  { %v3685_v23 = vld [vmem:[%s5265_s0 + $0x1f0] sm:$0xf]  ;;  %3684 = vst [vmem:[%s5266_s1 + $0x150] sm:$0xf] %v3683_v22  ;;  %3694 = vst [vmem:[%s5266_s1 + $0x3e4] sm:$0xf] %v3693_v27 }
  0x50   :  { %v3687_v24 = vld [vmem:[%s5265_s0 + $0x10] sm:$0xf]  ;;  %3686 = vst [vmem:[%s5266_s1 + $0x330] sm:$0xf] %v3685_v23  ;;  %v3695_v28 = vld [vmem:[%s5265_s0 + $0x484] sm:$0xf] }
  0x51   :  { %3688 = vst [vmem:[%s5266_s1 + $0x510] sm:$0xf] %v3687_v24  ;;  %v3697_v29 = vld [vmem:[%s5265_s0 + $0x2a4] sm:$0xf]  ;;  %3696 = vst [vmem:[%s5266_s1 + $0xc4] sm:$0xf] %v3695_v28 }
  0x52   :  { %v3699_v30 = vld [vmem:[%s5265_s0 + $0xc4] sm:$0xf]  ;;  %3698 = vst [vmem:[%s5266_s1 + $0x2a4] sm:$0xf] %v3697_v29  ;;  %v3707_v34 = vld [vmem:[%s5265_s0 + $0x538] sm:$0xf] }
  0x53   :  { %3700 = vst [vmem:[%s5266_s1 + $0x484] sm:$0xf] %v3699_v30  ;;  %v3701_v31 = vld [vmem:[%s5265_s0 + $0x3e4] sm:$0xf]  ;;  %v3709_v35 = vld [vmem:[%s5265_s0 + $0x358] sm:$0xf] }
  0x54   :  { %v3703_v32 = vld [vmem:[%s5265_s0 + $0x204] sm:$0xf]  ;;  %3702 = vst [vmem:[%s5266_s1 + $0x164] sm:$0xf] %v3701_v31  ;;  %v3711_v36 = vld [vmem:[%s5265_s0 + $0x178] sm:$0xf] }
  0x55   :  { %v3705_v33 = vld [vmem:[%s5265_s0 + $0x24] sm:$0xf]  ;;  %3704 = vst [vmem:[%s5266_s1 + $0x344] sm:$0xf] %v3703_v32  ;;  %3708 = vst [vmem:[%s5266_s1 + $0x38] sm:$0xf] %v3707_v34 }
  0x56   :  { %3706 = vst [vmem:[%s5266_s1 + $0x524] sm:$0xf] %v3705_v33  ;;  %3710 = vst [vmem:[%s5266_s1 + $0x218] sm:$0xf] %v3709_v35  ;;  %v3713_v37 = vld [vmem:[%s5265_s0 + $0x498] sm:$0xf] }
  0x57   :  { %3712 = vst [vmem:[%s5266_s1 + $0x3f8] sm:$0xf] %v3711_v36  ;;  %v3715_v38 = vld [vmem:[%s5265_s0 + $0x2b8] sm:$0xf]  ;;  %3714 = vst [vmem:[%s5266_s1 + $0xd8] sm:$0xf] %v3713_v37 }
  0x58   :  { %v3717_v39 = vld [vmem:[%s5265_s0 + $0xd8] sm:$0xf]  ;;  %3716 = vst [vmem:[%s5266_s1 + $0x2b8] sm:$0xf] %v3715_v38  ;;  %v3725_v43 = vld [vmem:[%s5265_s0 + $0x54c] sm:$0xf] }
  0x59   :  { %3718 = vst [vmem:[%s5266_s1 + $0x498] sm:$0xf] %v3717_v39  ;;  %v3719_v40 = vld [vmem:[%s5265_s0 + $0x3f8] sm:$0xf]  ;;  %v3727_v44 = vld [vmem:[%s5265_s0 + $0x36c] sm:$0xf] }
  0x5a   :  { %v3721_v41 = vld [vmem:[%s5265_s0 + $0x218] sm:$0xf]  ;;  %3720 = vst [vmem:[%s5266_s1 + $0x178] sm:$0xf] %v3719_v40  ;;  %v3729_v45 = vld [vmem:[%s5265_s0 + $0x18c] sm:$0xf] }
  0x5b   :  { %v3723_v42 = vld [vmem:[%s5265_s0 + $0x38] sm:$0xf]  ;;  %3722 = vst [vmem:[%s5266_s1 + $0x358] sm:$0xf] %v3721_v41  ;;  %3726 = vst [vmem:[%s5266_s1 + $0x4c] sm:$0xf] %v3725_v43 }
  0x5c   :  { %3724 = vst [vmem:[%s5266_s1 + $0x538] sm:$0xf] %v3723_v42  ;;  %3728 = vst [vmem:[%s5266_s1 + $0x22c] sm:$0xf] %v3727_v44  ;;  %v3731_v46 = vld [vmem:[%s5265_s0 + $0x4ac] sm:$0xf] }
  0x5d   :  { %3730 = vst [vmem:[%s5266_s1 + $0x40c] sm:$0xf] %v3729_v45  ;;  %v3733_v47 = vld [vmem:[%s5265_s0 + $0x2cc] sm:$0xf]  ;;  %3732 = vst [vmem:[%s5266_s1 + $0xec] sm:$0xf] %v3731_v46 }
  0x5e   :  { %v3735_v48 = vld [vmem:[%s5265_s0 + $0xec] sm:$0xf]  ;;  %3734 = vst [vmem:[%s5266_s1 + $0x2cc] sm:$0xf] %v3733_v47  ;;  %v3743_v52 = vld [vmem:[%s5265_s0 + $0x560] sm:$0xf] }
  0x5f   :  { %3736 = vst [vmem:[%s5266_s1 + $0x4ac] sm:$0xf] %v3735_v48  ;;  %v3737_v49 = vld [vmem:[%s5265_s0 + $0x40c] sm:$0xf]  ;;  %v3745_v53 = vld [vmem:[%s5265_s0 + $0x380] sm:$0xf] }
  0x60   :  { %v3739_v50 = vld [vmem:[%s5265_s0 + $0x22c] sm:$0xf]  ;;  %3738 = vst [vmem:[%s5266_s1 + $0x18c] sm:$0xf] %v3737_v49  ;;  %v3747_v54 = vld [vmem:[%s5265_s0 + $0x1a0] sm:$0xf] }
  0x61   :  { %v3741_v51 = vld [vmem:[%s5265_s0 + $0x4c] sm:$0xf]  ;;  %3740 = vst [vmem:[%s5266_s1 + $0x36c] sm:$0xf] %v3739_v50  ;;  %3744 = vst [vmem:[%s5266_s1 + $0x60] sm:$0xf] %v3743_v52 }
  0x62   :  { %3742 = vst [vmem:[%s5266_s1 + $0x54c] sm:$0xf] %v3741_v51  ;;  %3746 = vst [vmem:[%s5266_s1 + $0x240] sm:$0xf] %v3745_v53  ;;  %v3749_v55 = vld [vmem:[%s5265_s0 + $0x4c0] sm:$0xf] }
  0x63   :  { %3748 = vst [vmem:[%s5266_s1 + $0x420] sm:$0xf] %v3747_v54  ;;  %v3751_v56 = vld [vmem:[%s5265_s0 + $0x2e0] sm:$0xf]  ;;  %3750 = vst [vmem:[%s5266_s1 + $0x100] sm:$0xf] %v3749_v55 }
  0x64   :  { %v3753_v57 = vld [vmem:[%s5265_s0 + $0x100] sm:$0xf]  ;;  %3752 = vst [vmem:[%s5266_s1 + $0x2e0] sm:$0xf] %v3751_v56  ;;  %v3761_v61 = vld [vmem:[%s5265_s0 + $0x574] sm:$0xf] }
  0x65   :  { %3754 = vst [vmem:[%s5266_s1 + $0x4c0] sm:$0xf] %v3753_v57  ;;  %v3755_v58 = vld [vmem:[%s5265_s0 + $0x420] sm:$0xf]  ;;  %v3763_v62 = vld [vmem:[%s5265_s0 + $0x394] sm:$0xf] }
  0x66   :  { %v3757_v59 = vld [vmem:[%s5265_s0 + $0x240] sm:$0xf]  ;;  %3756 = vst [vmem:[%s5266_s1 + $0x1a0] sm:$0xf] %v3755_v58  ;;  %v3765_v63 = vld [vmem:[%s5265_s0 + $0x1b4] sm:$0xf] }
  0x67   :  { %v3759_v60 = vld [vmem:[%s5265_s0 + $0x60] sm:$0xf]  ;;  %3758 = vst [vmem:[%s5266_s1 + $0x380] sm:$0xf] %v3757_v59  ;;  %3762 = vst [vmem:[%s5266_s1 + $0x74] sm:$0xf] %v3761_v61 }
  0x68   :  { %3760 = vst [vmem:[%s5266_s1 + $0x560] sm:$0xf] %v3759_v60  ;;  %3764 = vst [vmem:[%s5266_s1 + $0x254] sm:$0xf] %v3763_v62  ;;  %v3767_v0 = vld [vmem:[%s5265_s0 + $0x4d4] sm:$0xf] }
  0x69   :  { %3766 = vst [vmem:[%s5266_s1 + $0x434] sm:$0xf] %v3765_v63  ;;  %v3769_v1 = vld [vmem:[%s5265_s0 + $0x2f4] sm:$0xf]  ;;  %3768 = vst [vmem:[%s5266_s1 + $0x114] sm:$0xf] %v3767_v0 }
  0x6a   :  { %v3771_v2 = vld [vmem:[%s5265_s0 + $0x114] sm:$0xf]  ;;  %3770 = vst [vmem:[%s5266_s1 + $0x2f4] sm:$0xf] %v3769_v1  ;;  %v3779_v6 = vld [vmem:[%s5265_s0 + $0x588] sm:$0xf] }
  0x6b   :  { %3772 = vst [vmem:[%s5266_s1 + $0x4d4] sm:$0xf] %v3771_v2  ;;  %v3773_v3 = vld [vmem:[%s5265_s0 + $0x434] sm:$0xf]  ;;  %v3781_v7 = vld [vmem:[%s5265_s0 + $0x3a8] sm:$0xf] }
  0x6c   :  { %v3775_v4 = vld [vmem:[%s5265_s0 + $0x254] sm:$0xf]  ;;  %3774 = vst [vmem:[%s5266_s1 + $0x1b4] sm:$0xf] %v3773_v3  ;;  %v3783_v8 = vld [vmem:[%s5265_s0 + $0x1c8] sm:$0xf] }
  0x6d   :  { %v3777_v5 = vld [vmem:[%s5265_s0 + $0x74] sm:$0xf]  ;;  %3776 = vst [vmem:[%s5266_s1 + $0x394] sm:$0xf] %v3775_v4  ;;  %3780 = vst [vmem:[%s5266_s1 + $0x88] sm:$0xf] %v3779_v6 }
  0x6e   :  { %3778 = vst [vmem:[%s5266_s1 + $0x574] sm:$0xf] %v3777_v5  ;;  %3782 = vst [vmem:[%s5266_s1 + $0x268] sm:$0xf] %v3781_v7  ;;  %v3785_v9 = vld [vmem:[%s5265_s0 + $0x4e8] sm:$0xf] }
  0x6f   :  { %3784 = vst [vmem:[%s5266_s1 + $0x448] sm:$0xf] %v3783_v8  ;;  %v3787_v10 = vld [vmem:[%s5265_s0 + $0x308] sm:$0xf]  ;;  %3786 = vst [vmem:[%s5266_s1 + $0x128] sm:$0xf] %v3785_v9 }
  0x70   :  { %v3789_v11 = vld [vmem:[%s5265_s0 + $0x128] sm:$0xf]  ;;  %3788 = vst [vmem:[%s5266_s1 + $0x308] sm:$0xf] %v3787_v10  ;;  %v3797_v15 = vld [vmem:[%s5265_s0 + $0x59c] sm:$0xf] }
  0x71   :  { %3790 = vst [vmem:[%s5266_s1 + $0x4e8] sm:$0xf] %v3789_v11  ;;  %v3791_v12 = vld [vmem:[%s5265_s0 + $0x448] sm:$0xf]  ;;  %v3799_v16 = vld [vmem:[%s5265_s0 + $0x3bc] sm:$0xf] }
  0x72   :  { %v3793_v13 = vld [vmem:[%s5265_s0 + $0x268] sm:$0xf]  ;;  %3792 = vst [vmem:[%s5266_s1 + $0x1c8] sm:$0xf] %v3791_v12  ;;  %v3801_v17 = vld [vmem:[%s5265_s0 + $0x1dc] sm:$0xf] }
  0x73   :  { %v3795_v14 = vld [vmem:[%s5265_s0 + $0x88] sm:$0xf]  ;;  %3794 = vst [vmem:[%s5266_s1 + $0x3a8] sm:$0xf] %v3793_v13  ;;  %3798 = vst [vmem:[%s5266_s1 + $0x9c] sm:$0xf] %v3797_v15 }
  0x74   :  { %3796 = vst [vmem:[%s5266_s1 + $0x588] sm:$0xf] %v3795_v14  ;;  %3800 = vst [vmem:[%s5266_s1 + $0x27c] sm:$0xf] %v3799_v16  ;;  %v3803_v18 = vld [vmem:[%s5265_s0 + $0x4fc] sm:$0xf] }
  0x75   :  { %3802 = vst [vmem:[%s5266_s1 + $0x45c] sm:$0xf] %v3801_v17  ;;  %v3805_v19 = vld [vmem:[%s5265_s0 + $0x31c] sm:$0xf]  ;;  %3804 = vst [vmem:[%s5266_s1 + $0x13c] sm:$0xf] %v3803_v18 }
  0x76   :  { %v3807_v20 = vld [vmem:[%s5265_s0 + $0x13c] sm:$0xf]  ;;  %3806 = vst [vmem:[%s5266_s1 + $0x31c] sm:$0xf] %v3805_v19 }
  0x77   :  { %3808 = vst [vmem:[%s5266_s1 + $0x4fc] sm:$0xf] %v3807_v20  ;;  %v3809_v21 = vld [vmem:[%s5265_s0 + $0x45c] sm:$0xf] }
  0x78   :  { %v3811_v22 = vld [vmem:[%s5265_s0 + $0x27c] sm:$0xf]  ;;  %3810 = vst [vmem:[%s5266_s1 + $0x1dc] sm:$0xf] %v3809_v21 }
  0x79   :  { %v3813_v23 = vld [vmem:[%s5265_s0 + $0x9c] sm:$0xf]  ;;  %3812 = vst [vmem:[%s5266_s1 + $0x3bc] sm:$0xf] %v3811_v22 }
  0x7a   :  { %3814 = vst [vmem:[%s5266_s1 + $0x59c] sm:$0xf] %v3813_v23 }

// kernel: my_resnet_forward.19
= control target key start
LH: loop header
LB: loop body
LE: loop exit
PB: predicated region body
PF: predicated region fallthrough
CT: control target
= control target key end

     0   :  { %v1398_v5 = vmov 0   ;;  %vm122_vm0 = vcmask 261120   ;;  %s1755_s0 = inlined_call_operand.vmem [shape: bf16[576,8], index: 0, kind: input, shape index: {}]   ;;  %s1756_s1 = inlined_call_operand.vmem [shape: bf16[64,576], index: 1, kind: input, shape index: {}]   ;;  %s1757_s2 = inlined_call_operand.vmem [shape: f32[64,1], index: 2, kind: input, shape index: {}]   ;;  %s1758_s3 = inlined_call_operand.vmem [shape: bf16[32,8], index: 3, kind: input, shape index: {}]   ;;  %s1759_s4 = inlined_call_operand.vmem [shape: bf16[64,32], index: 4, kind: input, shape index: {}]   ;;  %s1760_s5 = inlined_call_operand.vmem [shape: f32[64,1], index: 5, kind: input, shape index: {}]   ;;  %s1761_s6 = inlined_call_operand.vmem [shape: f32[8,8], index: 6, kind: input, shape index: {}]   ;;  %s1762_s7 = inlined_call_operand.hbm [shape: f32[64,8], index: 7, kind: output, shape index: {0}]   ;;  %s1763_s8 = inlined_call_operand.vmem [shape: f32[64,8], index: 8, kind: output, shape index: {1}]  }
   0x1   :  { %v1304_v0 = vld [vmem:[%s1758_s3] sm:$0xff]   ;;  %v1307_v3 = vld [vmem:[%s1758_s3 + $0x8] sm:$0xff]   ;;  %1302 = vset.pattern.permute.xlu0 %v1398_v5  ;;  %1303 = vset.pattern.permute.xlu1 %v1398_v5  ;;  %v1311_v8 = vld [vmem:[%s1755_s0 + $0x50] sm:$0xff]  }
   0x2   :  { %v1305_v1 = vld [vmem:[%s1755_s0 + $0x40] sm:$0xff]   ;;  %1232 = vmatprep.subr.bf16.mxu0 %v1304_v0  ;;  %v1308_v4 = vld [vmem:[%s1755_s0 + $0x48] sm:$0xff]   ;;  %v1314_v11 = vld [vmem:[%s1755_s0 + $0x10] sm:$0xff]  }
   0x3   :  { %v1306_v2 = vld [vmem:[%s1755_s0] sm:$0xff]   ;;  %1135 = vmatprep.subr.bf16.mxu1 %v1305_v1  ;;  %1233 = vmatpush3.bf16.msra.mxu0 %v1304_v0  ;;  %v1309_v6 = vld [vmem:[%s1755_s0 + $0x8] sm:$0xff]   ;;  %v1316_v13 = vld [vmem:[%s1755_s0 + $0x58] sm:$0xff]  }
   0x4   :  { %1136 = vmatpush3.bf16.msra.mxu1 %v1306_v2  ;;  %1234 = vmatprep.subr.bf16.mxu0 %v1307_v3  ;;  %v1310_v7 = vld [vmem:[%s1759_s4] sm:$0xff]   ;;  %v1313_v10 = vld [vmem:[%s1759_s4 + $0x8] sm:$0xff]   ;;  %v1318_v15 = vld [vmem:[%s1755_s0 + $0x18] sm:$0xff]  }
   0x5   :  { %1137 = vmatprep.subr.bf16.mxu1 %v1308_v4  ;;  %1236 = vmatprep.mubr.msk.bf16.mxu0 %vm122_vm0, %v1310_v7  ;;  %v1312_v9 = vld [vmem:[%s1755_s0 + $0xc0] sm:$0xff]   ;;  %v1317_v14 = vld [vmem:[%s1755_s0 + $0xc8] sm:$0xff]   ;;  %v1321_v18 = vld [vmem:[%s1755_s0 + $0xd0] sm:$0xff]  }
   0x6   :  { %v1315_v12 = vld [vmem:[%s1755_s0 + $0x80] sm:$0xff]   ;;  %v1319_v16 = vld [vmem:[%s1755_s0 + $0x88] sm:$0xff]   ;;  %v1323_v20 = vld [vmem:[%s1755_s0 + $0x90] sm:$0xff]  }
   0x7   :  { %1235 = vmatpush3.bf16.msra.mxu0 %v1307_v3  ;;  %v1320_v17 = vld [vmem:[%s1755_s0 + $0x60] sm:$0xff]   ;;  %v1324_v21 = vld [vmem:[%s1755_s0 + $0x68] sm:$0xff]   ;;  %v1325_v22 = vld [vmem:[%s1755_s0 + $0xd8] sm:$0xff]  }
   0x8   :  { %1138 = vmatpush3.bf16.msra.mxu1 %v1309_v6  ;;  %1175 = vmatprep.subr.bf16.mxu0 %v1312_v9  ;;  %v1322_v19 = vld [vmem:[%s1755_s0 + $0x20] sm:$0xff]   ;;  %v1326_v23 = vld [vmem:[%s1755_s0 + $0x28] sm:$0xff]   ;;  %v1327_v24 = vld [vmem:[%s1755_s0 + $0x98] sm:$0xff]  }
   0x9   :  { %1139 = vmatprep.subr.bf16.mxu1 %v1311_v8  ;;  %v1328_v25 = vld [vmem:[%s1755_s0 + $0x70] sm:$0xff]   ;;  %v1329_v26 = vld [vmem:[%s1755_s0 + $0xe0] sm:$0xff]   ;;  %v1332_v29 = vld [vmem:[%s1755_s0 + $0x78] sm:$0xff]  }
   0xa   :  { %1237 = vmatmul.mubr.msk.bf16.vlgmr.msra.gmra.mrb[0].mxu0 %vm122_vm0, %v1313_v10  ;;  %v1330_v27 = vld [vmem:[%s1755_s0 + $0x30] sm:$0xff]   ;;  %v1331_v28 = vld [vmem:[%s1755_s0 + $0xa0] sm:$0xff]   ;;  %v1333_v30 = vld [vmem:[%s1755_s0 + $0xe8] sm:$0xff]  }
   0xb   :  { %1176 = vmatpush3.bf16.msra.mxu0 %v1315_v12  ;;  %v1334_v31 = vld [vmem:[%s1755_s0 + $0x38] sm:$0xff]   ;;  %v1335_v32 = vld [vmem:[%s1755_s0 + $0xa8] sm:$0xff]   ;;  %v1336_v33 = vld [vmem:[%s1759_s4 + $0x10] sm:$0xff]  }
   0xc   :  { %1140 = vmatpush3.bf16.msra.mxu1 %v1314_v11  ;;  %1177 = vmatprep.subr.bf16.mxu0 %v1317_v14  ;;  %v1337_v34 = vld [vmem:[%s1756_s1] ss:$20 sps:$4 sm:$0xff]   ;;  %v1339_v35 = vld [vmem:[%s1756_s1 + $0x4] ss:$20 sps:$4 sm:$0xff]   ;;  %v1347_v42 = vld [vmem:[%s1756_s1 + $0x8] ss:$20 sps:$4 sm:$0xff]  }
   0xd   :  { %1141 = vmatprep.subr.bf16.mxu1 %v1316_v13  ;;  %1240 = vmatprep.mubr.msk.bf16.mxu0 %vm122_vm0, %v1336_v33  ;;  %v1340_v36 = vld [vmem:[%s1759_s4 + $0x18] sm:$0xff]   ;;  %v1341_v37 = vld [vmem:[%s1755_s0 + $0xf0] sm:$0xff]   ;;  %v1345_v41 = vld [vmem:[%s1756_s1 + $0x2c] ss:$20 sps:$4 sm:$0xff]  }
   0xe   :  { %705 = vmatprep.mubr.bf16.mxu1 %v1339_v35  ;;  %v1342_v38 = vld [vmem:[%s1755_s0 + $0xb0] sm:$0xff]   ;;  %v1343_v39 = vld [vmem:[%s1755_s0 + $0xf8] sm:$0xff]   ;;  %v1349_v43 = vld [vmem:[%s1756_s1 + $0xc] ss:$20 sps:$4 sm:$0xff]  }
   0xf   :  { %1178 = vmatpush3.bf16.msra.mxu0 %v1319_v16  ;;  %v1344_v40 = vld [vmem:[%s1755_s0 + $0xb8] sm:$0xff]   ;;  %v1351_v45 = vld [vmem:[%s1755_s0 + $0x100] sm:$0xff]   ;;  %v1352_v46 = vld [vmem:[%s1756_s1 + $0x54] ss:$20 sps:$4 sm:$0xff]  }
  0x10   :  { %1142 = vmatpush3.bf16.msra.mxu1 %v1318_v15  ;;  %1179 = vmatprep.subr.bf16.mxu0 %v1321_v18  ;;  %v1350_v44 = vld [vmem:[%s1756_s1 + $0x28] ss:$20 sps:$4 sm:$0xff]   ;;  %v1356_v49 = vld [vmem:[%s1756_s1 + $0x50] ss:$20 sps:$4 sm:$0xff]   ;;  %v1363_v56 = vld [vmem:[%s1756_s1 + $0x78] ss:$20 sps:$4 sm:$0xff]  }
  0x11   :  { %1143 = vmatprep.subr.bf16.mxu1 %v1320_v17  ;;  %v1354_v47 = vld [vmem:[%s1756_s1 + $0x34] ss:$20 sps:$4 sm:$0xff]   ;;  %v1357_v50 = vld [vmem:[%s1756_s1 + $0x30] ss:$20 sps:$4 sm:$0xff]   ;;  %v1369_v54 = vld [vmem:[%s1755_s0 + $0x118] sm:$0xff]  }
  0x12   :  { %1241 = vmatmul.mubr.msk.bf16.gmra.mrb[4].mxu0 %vm122_vm0, %v1340_v36  ;;  %v1358_v48 = vld [vmem:[%s1755_s0 + $0x108] sm:$0xff]   ;;  %v1359_v51 = vld [vmem:[%s1756_s1 + $0x7c] ss:$20 sps:$4 sm:$0xff]   ;;  %v296_v55 = vld [vmem:[%s1757_s2] sm:$0xff] }
  0x13   :  { %1180 = vmatpush3.bf16.msra.mxu0 %v1323_v20  ;;  %770 = vmatprep.mubr.bf16.mxu0 %v1349_v43  ;;  %v1365_v52 = vld [vmem:[%s1755_s0 + $0x110] sm:$0xff]   ;;  %v42_v57 = vld [vmem:[%s1760_s5] sm:$0xff]  ;;  %v1364_v58 = vld [vmem:[%s1756_s1 + $0x58] ss:$20 sps:$4 sm:$0xff]  }
  0x14   :  { %1144 = vmatpush3.bf16.msra.mxu1 %v1322_v19  ;;  %1181 = vmatprep.subr.bf16.mxu0 %v1325_v22  ;;  %v1361_v53 = vld [vmem:[%s1756_s1 + $0x5c] ss:$20 sps:$4 sm:$0xff]   ;;  %v297_v59 = vld [vmem:[%s1757_s2 + $0x8] sm:$0xff]  ;;  %v1366_v60 = vld [vmem:[%s1756_s1 + $0x84] ss:$20 sps:$4 sm:$0xff]  }
  0x15   :  { %1145 = vmatprep.subr.bf16.mxu1 %v1324_v21  ;;  %306 = vperm.xlu0 %1302, %v296_v55   ;;  %v298_v61 = vld [vmem:[%s1757_s2 + $0x10] sm:$0xff]  ;;  %v43_v62 = vld [vmem:[%s1760_s5 + $0x8] sm:$0xff] }
  0x16   :  { %52 = vperm.xlu1 %1303, %v42_v57  }
  0x17   :  { %1182 = vmatpush3.bf16.msra.mxu0 %v1327_v24 }
  0x18   :  { %1146 = vmatpush3.bf16.msra.mxu1 %v1326_v23  ;;  %1183 = vmatprep.subr.bf16.mxu0 %v1329_v26 }
  0x19   :  { %1147 = vmatprep.subr.bf16.mxu1 %v1328_v25  ;;  %311 = vperm.xlu0 %1302, %v297_v59  }
  0x1a   :  { %316 = vperm.xlu1 %1303, %v298_v61  }
  0x1b   :  { %1184 = vmatpush3.bf16.msra.mxu0 %v1331_v28 }
  0x1c   :  { %1148 = vmatpush3.bf16.msra.mxu1 %v1330_v27  ;;  %1185 = vmatprep.subr.bf16.mxu0 %v1333_v30 }
  0x1d   :  { %1149 = vmatprep.subr.bf16.mxu1 %v1332_v29 }
  0x1f   :  { %1186 = vmatpush3.bf16.msra.mxu0 %v1335_v32 }
  0x20   :  { %1150 = vmatpush3.bf16.msra.mxu1 %v1334_v31  ;;  %1187 = vmatprep.subr.bf16.mxu0 %v1341_v37 }
  0x23   :  { %706 = vmatmul.mubr.bf16.vlgmr.msra.gmra.mrb[0].mxu1 %v1337_v34  ;;  %1188 = vmatpush3.bf16.msra.mxu0 %v1342_v38 }
  0x24   :  { %1189 = vmatprep.subr.bf16.mxu0 %v1343_v39  ;;  %713 = vmatprep.mubr.bf16.mxu1 %v1345_v41 }
  0x27   :  { %1190 = vmatpush3.bf16.msra.mxu0 %v1344_v40 }
  0x28   :  { %1244 = vmatprep.subr.bf16.mxu0 %v1351_v45 }
  0x2a   :  { %771 = vmatmul.mubr.bf16.vlgmr.msra.gmra.mrb[8].mxu0 %v1347_v42 }
  0x2b   :  { %714 = vmatmul.mubr.bf16.gmra.mrb[4].mxu1 %v1350_v44  ;;  %1245 = vmatpush3.bf16.msra.mxu0 %v1351_v45 }
  0x2c   :  { %721 = vmatprep.mubr.bf16.mxu1 %v1352_v46  ;;  %778 = vmatprep.mubr.bf16.mxu0 %v1354_v47 }
  0x2d   :  { %1246 = vmatprep.subr.bf16.mxu0 %v1358_v48 }
  0x2f   :  { %1247 = vmatpush3.bf16.msra.mxu0 %v1358_v48 }
  0x30   :  { %1248 = vmatprep.subr.bf16.mxu0 %v1365_v52 }
  0x32   :  { %779 = vmatmul.mubr.bf16.gmra.mrb[12].mxu0 %v1357_v50 }
  0x33   :  { %722 = vmatmul.mubr.bf16.gmra.mrb[8].mxu1 %v1356_v49  ;;  %786 = vmatprep.mubr.bf16.mxu0 %v1361_v53 }
  0x34   :  { %729 = vmatprep.mubr.bf16.mxu1 %v1359_v51  ;;  %1249 = vmatpush3.bf16.msra.mxu0 %v1365_v52 }
  0x35   :  { %1250 = vmatprep.subr.bf16.mxu0 %v1369_v54 }
  0x38   :  { %1251 = vmatpush3.bf16.msra.mxu0 %v1369_v54 }
  0x3a   :  { %787 = vmatmul.mubr.bf16.gmra.mrb[16].mxu0 %v1364_v58 }
  0x3b   :  { %730 = vmatmul.mubr.bf16.gmra.mrb[12].mxu1 %v1363_v56 }
  0x3c   :  { %14 = vsyncpa [#allocation3], 0  ;;  %794 = vmatprep.mubr.bf16.mxu0 %v1366_v60  ;;  %v299_v63 = vld [vmem:[%s1757_s2 + $0x18] sm:$0xff]  ;;  %57 = vperm.xlu0 %1302, %v43_v62   ;;  %v1368_v0 = vld [vmem:[%s1756_s1 + $0x80] ss:$20 sps:$4 sm:$0xff]   ;;  %vm660_vm1 = vcmask 523264  }
  0x3d   :  { %321 = vperm.xlu1 %1303, %v299_v63   ;;  %v44_v1 = vld [vmem:[%s1760_s5 + $0x10] sm:$0xff]  ;;  %v300_v3 = vld [vmem:[%s1757_s2 + $0x20] sm:$0xff]  ;;  %v45_v4 = vld [vmem:[%s1760_s5 + $0x18] sm:$0xff]  ;;  %vm884_vm2 = vcmask 64512  }
  0x3e   :  { %v1370_v2 = vld [vmem:[%s1756_s1 + $0x10] ss:$20 sps:$4 sm:$0xff]   ;;  %v301_v5 = vld [vmem:[%s1757_s2 + $0x28] sm:$0xff]  ;;  %v1372_v8 = vld [vmem:[%s1756_s1 + $0x60] ss:$20 sps:$4 sm:$0xff]  }
  0x3f   :  { %v1371_v6 = vld [vmem:[%s1756_s1 + $0x38] ss:$20 sps:$4 sm:$0xff]   ;;  %v46_v7 = vld [vmem:[%s1760_s5 + $0x20] sm:$0xff]  ;;  %v302_v9 = vld [vmem:[%s1757_s2 + $0x30] sm:$0xff] }
  0x40   :  { %62 = vperm.xlu0 %1302, %v44_v1   ;;  %v47_v10 = vld [vmem:[%s1760_s5 + $0x28] sm:$0xff]  ;;  %v303_v11 = vld [vmem:[%s1757_s2 + $0x38] sm:$0xff]  ;;  %v48_v13 = vld [vmem:[%s1760_s5 + $0x30] sm:$0xff] }
  0x41   :  { %326 = vperm.xlu1 %1303, %v300_v3   ;;  %v1373_v12 = vld [vmem:[%s1756_s1 + $0x88] ss:$20 sps:$4 sm:$0xff]   ;;  %v893_v15 = vld [vmem:[%s1761_s6] sm:$0xff]  ;;  %s1399_s1 = smov [#allocation2]  }
  0x42   :  { %795 = vmatmul.mubr.bf16.gmra.mrb[20].mxu0 %v1368_v0  ;;  %v49_v14 = vld [vmem:[%s1760_s5 + $0x38] sm:$0xff]  ;;  %1260 = vmatprep.subr.mxu1 %v893_v15  ;;  %s1036_s5 = sshll.u32 %s1399_s1, 4  ;;  %s1037_s5 = int_to_ptr.vmem [resolvable:$true] %s1036_s5 }
  0x43   :  { %1252 = vmatprep.mubr.msk.bf16.mxu0 %vm660_vm1, %v1370_v2  ;;  %1261 = vmatpush3.msra.mxu1 %v893_v15  ;;  %s1374_s6 = scalar_lea.vmem %s1037_s5, 1024  ;;  %p1379_p1 = scmp.lt.s32.totalorder %s1037_s5, %s1037_s5 }
  0x44   :  { %67 = vperm.xlu0 %1302, %v45_v4   ;;  %p1375_p0 = scmp.ne.s32.totalorder %s1037_s5, %s1374_s6  ;;  %p1380_p2 = scmp.lt.s32.totalorder %s1374_s6, %s1374_s6 }
  0x45   :  { %331 = vperm.xlu1 %1303, %v301_v5  }
  0x46   :  { %p1381_p3 = por %p1380_p2, %p1379_p1 }
  0x48   :  { %72 = vperm.xlu0 %1302, %v46_v7   ;;  %p1382_p4 = pnand %p1381_p3, %p1375_p0 }
  0x49   :  { %336 = vperm.xlu1 %1303, %v302_v9  }
  0x4a   :  { %1253 = vmatmul.mubr.msk.bf16.vlgmr.msra.gmra.mrb[0].mxu0 %vm660_vm1, %v1371_v6 }
  0x4b   :  { %1256 = vmatprep.mubr.msk.bf16.mxu0 %vm660_vm1, %v1372_v8 }
  0x4c   :  { %77 = vperm.xlu0 %1302, %v47_v10  }
  0x4d   :  { %341 = vperm.xlu1 %1303, %v303_v11  }
  0x50   :  { %82 = vperm.xlu0 %1302, %v48_v13  }
  0x51   :  { %87 = vperm.xlu1 %1303, %v49_v14  }
  0x52   :  { %1257 = vmatmul.mubr.msk.bf16.gmra.mrb[4].mxu0 %vm660_vm1, %v1373_v12 }
  0x94   :  { %v307_v18 = vpop.permute.xlu0 %306 }
  0x95   :  { %v1692_v16 = vpop.permute.xlu1 %52 }
  0x98   :  { %v312_v25 = vpop.permute.xlu0 %311 }
  0x99   :  { %v317_v20 = vpop.permute.xlu1 %316 }
  0xbb   :  { %v58_v42 = vpop.permute.xlu0 %57 }
  0xbc   :  { %v322_v26 = vpop.permute.xlu1 %321 }
  0xbf   :  { %v63_v60 = vpop.permute.xlu0 %62 }
  0xc0   :  { %v327_v44 = vpop.permute.xlu1 %326 }
  0xc3   :  { %v68_v11 = vpop.permute.xlu0 %67 }
  0xc4   :  { %v332_v62 = vpop.permute.xlu1 %331 }
  0xc8   :  { %v337_v15 = vpop.permute.xlu1 %336 }
  0xf6   :  { %v1151_v17 = vpop.f32.mrb[0].mxu1 }
  0xf7   :  { %v1152_v19 = vpop.f32.mrb[1].mxu1 }
  0xf8   :  { %v1153_v21 = vadd.f32 %v1152_v19, %v1151_v17  ;;  %v1154_v22 = vpop.f32.mrb[2].mxu1 }
  0xf9   :  { %v1155_v23 = vpop.f32.mrb[3].mxu1 }
  0xfa   :  { %v1156_v24 = vadd.f32 %v1155_v23, %v1154_v22  ;;  %v708_v28 = vadd.f32 %v1153_v21, %v307_v18 }
  0xfc   :  { %v711_v34 = vadd.f32 %v1156_v24, %v312_v25  ;;  %v342_v24 = vpop.permute.xlu1 %341 }
  0xfd   :  { %v1191_v29 = vpop.f32.mrb[8].mxu0 }
  0xfe   :  { %v1157_v27 = vpop.f32.mrb[4].mxu1  ;;  %v1192_v31 = vpop.f32.mrb[9].mxu0 }
  0xff   :  { %v1158_v30 = vpop.f32.mrb[5].mxu1  ;;  %v1193_v35 = vadd.f32 %v1192_v31, %v1191_v29  ;;  %v1194_v36 = vpop.f32.mrb[10].mxu0 }
 0x100   :  { %v1159_v32 = vadd.f32 %v1158_v30, %v1157_v27  ;;  %v1160_v33 = vpop.f32.mrb[6].mxu1  ;;  %v1195_v38 = vpop.f32.mrb[11].mxu0 }
 0x101   :  { %v1161_v37 = vpop.f32.mrb[7].mxu1  ;;  %v773_v40 = vadd.f32 %v1193_v35, %v708_v28  ;;  %v1196_v41 = vadd.f32 %v1195_v38, %v1194_v36 }
 0x102   :  { %v1162_v39 = vadd.f32 %v1161_v37, %v1160_v33  ;;  %v716_v46 = vadd.f32 %v1159_v32, %v317_v20  ;;  %v73_v20 = vpop.permute.xlu0 %72 }
 0x103   :  { %v776_v43 = vadd.f32 %v1196_v41, %v711_v34  ;;  %v1276_v33 = vadd.f32 %v773_v40, %v1692_v16  ;;  %v88_v40 = vpop.permute.xlu1 %87 }
 0x104   :  { %v719_v52 = vadd.f32 %v1162_v39, %v322_v26 }
 0x105   :  { %v1197_v47 = vpop.f32.mrb[12].mxu0  ;;  %v1280_v39 = vadd.f32 %v776_v43, %v58_v42 }
 0x106   :  { %v1163_v45 = vpop.f32.mrb[8].mxu1  ;;  %v1198_v49 = vpop.f32.mrb[13].mxu0 }
 0x107   :  { %v1164_v48 = vpop.f32.mrb[9].mxu1  ;;  %v1199_v53 = vadd.f32 %v1198_v49, %v1197_v47  ;;  %v1200_v54 = vpop.f32.mrb[14].mxu0 }
 0x108   :  { %v1165_v50 = vadd.f32 %v1164_v48, %v1163_v45  ;;  %v1166_v51 = vpop.f32.mrb[10].mxu1  ;;  %v1201_v56 = vpop.f32.mrb[15].mxu0 }
 0x109   :  { %v1167_v55 = vpop.f32.mrb[11].mxu1  ;;  %v781_v58 = vadd.f32 %v1199_v53, %v716_v46  ;;  %v1202_v59 = vadd.f32 %v1201_v56, %v1200_v54  ;;  %v78_v31 = vpop.permute.xlu0 %77 }
 0x10a   :  { %v1168_v57 = vadd.f32 %v1167_v55, %v1166_v51  ;;  %v724_v0 = vadd.f32 %v1165_v50, %v327_v44 }
 0x10b   :  { %v784_v61 = vadd.f32 %v1202_v59, %v719_v52  ;;  %v1274_v30 = vadd.f32 %v781_v58, %v63_v60 }
 0x10c   :  { %v727_v12 = vadd.f32 %v1168_v57, %v332_v62 }
 0x10d   :  { %v1203_v1 = vpop.f32.mrb[16].mxu0  ;;  %v1278_v36 = vadd.f32 %v784_v61, %v68_v11  ;;  %v83_v49 = vpop.permute.xlu0 %82 }
 0x10e   :  { %v1169_v63 = vpop.f32.mrb[12].mxu1  ;;  %v1204_v4 = vpop.f32.mrb[17].mxu0 }
 0x10f   :  { %v1170_v2 = vpop.f32.mrb[13].mxu1  ;;  %v1205_v6 = vadd.f32 %v1204_v4, %v1203_v1  ;;  %v1206_v7 = vpop.f32.mrb[18].mxu0 }
 0x110   :  { %v1171_v3 = vadd.f32 %v1170_v2, %v1169_v63  ;;  %v1172_v5 = vpop.f32.mrb[14].mxu1  ;;  %v1207_v10 = vpop.f32.mrb[19].mxu0 }
 0x111   :  { %v1173_v8 = vpop.f32.mrb[15].mxu1  ;;  %v789_v13 = vadd.f32 %v1205_v6, %v724_v0  ;;  %v1208_v14 = vadd.f32 %v1207_v10, %v1206_v7 }
 0x112   :  { %v1174_v9 = vadd.f32 %v1173_v8, %v1172_v5  ;;  %v732_v21 = vadd.f32 %v1171_v3, %v337_v15 }
 0x113   :  { %v792_v17 = vadd.f32 %v1208_v14, %v727_v12  ;;  %v1284_v43 = vadd.f32 %v789_v13, %v73_v20 }
 0x114   :  { %v735_v26 = vadd.f32 %v1174_v9, %v342_v24 }
 0x115   :  { %v1209_v18 = vpop.f32.mrb[20].mxu0  ;;  %v1288_v56 = vadd.f32 %v792_v17, %v78_v31 }
 0x116   :  { %v1210_v19 = vpop.f32.mrb[21].mxu0 }
 0x117   :  { %v1211_v22 = vadd.f32 %v1210_v19, %v1209_v18  ;;  %v1212_v23 = vpop.f32.mrb[22].mxu0 }
 0x118   :  { %v1213_v25 = vpop.f32.mrb[23].mxu0 }
 0x119   :  { %v797_v27 = vadd.f32 %v1211_v22, %v732_v21  ;;  %v1214_v28 = vadd.f32 %v1213_v25, %v1212_v23 }
 0x11b   :  { %v800_v29 = vadd.f32 %v1214_v28, %v735_v26  ;;  %v1282_v16 = vadd.f32 %v797_v27, %v83_v49 }
 0x11d   :  { %v1254_v32 = vpop.f32.mrb[0].mxu0  ;;  %v1286_v53 = vadd.f32 %v800_v29, %v88_v40 }
 0x11e   :  { %v1275_v34 = vadd.f32 %v1274_v30, %v1254_v32  ;;  %v837_v35 = vpop.f32.mrb[1].mxu0 }
 0x11f   :  { %v1277_v37 = vadd.f32 %v1276_v33, %v837_v35  ;;  %v1255_v38 = vpop.f32.mrb[2].mxu0 }
 0x120   :  { %v878_v41 = vmax.f32 %v1275_v34, 0.0  ;;  %v1279_v44 = vadd.f32 %v1278_v36, %v1255_v38  ;;  %v840_v45 = vpop.f32.mrb[3].mxu0 }
 0x121   :  { %v876_v46 = vmax.f32 %v1277_v37, 0.0  ;;  %v1281_v47 = vadd.f32 %v1280_v39, %v840_v45 }
 0x122   :  { %887 = vst.msk [vmem:[#allocation2 + $0x10] sm:$0xff] %vm884_vm2, %v878_v41  ;;  %v879_v48 = vmax.f32 %v1279_v44, 0.0 }
 0x123   :  { %885 = vst.msk [vmem:[#allocation2] sm:$0xff] %vm884_vm2, %v876_v46  ;;  %v877_v50 = vmax.f32 %v1281_v47, 0.0  ;;  %1262 = vmatprep.mubr.msk.f32.mxu1 %vm884_vm2, %v876_v46 }
 0x124   :  { %888 = vst.msk [vmem:[#allocation2 + $0x18] sm:$0xff] %vm884_vm2, %v879_v48 }
 0x125   :  { %886 = vst.msk [vmem:[#allocation2 + $0x8] sm:$0xff] %vm884_vm2, %v877_v50  ;;  %v1258_v42 = vpop.f32.mrb[4].mxu0  ;;  %1263 = vmatmul.mubr.msk.f32.vlgmr.msra.gmra.mrb[16].mxu1 %vm884_vm2, %v877_v50 }
 0x126   :  { %v1283_v51 = vadd.f32 %v1282_v16, %v1258_v42  ;;  %v853_v52 = vpop.f32.mrb[5].mxu0  ;;  %1265 = vmatprep.mubr.msk.f32.mxu1 %vm884_vm2, %v878_v41 }
 0x127   :  { %v1285_v54 = vadd.f32 %v1284_v43, %v853_v52  ;;  %v1259_v55 = vpop.f32.mrb[6].mxu0 }
 0x128   :  { %v882_v57 = vmax.f32 %v1283_v51, 0.0  ;;  %v1287_v58 = vadd.f32 %v1286_v53, %v1259_v55  ;;  %v856_v59 = vpop.f32.mrb[7].mxu0 }
 0x129   :  { %v880_v60 = vmax.f32 %v1285_v54, 0.0  ;;  %v1289_v61 = vadd.f32 %v1288_v56, %v856_v59  ;;  %1266 = vmatmul.mubr.msk.f32.gmra.mrb[18].mxu1 %vm884_vm2, %v879_v48 }
 0x12a   :  { %891 = vst.msk [vmem:[#allocation2 + $0x30] sm:$0xff] %vm884_vm2, %v882_v57  ;;  %v883_v62 = vmax.f32 %v1287_v58, 0.0 }
 0x12b   :  { %889 = vst.msk [vmem:[#allocation2 + $0x20] sm:$0xff] %vm884_vm2, %v880_v60  ;;  %v881_v63 = vmax.f32 %v1289_v61, 0.0  ;;  %1268 = vmatprep.mubr.msk.f32.mxu1 %vm884_vm2, %v880_v60 }
 0x12c   :  { %892 = vst.msk [vmem:[#allocation2 + $0x38] sm:$0xff] %vm884_vm2, %v883_v62 }
 0x12d   :  { %890 = vst.msk [vmem:[#allocation2 + $0x28] sm:$0xff] %vm884_vm2, %v881_v63  ;;  %1269 = vmatmul.mubr.msk.f32.gmra.mrb[20].mxu1 %vm884_vm2, %v881_v63 }
 0x12e   :  { %1271 = vmatprep.mubr.msk.f32.mxu1 %vm884_vm2, %v882_v57 }
 0x131   :  { %1272 = vmatmul.mubr.msk.f32.gmra.mrb[22].mxu1 %vm884_vm2, %v883_v62 }
 0x132   :  { %1385 = shalt.err (!%p1382_p4)
}
 0x133   :  { %s1386_s19 = scalar_lea.hbm %s1762_s7, 1024 }
 0x134   :  { %p1387_p5 = scmp.ne.s32.totalorder %s1762_s7, %s1386_s19  ;;  %p1390_p6 = scmp.lt.u32.totalorder %s1386_s19, %s1762_s7 }
 0x136   :  { %p1392_p7 = pnand %p1390_p6, %p1387_p5 }
 0x138   :  { %1395 = shalt.err (!%p1392_p7)
}
 0x139   :  { %s1400_s0 = smov 128   ;;  %s1401_s24 = smov 8  }
 0x13a   :  { %1042 = dma.vmem_to_hbm [thread:$0]  %s1037_s5, 1024, %s1762_s7, [#allocation3], %s1400_s0, %s1400_s0, %s1401_s24  }
 0x1f8   :  { %v1264_v0 = vpop.f32.mrb[16].mxu1 }
 0x1f9   :  { %1024 = vst.msk [vmem:[%s1763_s8 + $0x8] sm:$0xff] %vm884_vm2, %v1264_v0  ;;  %v984_v1 = vpop.f32.mrb[17].mxu1 }
 0x1fa   :  { %1023 = vst.msk [vmem:[%s1763_s8] sm:$0xff] %vm884_vm2, %v984_v1 }
 0x1fc   :  { %v1267_v2 = vpop.f32.mrb[18].mxu1 }
 0x1fd   :  { %1026 = vst.msk [vmem:[%s1763_s8 + $0x18] sm:$0xff] %vm884_vm2, %v1267_v2  ;;  %v994_v3 = vpop.f32.mrb[19].mxu1 }
 0x1fe   :  { %1025 = vst.msk [vmem:[%s1763_s8 + $0x10] sm:$0xff] %vm884_vm2, %v994_v3 }
 0x200   :  { %v1270_v4 = vpop.f32.mrb[20].mxu1 }
 0x201   :  { %1028 = vst.msk [vmem:[%s1763_s8 + $0x28] sm:$0xff] %vm884_vm2, %v1270_v4  ;;  %v1004_v5 = vpop.f32.mrb[21].mxu1 }
 0x202   :  { %1027 = vst.msk [vmem:[%s1763_s8 + $0x20] sm:$0xff] %vm884_vm2, %v1004_v5 }
 0x204   :  { %v1273_v6 = vpop.f32.mrb[22].mxu1 }
 0x205   :  { %1030 = vst.msk [vmem:[%s1763_s8 + $0x38] sm:$0xff] %vm884_vm2, %v1273_v6  ;;  %v1014_v7 = vpop.f32.mrb[23].mxu1 }
 0x206   :  { %1029 = vst.msk [vmem:[%s1763_s8 + $0x30] sm:$0xff] %vm884_vm2, %v1014_v7 }
 0x207   :  { %1396 = dma.done.wait [#allocation3], 1024  }
 0x208   :  { %1397 = vsyncadd [#allocation3], 4294966272 }
 0x209   :  { %1050 = vsyncpa [#allocation3], 1 }

</bundles_post_ra>
